<compile_context>
chip_gen: v7x
topology: tpu7x:2x2x1
jax: 0.10.0
libtpu: 0.0.40
codegen_flags: <defaults>
</compile_context>

<pallas_src>
import jax
import jax.numpy as jnp
import numpy as np
from jax.experimental import pallas as pl
from jax.experimental.pallas import tpu as pltpu  # noqa: F401  (TPU backend assumed)

# ----------------------------- config ----------------------------------------
CFG = dict(
    num_joints=17,
    enc_num_blocks=2, enc_hidden_dim=32, enc_hidden_inter_dim=64, enc_token_inter_dim=64,
    dec_num_blocks=2, dec_hidden_dim=32, dec_hidden_inter_dim=64, dec_token_inter_dim=64,
    token_num=8, token_class_num=32, token_dim=32,
)

LANES = 128  # lane width of the packed weight / output slabs


def _rup(n, m):
    return (n + m - 1) // m * m


# --------------------------- in-kernel helpers --------------------------------
def _ln(x, g, b, eps=1e-5):
    mu = jnp.mean(x, axis=-1, keepdims=True)
    var = jnp.mean((x - mu) ** 2, axis=-1, keepdims=True)   # biased, like torch
    return (x - mu) * jax.lax.rsqrt(var + eps) * g + b


def _gelu(x):
    # exact erf GELU == torch.nn.GELU() default
    return 0.5 * x * (1.0 + jax.lax.erf(x * 0.7071067811865476))


def _mm(a, b, bf16=False):
    # bf16 operands / f32 accumulation for decoder-side matmuls; f32 elsewhere.
    if bf16:
        a = a.astype(jnp.bfloat16)
        b = b.astype(jnp.bfloat16)
    return jnp.dot(a, b, preferred_element_type=jnp.float32)


# ----------------------------- weight slab packer ------------------------------
class _SlabPacker:
    """Packs many small 2-D tensors into one (rows, LANES) f32 slab.

    Each tensor starts at a sublane-aligned (multiple of 8) row offset and lane 0;
    the layout dict maps name -> (row_offset, rows, cols) as Python ints so the
    kernel can unpack with zero-cost static slices."""

    def __init__(self):
        self.pieces = []
        self.layout = {}
        self.rows = 0

    def add(self, name, arr):
        arr = jnp.asarray(arr, jnp.float32)
        r, c = arr.shape
        assert c <= LANES, (name, arr.shape)
        self.layout[name] = (self.rows, int(r), int(c))
        self.pieces.append(jnp.pad(arr, ((0, _rup(r, 8) - r), (0, LANES - c))))
        self.rows += _rup(r, 8)

    def pack(self):
        return jnp.concatenate(self.pieces, axis=0), self.layout


def prepare_params(params, B, cfg):
    """One-time (eager, cached) weight prep: kron block-diag over batch, transposes,
    bias pre-broadcasts, codebook folds.  Returns (weight_slab, layout)."""
    J, H, Hd = cfg['num_joints'], cfg['enc_hidden_dim'], cfg['dec_hidden_dim']
    eyeB = jnp.eye(B, dtype=jnp.float32)
    blk_diag_t = lambda w: jnp.kron(eyeB, w.T)                       # (in,out) -> (B*out, B*in)
    col = lambda bias: jnp.tile(jnp.reshape(bias, (-1, 1)), (B, 1))  # (1,out)  -> (B*out, 1)

    pk = _SlabPacker()
    pk.add("start_w", params['start_w'])
    pk.add("start_b", params['start_b'])
    pk.add("inv_tok", params['inv_token'])

    def add_mixer(pfx, p, hidden):
        l1g, l1b, tw1, tb1, tw2, tb2, l2g, l2b, cw1, cb1, cw2, cb2 = p
        pk.add(pfx + "_ln1", jnp.concatenate([l1g, l1b], axis=0))
        pk.add(pfx + "_tw1", blk_diag_t(tw1))
        pk.add(pfx + "_tb1", jnp.tile(col(tb1), (1, hidden)))   # pre-broadcast bias
        pk.add(pfx + "_tw2", blk_diag_t(tw2))
        pk.add(pfx + "_tb2", jnp.tile(col(tb2), (1, hidden)))   # pre-broadcast bias
        pk.add(pfx + "_ln2", jnp.concatenate([l2g, l2b], axis=0))
        pk.add(pfx + "_cw1", cw1)
        pk.add(pfx + "_cb1", cb1)
        pk.add(pfx + "_cw2", cw2)
        pk.add(pfx + "_cb2", cb2)

    for i, blk in enumerate(params['enc_blocks']):
        add_mixer(f"enc{i}", blk, H)

    pk.add("enc_ln", jnp.concatenate([params['enc_ln_g'], params['enc_ln_b']], axis=0))
    pk.add("tok_w", blk_diag_t(params['token_mlp_w']))
    pk.add("tok_b", jnp.tile(col(params['token_mlp_b']), (1, H)))
    pk.add("feat_w", params['feat_w'])
    pk.add("feat_b", params['feat_b'])

    cb = params['codebook']
    pk.add("cbook_t", cb.T)
    pk.add("cbook_sq", jnp.sum(cb * cb, axis=1)[None, :])

    # Fold codebook + decoder_token_mlp bias through decoder_start:
    #   y = dtok_w @ (onehot @ (cbook @ dstart_w)) + (dtok_b_col @ colsum(dstart_w) + dstart_b)
    dstart_w, dstart_b = params['dec_start_w'], params['dec_start_b']
    pk.add("dtok_w", blk_diag_t(params['dec_token_mlp_w']))
    pk.add("dec_P", cb @ dstart_w)
    colsum = jnp.sum(dstart_w, axis=0, keepdims=True)
    pk.add("dec_bfold", col(params['dec_token_mlp_b']) @ colsum + dstart_b)

    for i, blk in enumerate(params['dec_blocks']):
        add_mixer(f"dec{i}", blk, Hd)

    pk.add("dec_ln", jnp.concatenate([params['dec_ln_g'], params['dec_ln_b']], axis=0))
    pk.add("rec_w", params['rec_w'])
    pk.add("rec_b", params['rec_b'])
    return pk.pack()


# ------------------------------- fused kernel ---------------------------------
def make_fused_kernel(layout, B, cfg):
    J, M, C = cfg['num_joints'], cfg['token_num'], cfg['token_class_num']
    n_enc, n_dec = cfg['enc_num_blocks'], cfg['dec_num_blocks']
    BJ, BM = B * J, B * M
    REC_ROWS, DIST_ROWS = _rup(BJ, 8), _rup(BM, 8)

    def kernel(jin_ref, w_ref, out_ref):
        def get(name):
            r0, r, c = layout[name]          # Python ints -> static slices
            return w_ref[r0:r0 + r, 0:c]

        def mixer(x, pfx, bf16):
            ln1 = get(pfx + "_ln1")
            y = _ln(x, ln1[0:1, :], ln1[1:2, :])
            h = _gelu(_mm(get(pfx + "_tw1"), y, bf16) + get(pfx + "_tb1"))
            ytok = _mm(get(pfx + "_tw2"), h, bf16) + get(pfx + "_tb2")
            ln2 = get(pfx + "_ln2")
            z = _ln(x + ytok, ln2[0:1, :], ln2[1:2, :])
            h2 = _gelu(_mm(z, get(pfx + "_cw1"), bf16) + get(pfx + "_cb1"))
            zc = _mm(h2, get(pfx + "_cw2"), bf16) + get(pfx + "_cb2")
            return x + ytok + zc

        jin = jin_ref[...]                                        # (BJ, 3)
        coord = jin[:, 0:2]
        vis = (jin[:, 2:3] != 0.0).astype(jnp.float32)

        # ------------------------------ encoder (f32) ------------------------
        x = _mm(coord, get("start_w")) + get("start_b")           # (BJ, H)
        x = x * vis + get("inv_tok") * (1.0 - vis)                # invisible-token mask
        for i in range(n_enc):
            x = mixer(x, f"enc{i}", False)
        eln = get("enc_ln")
        x = _ln(x, eln[0:1, :], eln[1:2, :])
        t = _mm(get("tok_w"), x) + get("tok_b")                   # (BM, H)  token_mlp
        feat = _mm(t, get("feat_w")) + get("feat_b")              # (BM, D)  feature_embed

        # ------------------------ vector quantization (f32) ------------------
        f2 = jnp.sum(feat * feat, axis=1, keepdims=True)          # (BM, 1)
        d = f2 + get("cbook_sq") - 2.0 * _mm(feat, get("cbook_t"))  # (BM, C)
        ids = jax.lax.broadcasted_iota(jnp.int32, d.shape, 1)
        dmin = jnp.min(d, axis=1, keepdims=True)
        idx = jnp.min(jnp.where(d <= dmin, ids, C), axis=1, keepdims=True)  # first argmin
        onehot = (ids == idx).astype(jnp.float32)                 # (BM, C)

        # ------------------- decoder (bf16 operands, f32 acc) ----------------
        sel = _mm(onehot, get("dec_P"), True)                     # (BM, Hd)  onehot @ (cbook@dstart_w)
        y = _mm(get("dtok_w"), sel, True) + get("dec_bfold")      # (BJ, Hd)
        for i in range(n_dec):
            y = mixer(y, f"dec{i}", True)
        dln = get("dec_ln")
        y = _ln(y, dln[0:1, :], dln[1:2, :])
        rec = _mm(y, get("rec_w"), True) + get("rec_b")           # (BJ, 2)

        # --------------- pack one lane-dense output slab ----------------------
        rec_blk = jnp.concatenate(
            [rec, jnp.zeros((BJ, LANES - 2), jnp.float32)], axis=1)
        if REC_ROWS > BJ:
            rec_blk = jnp.concatenate(
                [rec_blk, jnp.zeros((REC_ROWS - BJ, LANES), jnp.float32)], axis=0)
        di_blk = jnp.concatenate(
            [d, idx.astype(jnp.float32),
             jnp.zeros((BM, LANES - C - 1), jnp.float32)], axis=1)
        if DIST_ROWS > BM:
            di_blk = jnp.concatenate(
                [di_blk, jnp.zeros((DIST_ROWS - BM, LANES), jnp.float32)], axis=0)
        out_ref[...] = jnp.concatenate([rec_blk, di_blk], axis=0)  # single unmasked store

    return kernel, REC_ROWS + DIST_ROWS


# ------------------------------ full forward ----------------------------------
def pct_tokenizer_forward(joints, wslab, layout, cfg):
    """Eval-time forward, stage_pct='tokenizer', train=False. Exactly one pallas_call."""
    B, J, _ = joints.shape
    M, C = cfg['token_num'], cfg['token_class_num']
    BJ, BM = B * J, B * M
    REC_ROWS = _rup(BJ, 8)

    kernel, out_rows = make_fused_kernel(layout, B, cfg)
    out = pl.pallas_call(
        kernel,
        out_shape=jax.ShapeDtypeStruct((out_rows, LANES), jnp.float32),
    )(joints.reshape(BJ, 3), wslab)

    rec = out[:BJ, :2].reshape(B, J, 2)
    dist = out[REC_ROWS:REC_ROWS + BM, :C]
    idx = out[REC_ROWS:REC_ROWS + BM, C].astype(jnp.int32)
    e_latent_loss = None
    return rec, idx, e_latent_loss, dist


# -------------------------- deterministic params -------------------------------
def init_params(key, cfg):
    J, H, Hd = cfg['num_joints'], cfg['enc_hidden_dim'], cfg['dec_hidden_dim']
    M, C, D = cfg['token_num'], cfg['token_class_num'], cfg['token_dim']
    keys = iter(jax.random.split(key, 256))

    def nrm(shape, std=0.02):
        return (std * jax.random.normal(next(keys), shape)).astype(jnp.float32)

    def mixer_block(tokens, hidden, token_inter, hidden_inter):
        return [
            1.0 + nrm((1, hidden)), nrm((1, hidden)),            # ln1 gamma/beta
            nrm((tokens, token_inter)), nrm((1, token_inter)),   # MLP_token fc1
            nrm((token_inter, tokens)), nrm((1, tokens)),        # MLP_token fc2
            1.0 + nrm((1, hidden)), nrm((1, hidden)),            # ln2 gamma/beta
            nrm((hidden, hidden_inter)), nrm((1, hidden_inter)), # MLP_channel fc1
            nrm((hidden_inter, hidden)), nrm((1, hidden)),       # MLP_channel fc2
        ]

    return dict(
        start_w=nrm((2, H)), start_b=nrm((1, H)),
        inv_token=nrm((1, H)),                                   # trunc_normal(std=0.02) stand-in
        enc_blocks=[mixer_block(J, H, cfg['enc_token_inter_dim'], cfg['enc_hidden_inter_dim'])
                    for _ in range(cfg['enc_num_blocks'])],
        enc_ln_g=1.0 + nrm((1, H)), enc_ln_b=nrm((1, H)),
        token_mlp_w=nrm((J, M)), token_mlp_b=nrm((1, M)),
        feat_w=nrm((H, D)), feat_b=nrm((1, D)),
        codebook=jax.random.normal(next(keys), (C, D)).astype(jnp.float32),
        dec_token_mlp_w=nrm((M, J)), dec_token_mlp_b=nrm((1, J)),
        dec_start_w=nrm((D, Hd)), dec_start_b=nrm((1, Hd)),
        dec_blocks=[mixer_block(J, Hd, cfg['dec_token_inter_dim'], cfg['dec_hidden_inter_dim'])
                    for _ in range(cfg['dec_num_blocks'])],
        dec_ln_g=1.0 + nrm((1, Hd)), dec_ln_b=nrm((1, Hd)),
        rec_w=nrm((Hd, 2)), rec_b=nrm((1, 2)),
    )


# ------------------------------ pure-JAX reference ------------------------------
def reference_forward(joints, params, cfg):
    B, J, _ = joints.shape
    M, D = cfg['token_num'], cfg['token_dim']
    coord = joints[:, :, :2]
    vis = (joints[:, :, 2:3] != 0.0).astype(jnp.float32)

    def ln(x, g, b):
        mu = x.mean(-1, keepdims=True)
        var = ((x - mu) ** 2).mean(-1, keepdims=True)
        return (x - mu) / jnp.sqrt(var + 1e-5) * g + b

    gelu = lambda x: 0.5 * x * (1.0 + jax.lax.erf(x / jnp.sqrt(2.0)))

    def mixer(x, p):
        l1g, l1b, tw1, tb1, tw2, tb2, l2g, l2b, cw1, cb1, cw2, cb2 = p
        y = ln(x, l1g, l1b)
        y = jnp.swapaxes(gelu(jnp.swapaxes(y, 1, 2) @ tw1 + tb1) @ tw2 + tb2, 1, 2)
        z = ln(x + y, l2g, l2b)
        z = gelu(z @ cw1 + cb1) @ cw2 + cb2
        return x + y + z

    x = coord @ params['start_w'] + params['start_b']
    x = x * vis + params['inv_token'] * (1.0 - vis)
    for p in params['enc_blocks']:
        x = mixer(x, p)
    x = ln(x, params['enc_ln_g'], params['enc_ln_b'])
    x = jnp.swapaxes(jnp.swapaxes(x, 1, 2) @ params['token_mlp_w'] + params['token_mlp_b'], 1, 2)
    feat = (x @ params['feat_w'] + params['feat_b']).reshape(B * M, D)
    cb = params['codebook']
    dist = (jnp.sum(feat ** 2, 1, keepdims=True) + jnp.sum(cb ** 2, 1)[None, :]
            - 2.0 * feat @ cb.T)
    idx = jnp.argmin(dist, axis=1)
    part = cb[idx].reshape(B, M, D)
    y = jnp.swapaxes(jnp.swapaxes(part, 1, 2) @ params['dec_token_mlp_w']
                     + params['dec_token_mlp_b'], 1, 2)
    y = y @ params['dec_start_w'] + params['dec_start_b']
    for p in params['dec_blocks']:
        y = mixer(y, p)
    y = ln(y, params['dec_ln_g'], params['dec_ln_b'])
    rec = y @ params['rec_w'] + params['rec_b']
    return rec, idx, dist


# ------------------------------------ main --------------------------------------
if __name__ == "__main__":
    key = jax.random.PRNGKey(0)
    pkey, ckey, vkey = jax.random.split(key, 3)
    params = init_params(pkey, CFG)

    B, J = 2, CFG['num_joints']
    coords = jax.random.uniform(ckey, (B, J, 2), jnp.float32)
    visible = (jax.random.uniform(vkey, (B, J, 1)) > 0.2).astype(jnp.float32)
    joints = jnp.concatenate([coords, visible], axis=-1)          # (B, J, 3)

    # One-time weight prep (kron / transposes / bias broadcasts / codebook folds),
    # cached outside the jitted forward so every call is exactly one pallas_call.
    wslab, layout = prepare_params(params, B, CFG)
    wslab = jax.device_put(wslab)

    fwd = jax.jit(lambda j, w: pct_tokenizer_forward(j, w, layout, CFG))
    rec, idx, e_latent_loss, dist = fwd(joints, wslab)
    jax.block_until_ready(rec)

    rec_ref, idx_ref, dist_ref = reference_forward(joints, params, CFG)
    np.testing.assert_allclose(np.asarray(dist), np.asarray(dist_ref), rtol=2e-2, atol=2e-2)
    np.testing.assert_array_equal(np.asarray(idx), np.asarray(idx_ref))
    np.testing.assert_allclose(np.asarray(rec), np.asarray(rec_ref), rtol=2e-2, atol=2e-2)

    print("KERNEL_OK")
</pallas_src>

<mosaic_0001>
module attributes {stable_mosaic.version = 11 : i64} {
  func.func @kernel(%arg0: memref<34x3xf32, #tpu.memory_space<vmem>>, %arg1: memref<2160x128xf32, #tpu.memory_space<vmem>>, %arg2: memref<56x128xf32, #tpu.memory_space<vmem>>) attributes {dimension_semantics = [], scalar_prefetch = 0 : i64, scratch_operands = 0 : i64, tpu.core_type = #tpu.core_type<tc>} {
    %c0 = arith.constant 0 : index
    %c0_0 = arith.constant 0 : index
    %0 = vector.load %arg0[%c0, %c0_0] : memref<34x3xf32, #tpu.memory_space<vmem>>, vector<34x3xf32>
    %1 = vector.extract_strided_slice %0 {offsets = [0, 0], sizes = [34, 2], strides = [1, 1]} : vector<34x3xf32> to vector<34x2xf32>
    %2 = vector.extract_strided_slice %0 {offsets = [0, 2], sizes = [34, 1], strides = [1, 1]} : vector<34x3xf32> to vector<34x1xf32>
    %cst = arith.constant 0.000000e+00 : f32
    %3 = vector.broadcast %cst : f32 to vector<34x1xf32>
    %4 = arith.cmpf one, %2, %3 : vector<34x1xf32>
    %5 = arith.extui %4 : vector<34x1xi1> to vector<34x1xi32>
    %6 = arith.sitofp %5 : vector<34x1xi32> to vector<34x1xf32>
    %c0_1 = arith.constant 0 : index
    %c0_2 = arith.constant 0 : index
    %7 = vector.load %arg1[%c0_1, %c0_2] : memref<2160x128xf32, #tpu.memory_space<vmem>>, vector<2x32xf32>
    %cst_3 = arith.constant dense<0.000000e+00> : vector<34x32xf32>
    %8 = tpu.matmul %1, %7, %cst_3 {dimension_numbers = #tpu.dot_dimension_numbers<[1], [0], [0], [1], [0, 0, 1, 1], [], []>} : vector<34x2xf32>, vector<2x32xf32>, vector<34x32xf32> -> vector<34x32xf32>
    %c8 = arith.constant 8 : index
    %c0_4 = arith.constant 0 : index
    %9 = vector.load %arg1[%c8, %c0_4] : memref<2160x128xf32, #tpu.memory_space<vmem>>, vector<1x32xf32>
    %10 = vector.broadcast %9 : vector<1x32xf32> to vector<34x32xf32>
    %11 = arith.addf %8, %10 : vector<34x32xf32>
    %12 = vector.broadcast %6 : vector<34x1xf32> to vector<34x32xf32>
    %13 = arith.mulf %11, %12 : vector<34x32xf32>
    %c16 = arith.constant 16 : index
    %c0_5 = arith.constant 0 : index
    %14 = vector.load %arg1[%c16, %c0_5] : memref<2160x128xf32, #tpu.memory_space<vmem>>, vector<1x32xf32>
    %cst_6 = arith.constant 1.000000e+00 : f32
    %15 = vector.broadcast %cst_6 : f32 to vector<34x1xf32>
    %16 = arith.subf %15, %6 : vector<34x1xf32>
    %17 = vector.broadcast %14 : vector<1x32xf32> to vector<34x32xf32>
    %18 = vector.broadcast %16 : vector<34x1xf32> to vector<34x32xf32>
    %19 = arith.mulf %17, %18 : vector<34x32xf32>
    %20 = arith.addf %13, %19 : vector<34x32xf32>
    %c24 = arith.constant 24 : index
    %c0_7 = arith.constant 0 : index
    %21 = vector.load %arg1[%c24, %c0_7] : memref<2160x128xf32, #tpu.memory_space<vmem>>, vector<2x32xf32>
    %22 = vector.extract_strided_slice %21 {offsets = [0, 0], sizes = [1, 32], strides = [1, 1]} : vector<2x32xf32> to vector<1x32xf32>
    %23 = vector.extract_strided_slice %21 {offsets = [1, 0], sizes = [1, 32], strides = [1, 1]} : vector<2x32xf32> to vector<1x32xf32>
    %cst_8 = arith.constant dense<0.000000e+00> : vector<34xf32>
    %24 = vector.multi_reduction <add>, %20, %cst_8 [1] : vector<34x32xf32> to vector<34xf32>
    %25 = vector.shape_cast %24 : vector<34xf32> to vector<34x1xf32>
    %cst_9 = arith.constant 3.200000e+01 : f32
    %26 = vector.broadcast %cst_9 : f32 to vector<34x1xf32>
    %27 = arith.divf %25, %26 : vector<34x1xf32>
    %28 = vector.broadcast %27 : vector<34x1xf32> to vector<34x32xf32>
    %29 = arith.subf %20, %28 : vector<34x32xf32>
    %30 = arith.mulf %29, %29 : vector<34x32xf32>
    %cst_10 = arith.constant dense<0.000000e+00> : vector<34xf32>
    %31 = vector.multi_reduction <add>, %30, %cst_10 [1] : vector<34x32xf32> to vector<34xf32>
    %32 = vector.shape_cast %31 : vector<34xf32> to vector<34x1xf32>
    %cst_11 = arith.constant 3.200000e+01 : f32
    %33 = vector.broadcast %cst_11 : f32 to vector<34x1xf32>
    %34 = arith.divf %32, %33 : vector<34x1xf32>
    %35 = vector.broadcast %27 : vector<34x1xf32> to vector<34x32xf32>
    %36 = arith.subf %20, %35 : vector<34x32xf32>
    %cst_12 = arith.constant 9.99999974E-6 : f32
    %37 = vector.broadcast %cst_12 : f32 to vector<34x1xf32>
    %38 = arith.addf %34, %37 : vector<34x1xf32>
    %39 = math.rsqrt %38 : vector<34x1xf32>
    %40 = vector.broadcast %39 : vector<34x1xf32> to vector<34x32xf32>
    %41 = arith.mulf %36, %40 : vector<34x32xf32>
    %42 = vector.broadcast %22 : vector<1x32xf32> to vector<34x32xf32>
    %43 = arith.mulf %41, %42 : vector<34x32xf32>
    %44 = vector.broadcast %23 : vector<1x32xf32> to vector<34x32xf32>
    %45 = arith.addf %43, %44 : vector<34x32xf32>
    %c32 = arith.constant 32 : index
    %c0_13 = arith.constant 0 : index
    %46 = vector.load %arg1[%c32, %c0_13] : memref<2160x128xf32, #tpu.memory_space<vmem>>, vector<128x34xf32>
    %cst_14 = arith.constant dense<0.000000e+00> : vector<128x32xf32>
    %47 = tpu.matmul %46, %45, %cst_14 {dimension_numbers = #tpu.dot_dimension_numbers<[1], [0], [0], [1], [0, 0, 1, 1], [], []>} : vector<128x34xf32>, vector<34x32xf32>, vector<128x32xf32> -> vector<128x32xf32>
    %c160 = arith.constant 160 : index
    %c0_15 = arith.constant 0 : index
    %48 = vector.load %arg1[%c160, %c0_15] : memref<2160x128xf32, #tpu.memory_space<vmem>>, vector<128x32xf32>
    %49 = arith.addf %47, %48 : vector<128x32xf32>
    %cst_16 = arith.constant 5.000000e-01 : f32
    %50 = vector.broadcast %cst_16 : f32 to vector<128x32xf32>
    %51 = arith.mulf %50, %49 : vector<128x32xf32>
    %cst_17 = arith.constant 0.707106769 : f32
    %52 = vector.broadcast %cst_17 : f32 to vector<128x32xf32>
    %53 = arith.mulf %49, %52 : vector<128x32xf32>
    %54 = math.erf %53 : vector<128x32xf32>
    %cst_18 = arith.constant 1.000000e+00 : f32
    %55 = vector.broadcast %cst_18 : f32 to vector<128x32xf32>
    %56 = arith.addf %55, %54 : vector<128x32xf32>
    %57 = arith.mulf %51, %56 : vector<128x32xf32>
    %c288 = arith.constant 288 : index
    %c0_19 = arith.constant 0 : index
    %58 = vector.load %arg1[%c288, %c0_19] : memref<2160x128xf32, #tpu.memory_space<vmem>>, vector<34x128xf32>
    %cst_20 = arith.constant dense<0.000000e+00> : vector<34x32xf32>
    %59 = tpu.matmul %58, %57, %cst_20 {dimension_numbers = #tpu.dot_dimension_numbers<[1], [0], [0], [1], [0, 0, 1, 1], [], []>} : vector<34x128xf32>, vector<128x32xf32>, vector<34x32xf32> -> vector<34x32xf32>
    %c328 = arith.constant 328 : index
    %c0_21 = arith.constant 0 : index
    %60 = vector.load %arg1[%c328, %c0_21] : memref<2160x128xf32, #tpu.memory_space<vmem>>, vector<34x32xf32>
    %61 = arith.addf %59, %60 : vector<34x32xf32>
    %c368 = arith.constant 368 : index
    %c0_22 = arith.constant 0 : index
    %62 = vector.load %arg1[%c368, %c0_22] : memref<2160x128xf32, #tpu.memory_space<vmem>>, vector<2x32xf32>
    %63 = arith.addf %20, %61 : vector<34x32xf32>
    %64 = vector.extract_strided_slice %62 {offsets = [0, 0], sizes = [1, 32], strides = [1, 1]} : vector<2x32xf32> to vector<1x32xf32>
    %65 = vector.extract_strided_slice %62 {offsets = [1, 0], sizes = [1, 32], strides = [1, 1]} : vector<2x32xf32> to vector<1x32xf32>
    %cst_23 = arith.constant dense<0.000000e+00> : vector<34xf32>
    %66 = vector.multi_reduction <add>, %63, %cst_23 [1] : vector<34x32xf32> to vector<34xf32>
    %67 = vector.shape_cast %66 : vector<34xf32> to vector<34x1xf32>
    %cst_24 = arith.constant 3.200000e+01 : f32
    %68 = vector.broadcast %cst_24 : f32 to vector<34x1xf32>
    %69 = arith.divf %67, %68 : vector<34x1xf32>
    %70 = vector.broadcast %69 : vector<34x1xf32> to vector<34x32xf32>
    %71 = arith.subf %63, %70 : vector<34x32xf32>
    %72 = arith.mulf %71, %71 : vector<34x32xf32>
    %cst_25 = arith.constant dense<0.000000e+00> : vector<34xf32>
    %73 = vector.multi_reduction <add>, %72, %cst_25 [1] : vector<34x32xf32> to vector<34xf32>
    %74 = vector.shape_cast %73 : vector<34xf32> to vector<34x1xf32>
    %cst_26 = arith.constant 3.200000e+01 : f32
    %75 = vector.broadcast %cst_26 : f32 to vector<34x1xf32>
    %76 = arith.divf %74, %75 : vector<34x1xf32>
    %77 = vector.broadcast %69 : vector<34x1xf32> to vector<34x32xf32>
    %78 = arith.subf %63, %77 : vector<34x32xf32>
    %cst_27 = arith.constant 9.99999974E-6 : f32
    %79 = vector.broadcast %cst_27 : f32 to vector<34x1xf32>
    %80 = arith.addf %76, %79 : vector<34x1xf32>
    %81 = math.rsqrt %80 : vector<34x1xf32>
    %82 = vector.broadcast %81 : vector<34x1xf32> to vector<34x32xf32>
    %83 = arith.mulf %78, %82 : vector<34x32xf32>
    %84 = vector.broadcast %64 : vector<1x32xf32> to vector<34x32xf32>
    %85 = arith.mulf %83, %84 : vector<34x32xf32>
    %86 = vector.broadcast %65 : vector<1x32xf32> to vector<34x32xf32>
    %87 = arith.addf %85, %86 : vector<34x32xf32>
    %c376 = arith.constant 376 : index
    %c0_28 = arith.constant 0 : index
    %88 = vector.load %arg1[%c376, %c0_28] : memref<2160x128xf32, #tpu.memory_space<vmem>>, vector<32x64xf32>
    %cst_29 = arith.constant dense<0.000000e+00> : vector<34x64xf32>
    %89 = tpu.matmul %87, %88, %cst_29 {dimension_numbers = #tpu.dot_dimension_numbers<[1], [0], [0], [1], [0, 0, 1, 1], [], []>} : vector<34x32xf32>, vector<32x64xf32>, vector<34x64xf32> -> vector<34x64xf32>
    %c408 = arith.constant 408 : index
    %c0_30 = arith.constant 0 : index
    %90 = vector.load %arg1[%c408, %c0_30] : memref<2160x128xf32, #tpu.memory_space<vmem>>, vector<1x64xf32>
    %91 = vector.broadcast %90 : vector<1x64xf32> to vector<34x64xf32>
    %92 = arith.addf %89, %91 : vector<34x64xf32>
    %cst_31 = arith.constant 5.000000e-01 : f32
    %93 = vector.broadcast %cst_31 : f32 to vector<34x64xf32>
    %94 = arith.mulf %93, %92 : vector<34x64xf32>
    %cst_32 = arith.constant 0.707106769 : f32
    %95 = vector.broadcast %cst_32 : f32 to vector<34x64xf32>
    %96 = arith.mulf %92, %95 : vector<34x64xf32>
    %97 = math.erf %96 : vector<34x64xf32>
    %cst_33 = arith.constant 1.000000e+00 : f32
    %98 = vector.broadcast %cst_33 : f32 to vector<34x64xf32>
    %99 = arith.addf %98, %97 : vector<34x64xf32>
    %100 = arith.mulf %94, %99 : vector<34x64xf32>
    %c416 = arith.constant 416 : index
    %c0_34 = arith.constant 0 : index
    %101 = vector.load %arg1[%c416, %c0_34] : memref<2160x128xf32, #tpu.memory_space<vmem>>, vector<64x32xf32>
    %cst_35 = arith.constant dense<0.000000e+00> : vector<34x32xf32>
    %102 = tpu.matmul %100, %101, %cst_35 {dimension_numbers = #tpu.dot_dimension_numbers<[1], [0], [0], [1], [0, 0, 1, 1], [], []>} : vector<34x64xf32>, vector<64x32xf32>, vector<34x32xf32> -> vector<34x32xf32>
    %c480 = arith.constant 480 : index
    %c0_36 = arith.constant 0 : index
    %103 = vector.load %arg1[%c480, %c0_36] : memref<2160x128xf32, #tpu.memory_space<vmem>>, vector<1x32xf32>
    %104 = vector.broadcast %103 : vector<1x32xf32> to vector<34x32xf32>
    %105 = arith.addf %102, %104 : vector<34x32xf32>
    %106 = arith.addf %20, %61 : vector<34x32xf32>
    %107 = arith.addf %106, %105 : vector<34x32xf32>
    %c488 = arith.constant 488 : index
    %c0_37 = arith.constant 0 : index
    %108 = vector.load %arg1[%c488, %c0_37] : memref<2160x128xf32, #tpu.memory_space<vmem>>, vector<2x32xf32>
    %109 = vector.extract_strided_slice %108 {offsets = [0, 0], sizes = [1, 32], strides = [1, 1]} : vector<2x32xf32> to vector<1x32xf32>
    %110 = vector.extract_strided_slice %108 {offsets = [1, 0], sizes = [1, 32], strides = [1, 1]} : vector<2x32xf32> to vector<1x32xf32>
    %cst_38 = arith.constant dense<0.000000e+00> : vector<34xf32>
    %111 = vector.multi_reduction <add>, %107, %cst_38 [1] : vector<34x32xf32> to vector<34xf32>
    %112 = vector.shape_cast %111 : vector<34xf32> to vector<34x1xf32>
    %cst_39 = arith.constant 3.200000e+01 : f32
    %113 = vector.broadcast %cst_39 : f32 to vector<34x1xf32>
    %114 = arith.divf %112, %113 : vector<34x1xf32>
    %115 = vector.broadcast %114 : vector<34x1xf32> to vector<34x32xf32>
    %116 = arith.subf %107, %115 : vector<34x32xf32>
    %117 = arith.mulf %116, %116 : vector<34x32xf32>
    %cst_40 = arith.constant dense<0.000000e+00> : vector<34xf32>
    %118 = vector.multi_reduction <add>, %117, %cst_40 [1] : vector<34x32xf32> to vector<34xf32>
    %119 = vector.shape_cast %118 : vector<34xf32> to vector<34x1xf32>
    %cst_41 = arith.constant 3.200000e+01 : f32
    %120 = vector.broadcast %cst_41 : f32 to vector<34x1xf32>
    %121 = arith.divf %119, %120 : vector<34x1xf32>
    %122 = vector.broadcast %114 : vector<34x1xf32> to vector<34x32xf32>
    %123 = arith.subf %107, %122 : vector<34x32xf32>
    %cst_42 = arith.constant 9.99999974E-6 : f32
    %124 = vector.broadcast %cst_42 : f32 to vector<34x1xf32>
    %125 = arith.addf %121, %124 : vector<34x1xf32>
    %126 = math.rsqrt %125 : vector<34x1xf32>
    %127 = vector.broadcast %126 : vector<34x1xf32> to vector<34x32xf32>
    %128 = arith.mulf %123, %127 : vector<34x32xf32>
    %129 = vector.broadcast %109 : vector<1x32xf32> to vector<34x32xf32>
    %130 = arith.mulf %128, %129 : vector<34x32xf32>
    %131 = vector.broadcast %110 : vector<1x32xf32> to vector<34x32xf32>
    %132 = arith.addf %130, %131 : vector<34x32xf32>
    %c496 = arith.constant 496 : index
    %c0_43 = arith.constant 0 : index
    %133 = vector.load %arg1[%c496, %c0_43] : memref<2160x128xf32, #tpu.memory_space<vmem>>, vector<128x34xf32>
    %cst_44 = arith.constant dense<0.000000e+00> : vector<128x32xf32>
    %134 = tpu.matmul %133, %132, %cst_44 {dimension_numbers = #tpu.dot_dimension_numbers<[1], [0], [0], [1], [0, 0, 1, 1], [], []>} : vector<128x34xf32>, vector<34x32xf32>, vector<128x32xf32> -> vector<128x32xf32>
    %c624 = arith.constant 624 : index
    %c0_45 = arith.constant 0 : index
    %135 = vector.load %arg1[%c624, %c0_45] : memref<2160x128xf32, #tpu.memory_space<vmem>>, vector<128x32xf32>
    %136 = arith.addf %134, %135 : vector<128x32xf32>
    %cst_46 = arith.constant 5.000000e-01 : f32
    %137 = vector.broadcast %cst_46 : f32 to vector<128x32xf32>
    %138 = arith.mulf %137, %136 : vector<128x32xf32>
    %cst_47 = arith.constant 0.707106769 : f32
    %139 = vector.broadcast %cst_47 : f32 to vector<128x32xf32>
    %140 = arith.mulf %136, %139 : vector<128x32xf32>
    %141 = math.erf %140 : vector<128x32xf32>
    %cst_48 = arith.constant 1.000000e+00 : f32
    %142 = vector.broadcast %cst_48 : f32 to vector<128x32xf32>
    %143 = arith.addf %142, %141 : vector<128x32xf32>
    %144 = arith.mulf %138, %143 : vector<128x32xf32>
    %c752 = arith.constant 752 : index
    %c0_49 = arith.constant 0 : index
    %145 = vector.load %arg1[%c752, %c0_49] : memref<2160x128xf32, #tpu.memory_space<vmem>>, vector<34x128xf32>
    %cst_50 = arith.constant dense<0.000000e+00> : vector<34x32xf32>
    %146 = tpu.matmul %145, %144, %cst_50 {dimension_numbers = #tpu.dot_dimension_numbers<[1], [0], [0], [1], [0, 0, 1, 1], [], []>} : vector<34x128xf32>, vector<128x32xf32>, vector<34x32xf32> -> vector<34x32xf32>
    %c792 = arith.constant 792 : index
    %c0_51 = arith.constant 0 : index
    %147 = vector.load %arg1[%c792, %c0_51] : memref<2160x128xf32, #tpu.memory_space<vmem>>, vector<34x32xf32>
    %148 = arith.addf %146, %147 : vector<34x32xf32>
    %c832 = arith.constant 832 : index
    %c0_52 = arith.constant 0 : index
    %149 = vector.load %arg1[%c832, %c0_52] : memref<2160x128xf32, #tpu.memory_space<vmem>>, vector<2x32xf32>
    %150 = arith.addf %107, %148 : vector<34x32xf32>
    %151 = vector.extract_strided_slice %149 {offsets = [0, 0], sizes = [1, 32], strides = [1, 1]} : vector<2x32xf32> to vector<1x32xf32>
    %152 = vector.extract_strided_slice %149 {offsets = [1, 0], sizes = [1, 32], strides = [1, 1]} : vector<2x32xf32> to vector<1x32xf32>
    %cst_53 = arith.constant dense<0.000000e+00> : vector<34xf32>
    %153 = vector.multi_reduction <add>, %150, %cst_53 [1] : vector<34x32xf32> to vector<34xf32>
    %154 = vector.shape_cast %153 : vector<34xf32> to vector<34x1xf32>
    %cst_54 = arith.constant 3.200000e+01 : f32
    %155 = vector.broadcast %cst_54 : f32 to vector<34x1xf32>
    %156 = arith.divf %154, %155 : vector<34x1xf32>
    %157 = vector.broadcast %156 : vector<34x1xf32> to vector<34x32xf32>
    %158 = arith.subf %150, %157 : vector<34x32xf32>
    %159 = arith.mulf %158, %158 : vector<34x32xf32>
    %cst_55 = arith.constant dense<0.000000e+00> : vector<34xf32>
    %160 = vector.multi_reduction <add>, %159, %cst_55 [1] : vector<34x32xf32> to vector<34xf32>
    %161 = vector.shape_cast %160 : vector<34xf32> to vector<34x1xf32>
    %cst_56 = arith.constant 3.200000e+01 : f32
    %162 = vector.broadcast %cst_56 : f32 to vector<34x1xf32>
    %163 = arith.divf %161, %162 : vector<34x1xf32>
    %164 = vector.broadcast %156 : vector<34x1xf32> to vector<34x32xf32>
    %165 = arith.subf %150, %164 : vector<34x32xf32>
    %cst_57 = arith.constant 9.99999974E-6 : f32
    %166 = vector.broadcast %cst_57 : f32 to vector<34x1xf32>
    %167 = arith.addf %163, %166 : vector<34x1xf32>
    %168 = math.rsqrt %167 : vector<34x1xf32>
    %169 = vector.broadcast %168 : vector<34x1xf32> to vector<34x32xf32>
    %170 = arith.mulf %165, %169 : vector<34x32xf32>
    %171 = vector.broadcast %151 : vector<1x32xf32> to vector<34x32xf32>
    %172 = arith.mulf %170, %171 : vector<34x32xf32>
    %173 = vector.broadcast %152 : vector<1x32xf32> to vector<34x32xf32>
    %174 = arith.addf %172, %173 : vector<34x32xf32>
    %c840 = arith.constant 840 : index
    %c0_58 = arith.constant 0 : index
    %175 = vector.load %arg1[%c840, %c0_58] : memref<2160x128xf32, #tpu.memory_space<vmem>>, vector<32x64xf32>
    %cst_59 = arith.constant dense<0.000000e+00> : vector<34x64xf32>
    %176 = tpu.matmul %174, %175, %cst_59 {dimension_numbers = #tpu.dot_dimension_numbers<[1], [0], [0], [1], [0, 0, 1, 1], [], []>} : vector<34x32xf32>, vector<32x64xf32>, vector<34x64xf32> -> vector<34x64xf32>
    %c872 = arith.constant 872 : index
    %c0_60 = arith.constant 0 : index
    %177 = vector.load %arg1[%c872, %c0_60] : memref<2160x128xf32, #tpu.memory_space<vmem>>, vector<1x64xf32>
    %178 = vector.broadcast %177 : vector<1x64xf32> to vector<34x64xf32>
    %179 = arith.addf %176, %178 : vector<34x64xf32>
    %cst_61 = arith.constant 5.000000e-01 : f32
    %180 = vector.broadcast %cst_61 : f32 to vector<34x64xf32>
    %181 = arith.mulf %180, %179 : vector<34x64xf32>
    %cst_62 = arith.constant 0.707106769 : f32
    %182 = vector.broadcast %cst_62 : f32 to vector<34x64xf32>
    %183 = arith.mulf %179, %182 : vector<34x64xf32>
    %184 = math.erf %183 : vector<34x64xf32>
    %cst_63 = arith.constant 1.000000e+00 : f32
    %185 = vector.broadcast %cst_63 : f32 to vector<34x64xf32>
    %186 = arith.addf %185, %184 : vector<34x64xf32>
    %187 = arith.mulf %181, %186 : vector<34x64xf32>
    %c880 = arith.constant 880 : index
    %c0_64 = arith.constant 0 : index
    %188 = vector.load %arg1[%c880, %c0_64] : memref<2160x128xf32, #tpu.memory_space<vmem>>, vector<64x32xf32>
    %cst_65 = arith.constant dense<0.000000e+00> : vector<34x32xf32>
    %189 = tpu.matmul %187, %188, %cst_65 {dimension_numbers = #tpu.dot_dimension_numbers<[1], [0], [0], [1], [0, 0, 1, 1], [], []>} : vector<34x64xf32>, vector<64x32xf32>, vector<34x32xf32> -> vector<34x32xf32>
    %c944 = arith.constant 944 : index
    %c0_66 = arith.constant 0 : index
    %190 = vector.load %arg1[%c944, %c0_66] : memref<2160x128xf32, #tpu.memory_space<vmem>>, vector<1x32xf32>
    %191 = vector.broadcast %190 : vector<1x32xf32> to vector<34x32xf32>
    %192 = arith.addf %189, %191 : vector<34x32xf32>
    %193 = arith.addf %107, %148 : vector<34x32xf32>
    %194 = arith.addf %193, %192 : vector<34x32xf32>
    %c952 = arith.constant 952 : index
    %c0_67 = arith.constant 0 : index
    %195 = vector.load %arg1[%c952, %c0_67] : memref<2160x128xf32, #tpu.memory_space<vmem>>, vector<2x32xf32>
    %196 = vector.extract_strided_slice %195 {offsets = [0, 0], sizes = [1, 32], strides = [1, 1]} : vector<2x32xf32> to vector<1x32xf32>
    %197 = vector.extract_strided_slice %195 {offsets = [1, 0], sizes = [1, 32], strides = [1, 1]} : vector<2x32xf32> to vector<1x32xf32>
    %cst_68 = arith.constant dense<0.000000e+00> : vector<34xf32>
    %198 = vector.multi_reduction <add>, %194, %cst_68 [1] : vector<34x32xf32> to vector<34xf32>
    %199 = vector.shape_cast %198 : vector<34xf32> to vector<34x1xf32>
    %cst_69 = arith.constant 3.200000e+01 : f32
    %200 = vector.broadcast %cst_69 : f32 to vector<34x1xf32>
    %201 = arith.divf %199, %200 : vector<34x1xf32>
    %202 = vector.broadcast %201 : vector<34x1xf32> to vector<34x32xf32>
    %203 = arith.subf %194, %202 : vector<34x32xf32>
    %204 = arith.mulf %203, %203 : vector<34x32xf32>
    %cst_70 = arith.constant dense<0.000000e+00> : vector<34xf32>
    %205 = vector.multi_reduction <add>, %204, %cst_70 [1] : vector<34x32xf32> to vector<34xf32>
    %206 = vector.shape_cast %205 : vector<34xf32> to vector<34x1xf32>
    %cst_71 = arith.constant 3.200000e+01 : f32
    %207 = vector.broadcast %cst_71 : f32 to vector<34x1xf32>
    %208 = arith.divf %206, %207 : vector<34x1xf32>
    %209 = vector.broadcast %201 : vector<34x1xf32> to vector<34x32xf32>
    %210 = arith.subf %194, %209 : vector<34x32xf32>
    %cst_72 = arith.constant 9.99999974E-6 : f32
    %211 = vector.broadcast %cst_72 : f32 to vector<34x1xf32>
    %212 = arith.addf %208, %211 : vector<34x1xf32>
    %213 = math.rsqrt %212 : vector<34x1xf32>
    %214 = vector.broadcast %213 : vector<34x1xf32> to vector<34x32xf32>
    %215 = arith.mulf %210, %214 : vector<34x32xf32>
    %216 = vector.broadcast %196 : vector<1x32xf32> to vector<34x32xf32>
    %217 = arith.mulf %215, %216 : vector<34x32xf32>
    %218 = vector.broadcast %197 : vector<1x32xf32> to vector<34x32xf32>
    %219 = arith.addf %217, %218 : vector<34x32xf32>
    %c960 = arith.constant 960 : index
    %c0_73 = arith.constant 0 : index
    %220 = vector.load %arg1[%c960, %c0_73] : memref<2160x128xf32, #tpu.memory_space<vmem>>, vector<16x34xf32>
    %cst_74 = arith.constant dense<0.000000e+00> : vector<16x32xf32>
    %221 = tpu.matmul %220, %219, %cst_74 {dimension_numbers = #tpu.dot_dimension_numbers<[1], [0], [0], [1], [0, 0, 1, 1], [], []>} : vector<16x34xf32>, vector<34x32xf32>, vector<16x32xf32> -> vector<16x32xf32>
    %c976 = arith.constant 976 : index
    %c0_75 = arith.constant 0 : index
    %222 = vector.load %arg1[%c976, %c0_75] : memref<2160x128xf32, #tpu.memory_space<vmem>>, vector<16x32xf32>
    %223 = arith.addf %221, %222 : vector<16x32xf32>
    %c992 = arith.constant 992 : index
    %c0_76 = arith.constant 0 : index
    %224 = vector.load %arg1[%c992, %c0_76] : memref<2160x128xf32, #tpu.memory_space<vmem>>, vector<32x32xf32>
    %cst_77 = arith.constant dense<0.000000e+00> : vector<16x32xf32>
    %225 = tpu.matmul %223, %224, %cst_77 {dimension_numbers = #tpu.dot_dimension_numbers<[1], [0], [0], [1], [0, 0, 1, 1], [], []>} : vector<16x32xf32>, vector<32x32xf32>, vector<16x32xf32> -> vector<16x32xf32>
    %c1024 = arith.constant 1024 : index
    %c0_78 = arith.constant 0 : index
    %226 = vector.load %arg1[%c1024, %c0_78] : memref<2160x128xf32, #tpu.memory_space<vmem>>, vector<1x32xf32>
    %227 = vector.broadcast %226 : vector<1x32xf32> to vector<16x32xf32>
    %228 = arith.addf %225, %227 : vector<16x32xf32>
    %229 = arith.mulf %228, %228 : vector<16x32xf32>
    %cst_79 = arith.constant dense<0.000000e+00> : vector<16xf32>
    %230 = vector.multi_reduction <add>, %229, %cst_79 [1] : vector<16x32xf32> to vector<16xf32>
    %231 = vector.shape_cast %230 : vector<16xf32> to vector<16x1xf32>
    %c1064 = arith.constant 1064 : index
    %c0_80 = arith.constant 0 : index
    %232 = vector.load %arg1[%c1064, %c0_80] : memref<2160x128xf32, #tpu.memory_space<vmem>>, vector<1x32xf32>
    %233 = vector.broadcast %231 : vector<16x1xf32> to vector<16x32xf32>
    %234 = vector.broadcast %232 : vector<1x32xf32> to vector<16x32xf32>
    %235 = arith.addf %233, %234 : vector<16x32xf32>
    %c1032 = arith.constant 1032 : index
    %c0_81 = arith.constant 0 : index
    %236 = vector.load %arg1[%c1032, %c0_81] : memref<2160x128xf32, #tpu.memory_space<vmem>>, vector<32x32xf32>
    %cst_82 = arith.constant dense<0.000000e+00> : vector<16x32xf32>
    %237 = tpu.matmul %228, %236, %cst_82 {dimension_numbers = #tpu.dot_dimension_numbers<[1], [0], [0], [1], [0, 0, 1, 1], [], []>} : vector<16x32xf32>, vector<32x32xf32>, vector<16x32xf32> -> vector<16x32xf32>
    %cst_83 = arith.constant 2.000000e+00 : f32
    %238 = vector.broadcast %cst_83 : f32 to vector<16x32xf32>
    %239 = arith.mulf %238, %237 : vector<16x32xf32>
    %240 = arith.subf %235, %239 : vector<16x32xf32>
    %241 = tpu.iota {dimensions = array<i32: 1>} : vector<16x32xi32>
    %cst_84 = arith.constant dense<0x7F800000> : vector<16xf32>
    %242 = vector.multi_reduction <minimumf>, %240, %cst_84 [1] : vector<16x32xf32> to vector<16xf32>
    %243 = vector.shape_cast %242 : vector<16xf32> to vector<16x1xf32>
    %244 = vector.broadcast %243 : vector<16x1xf32> to vector<16x32xf32>
    %245 = arith.cmpf ole, %240, %244 : vector<16x32xf32>
    %c32_i32 = arith.constant 32 : i32
    %246 = vector.broadcast %c32_i32 : i32 to vector<16x32xi32>
    %247 = arith.select %245, %241, %246 : vector<16x32xi1>, vector<16x32xi32>
    %cst_85 = arith.constant dense<2147483647> : vector<16xi32>
    %248 = vector.multi_reduction <minsi>, %247, %cst_85 [1] : vector<16x32xi32> to vector<16xi32>
    %249 = vector.shape_cast %248 : vector<16xi32> to vector<16x1xi32>
    %250 = vector.broadcast %249 : vector<16x1xi32> to vector<16x32xi32>
    %251 = arith.cmpi eq, %241, %250 : vector<16x32xi32>
    %252 = arith.extui %251 : vector<16x32xi1> to vector<16x32xi32>
    %253 = arith.sitofp %252 : vector<16x32xi32> to vector<16x32xf32>
    %c1112 = arith.constant 1112 : index
    %c0_86 = arith.constant 0 : index
    %254 = vector.load %arg1[%c1112, %c0_86] : memref<2160x128xf32, #tpu.memory_space<vmem>>, vector<32x32xf32>
    %255 = arith.truncf %253 : vector<16x32xf32> to vector<16x32xbf16>
    %256 = arith.truncf %254 : vector<32x32xf32> to vector<32x32xbf16>
    %cst_87 = arith.constant dense<0.000000e+00> : vector<16x32xf32>
    %257 = tpu.matmul %255, %256, %cst_87 {dimension_numbers = #tpu.dot_dimension_numbers<[1], [0], [0], [1], [0, 0, 1, 1], [], []>} : vector<16x32xbf16>, vector<32x32xbf16>, vector<16x32xf32> -> vector<16x32xf32>
    %c1072 = arith.constant 1072 : index
    %c0_88 = arith.constant 0 : index
    %258 = vector.load %arg1[%c1072, %c0_88] : memref<2160x128xf32, #tpu.memory_space<vmem>>, vector<34x16xf32>
    %259 = arith.truncf %258 : vector<34x16xf32> to vector<34x16xbf16>
    %260 = arith.truncf %257 : vector<16x32xf32> to vector<16x32xbf16>
    %cst_89 = arith.constant dense<0.000000e+00> : vector<34x32xf32>
    %261 = tpu.matmul %259, %260, %cst_89 {dimension_numbers = #tpu.dot_dimension_numbers<[1], [0], [0], [1], [0, 0, 1, 1], [], []>} : vector<34x16xbf16>, vector<16x32xbf16>, vector<34x32xf32> -> vector<34x32xf32>
    %c1144 = arith.constant 1144 : index
    %c0_90 = arith.constant 0 : index
    %262 = vector.load %arg1[%c1144, %c0_90] : memref<2160x128xf32, #tpu.memory_space<vmem>>, vector<34x32xf32>
    %263 = arith.addf %261, %262 : vector<34x32xf32>
    %c1184 = arith.constant 1184 : index
    %c0_91 = arith.constant 0 : index
    %264 = vector.load %arg1[%c1184, %c0_91] : memref<2160x128xf32, #tpu.memory_space<vmem>>, vector<2x32xf32>
    %265 = vector.extract_strided_slice %264 {offsets = [0, 0], sizes = [1, 32], strides = [1, 1]} : vector<2x32xf32> to vector<1x32xf32>
    %266 = vector.extract_strided_slice %264 {offsets = [1, 0], sizes = [1, 32], strides = [1, 1]} : vector<2x32xf32> to vector<1x32xf32>
    %cst_92 = arith.constant dense<0.000000e+00> : vector<34xf32>
    %267 = vector.multi_reduction <add>, %263, %cst_92 [1] : vector<34x32xf32> to vector<34xf32>
    %268 = vector.shape_cast %267 : vector<34xf32> to vector<34x1xf32>
    %cst_93 = arith.constant 3.200000e+01 : f32
    %269 = vector.broadcast %cst_93 : f32 to vector<34x1xf32>
    %270 = arith.divf %268, %269 : vector<34x1xf32>
    %271 = vector.broadcast %270 : vector<34x1xf32> to vector<34x32xf32>
    %272 = arith.subf %263, %271 : vector<34x32xf32>
    %273 = arith.mulf %272, %272 : vector<34x32xf32>
    %cst_94 = arith.constant dense<0.000000e+00> : vector<34xf32>
    %274 = vector.multi_reduction <add>, %273, %cst_94 [1] : vector<34x32xf32> to vector<34xf32>
    %275 = vector.shape_cast %274 : vector<34xf32> to vector<34x1xf32>
    %cst_95 = arith.constant 3.200000e+01 : f32
    %276 = vector.broadcast %cst_95 : f32 to vector<34x1xf32>
    %277 = arith.divf %275, %276 : vector<34x1xf32>
    %278 = vector.broadcast %270 : vector<34x1xf32> to vector<34x32xf32>
    %279 = arith.subf %263, %278 : vector<34x32xf32>
    %cst_96 = arith.constant 9.99999974E-6 : f32
    %280 = vector.broadcast %cst_96 : f32 to vector<34x1xf32>
    %281 = arith.addf %277, %280 : vector<34x1xf32>
    %282 = math.rsqrt %281 : vector<34x1xf32>
    %283 = vector.broadcast %282 : vector<34x1xf32> to vector<34x32xf32>
    %284 = arith.mulf %279, %283 : vector<34x32xf32>
    %285 = vector.broadcast %265 : vector<1x32xf32> to vector<34x32xf32>
    %286 = arith.mulf %284, %285 : vector<34x32xf32>
    %287 = vector.broadcast %266 : vector<1x32xf32> to vector<34x32xf32>
    %288 = arith.addf %286, %287 : vector<34x32xf32>
    %c1192 = arith.constant 1192 : index
    %c0_97 = arith.constant 0 : index
    %289 = vector.load %arg1[%c1192, %c0_97] : memref<2160x128xf32, #tpu.memory_space<vmem>>, vector<128x34xf32>
    %290 = arith.truncf %289 : vector<128x34xf32> to vector<128x34xbf16>
    %291 = arith.truncf %288 : vector<34x32xf32> to vector<34x32xbf16>
    %cst_98 = arith.constant dense<0.000000e+00> : vector<128x32xf32>
    %292 = tpu.matmul %290, %291, %cst_98 {dimension_numbers = #tpu.dot_dimension_numbers<[1], [0], [0], [1], [0, 0, 1, 1], [], []>} : vector<128x34xbf16>, vector<34x32xbf16>, vector<128x32xf32> -> vector<128x32xf32>
    %c1320 = arith.constant 1320 : index
    %c0_99 = arith.constant 0 : index
    %293 = vector.load %arg1[%c1320, %c0_99] : memref<2160x128xf32, #tpu.memory_space<vmem>>, vector<128x32xf32>
    %294 = arith.addf %292, %293 : vector<128x32xf32>
    %cst_100 = arith.constant 5.000000e-01 : f32
    %295 = vector.broadcast %cst_100 : f32 to vector<128x32xf32>
    %296 = arith.mulf %295, %294 : vector<128x32xf32>
    %cst_101 = arith.constant 0.707106769 : f32
    %297 = vector.broadcast %cst_101 : f32 to vector<128x32xf32>
    %298 = arith.mulf %294, %297 : vector<128x32xf32>
    %299 = math.erf %298 : vector<128x32xf32>
    %cst_102 = arith.constant 1.000000e+00 : f32
    %300 = vector.broadcast %cst_102 : f32 to vector<128x32xf32>
    %301 = arith.addf %300, %299 : vector<128x32xf32>
    %302 = arith.mulf %296, %301 : vector<128x32xf32>
    %c1448 = arith.constant 1448 : index
    %c0_103 = arith.constant 0 : index
    %303 = vector.load %arg1[%c1448, %c0_103] : memref<2160x128xf32, #tpu.memory_space<vmem>>, vector<34x128xf32>
    %304 = arith.truncf %303 : vector<34x128xf32> to vector<34x128xbf16>
    %305 = arith.truncf %302 : vector<128x32xf32> to vector<128x32xbf16>
    %cst_104 = arith.constant dense<0.000000e+00> : vector<34x32xf32>
    %306 = tpu.matmul %304, %305, %cst_104 {dimension_numbers = #tpu.dot_dimension_numbers<[1], [0], [0], [1], [0, 0, 1, 1], [], []>} : vector<34x128xbf16>, vector<128x32xbf16>, vector<34x32xf32> -> vector<34x32xf32>
    %c1488 = arith.constant 1488 : index
    %c0_105 = arith.constant 0 : index
    %307 = vector.load %arg1[%c1488, %c0_105] : memref<2160x128xf32, #tpu.memory_space<vmem>>, vector<34x32xf32>
    %308 = arith.addf %306, %307 : vector<34x32xf32>
    %c1528 = arith.constant 1528 : index
    %c0_106 = arith.constant 0 : index
    %309 = vector.load %arg1[%c1528, %c0_106] : memref<2160x128xf32, #tpu.memory_space<vmem>>, vector<2x32xf32>
    %310 = arith.addf %263, %308 : vector<34x32xf32>
    %311 = vector.extract_strided_slice %309 {offsets = [0, 0], sizes = [1, 32], strides = [1, 1]} : vector<2x32xf32> to vector<1x32xf32>
    %312 = vector.extract_strided_slice %309 {offsets = [1, 0], sizes = [1, 32], strides = [1, 1]} : vector<2x32xf32> to vector<1x32xf32>
    %cst_107 = arith.constant dense<0.000000e+00> : vector<34xf32>
    %313 = vector.multi_reduction <add>, %310, %cst_107 [1] : vector<34x32xf32> to vector<34xf32>
    %314 = vector.shape_cast %313 : vector<34xf32> to vector<34x1xf32>
    %cst_108 = arith.constant 3.200000e+01 : f32
    %315 = vector.broadcast %cst_108 : f32 to vector<34x1xf32>
    %316 = arith.divf %314, %315 : vector<34x1xf32>
    %317 = vector.broadcast %316 : vector<34x1xf32> to vector<34x32xf32>
    %318 = arith.subf %310, %317 : vector<34x32xf32>
    %319 = arith.mulf %318, %318 : vector<34x32xf32>
    %cst_109 = arith.constant dense<0.000000e+00> : vector<34xf32>
    %320 = vector.multi_reduction <add>, %319, %cst_109 [1] : vector<34x32xf32> to vector<34xf32>
    %321 = vector.shape_cast %320 : vector<34xf32> to vector<34x1xf32>
    %cst_110 = arith.constant 3.200000e+01 : f32
    %322 = vector.broadcast %cst_110 : f32 to vector<34x1xf32>
    %323 = arith.divf %321, %322 : vector<34x1xf32>
    %324 = vector.broadcast %316 : vector<34x1xf32> to vector<34x32xf32>
    %325 = arith.subf %310, %324 : vector<34x32xf32>
    %cst_111 = arith.constant 9.99999974E-6 : f32
    %326 = vector.broadcast %cst_111 : f32 to vector<34x1xf32>
    %327 = arith.addf %323, %326 : vector<34x1xf32>
    %328 = math.rsqrt %327 : vector<34x1xf32>
    %329 = vector.broadcast %328 : vector<34x1xf32> to vector<34x32xf32>
    %330 = arith.mulf %325, %329 : vector<34x32xf32>
    %331 = vector.broadcast %311 : vector<1x32xf32> to vector<34x32xf32>
    %332 = arith.mulf %330, %331 : vector<34x32xf32>
    %333 = vector.broadcast %312 : vector<1x32xf32> to vector<34x32xf32>
    %334 = arith.addf %332, %333 : vector<34x32xf32>
    %c1536 = arith.constant 1536 : index
    %c0_112 = arith.constant 0 : index
    %335 = vector.load %arg1[%c1536, %c0_112] : memref<2160x128xf32, #tpu.memory_space<vmem>>, vector<32x64xf32>
    %336 = arith.truncf %334 : vector<34x32xf32> to vector<34x32xbf16>
    %337 = arith.truncf %335 : vector<32x64xf32> to vector<32x64xbf16>
    %cst_113 = arith.constant dense<0.000000e+00> : vector<34x64xf32>
    %338 = tpu.matmul %336, %337, %cst_113 {dimension_numbers = #tpu.dot_dimension_numbers<[1], [0], [0], [1], [0, 0, 1, 1], [], []>} : vector<34x32xbf16>, vector<32x64xbf16>, vector<34x64xf32> -> vector<34x64xf32>
    %c1568 = arith.constant 1568 : index
    %c0_114 = arith.constant 0 : index
    %339 = vector.load %arg1[%c1568, %c0_114] : memref<2160x128xf32, #tpu.memory_space<vmem>>, vector<1x64xf32>
    %340 = vector.broadcast %339 : vector<1x64xf32> to vector<34x64xf32>
    %341 = arith.addf %338, %340 : vector<34x64xf32>
    %cst_115 = arith.constant 5.000000e-01 : f32
    %342 = vector.broadcast %cst_115 : f32 to vector<34x64xf32>
    %343 = arith.mulf %342, %341 : vector<34x64xf32>
    %cst_116 = arith.constant 0.707106769 : f32
    %344 = vector.broadcast %cst_116 : f32 to vector<34x64xf32>
    %345 = arith.mulf %341, %344 : vector<34x64xf32>
    %346 = math.erf %345 : vector<34x64xf32>
    %cst_117 = arith.constant 1.000000e+00 : f32
    %347 = vector.broadcast %cst_117 : f32 to vector<34x64xf32>
    %348 = arith.addf %347, %346 : vector<34x64xf32>
    %349 = arith.mulf %343, %348 : vector<34x64xf32>
    %c1576 = arith.constant 1576 : index
    %c0_118 = arith.constant 0 : index
    %350 = vector.load %arg1[%c1576, %c0_118] : memref<2160x128xf32, #tpu.memory_space<vmem>>, vector<64x32xf32>
    %351 = arith.truncf %349 : vector<34x64xf32> to vector<34x64xbf16>
    %352 = arith.truncf %350 : vector<64x32xf32> to vector<64x32xbf16>
    %cst_119 = arith.constant dense<0.000000e+00> : vector<34x32xf32>
    %353 = tpu.matmul %351, %352, %cst_119 {dimension_numbers = #tpu.dot_dimension_numbers<[1], [0], [0], [1], [0, 0, 1, 1], [], []>} : vector<34x64xbf16>, vector<64x32xbf16>, vector<34x32xf32> -> vector<34x32xf32>
    %c1640 = arith.constant 1640 : index
    %c0_120 = arith.constant 0 : index
    %354 = vector.load %arg1[%c1640, %c0_120] : memref<2160x128xf32, #tpu.memory_space<vmem>>, vector<1x32xf32>
    %355 = vector.broadcast %354 : vector<1x32xf32> to vector<34x32xf32>
    %356 = arith.addf %353, %355 : vector<34x32xf32>
    %357 = arith.addf %263, %308 : vector<34x32xf32>
    %358 = arith.addf %357, %356 : vector<34x32xf32>
    %c1648 = arith.constant 1648 : index
    %c0_121 = arith.constant 0 : index
    %359 = vector.load %arg1[%c1648, %c0_121] : memref<2160x128xf32, #tpu.memory_space<vmem>>, vector<2x32xf32>
    %360 = vector.extract_strided_slice %359 {offsets = [0, 0], sizes = [1, 32], strides = [1, 1]} : vector<2x32xf32> to vector<1x32xf32>
    %361 = vector.extract_strided_slice %359 {offsets = [1, 0], sizes = [1, 32], strides = [1, 1]} : vector<2x32xf32> to vector<1x32xf32>
    %cst_122 = arith.constant dense<0.000000e+00> : vector<34xf32>
    %362 = vector.multi_reduction <add>, %358, %cst_122 [1] : vector<34x32xf32> to vector<34xf32>
    %363 = vector.shape_cast %362 : vector<34xf32> to vector<34x1xf32>
    %cst_123 = arith.constant 3.200000e+01 : f32
    %364 = vector.broadcast %cst_123 : f32 to vector<34x1xf32>
    %365 = arith.divf %363, %364 : vector<34x1xf32>
    %366 = vector.broadcast %365 : vector<34x1xf32> to vector<34x32xf32>
    %367 = arith.subf %358, %366 : vector<34x32xf32>
    %368 = arith.mulf %367, %367 : vector<34x32xf32>
    %cst_124 = arith.constant dense<0.000000e+00> : vector<34xf32>
    %369 = vector.multi_reduction <add>, %368, %cst_124 [1] : vector<34x32xf32> to vector<34xf32>
    %370 = vector.shape_cast %369 : vector<34xf32> to vector<34x1xf32>
    %cst_125 = arith.constant 3.200000e+01 : f32
    %371 = vector.broadcast %cst_125 : f32 to vector<34x1xf32>
    %372 = arith.divf %370, %371 : vector<34x1xf32>
    %373 = vector.broadcast %365 : vector<34x1xf32> to vector<34x32xf32>
    %374 = arith.subf %358, %373 : vector<34x32xf32>
    %cst_126 = arith.constant 9.99999974E-6 : f32
    %375 = vector.broadcast %cst_126 : f32 to vector<34x1xf32>
    %376 = arith.addf %372, %375 : vector<34x1xf32>
    %377 = math.rsqrt %376 : vector<34x1xf32>
    %378 = vector.broadcast %377 : vector<34x1xf32> to vector<34x32xf32>
    %379 = arith.mulf %374, %378 : vector<34x32xf32>
    %380 = vector.broadcast %360 : vector<1x32xf32> to vector<34x32xf32>
    %381 = arith.mulf %379, %380 : vector<34x32xf32>
    %382 = vector.broadcast %361 : vector<1x32xf32> to vector<34x32xf32>
    %383 = arith.addf %381, %382 : vector<34x32xf32>
    %c1656 = arith.constant 1656 : index
    %c0_127 = arith.constant 0 : index
    %384 = vector.load %arg1[%c1656, %c0_127] : memref<2160x128xf32, #tpu.memory_space<vmem>>, vector<128x34xf32>
    %385 = arith.truncf %384 : vector<128x34xf32> to vector<128x34xbf16>
    %386 = arith.truncf %383 : vector<34x32xf32> to vector<34x32xbf16>
    %cst_128 = arith.constant dense<0.000000e+00> : vector<128x32xf32>
    %387 = tpu.matmul %385, %386, %cst_128 {dimension_numbers = #tpu.dot_dimension_numbers<[1], [0], [0], [1], [0, 0, 1, 1], [], []>} : vector<128x34xbf16>, vector<34x32xbf16>, vector<128x32xf32> -> vector<128x32xf32>
    %c1784 = arith.constant 1784 : index
    %c0_129 = arith.constant 0 : index
    %388 = vector.load %arg1[%c1784, %c0_129] : memref<2160x128xf32, #tpu.memory_space<vmem>>, vector<128x32xf32>
    %389 = arith.addf %387, %388 : vector<128x32xf32>
    %cst_130 = arith.constant 5.000000e-01 : f32
    %390 = vector.broadcast %cst_130 : f32 to vector<128x32xf32>
    %391 = arith.mulf %390, %389 : vector<128x32xf32>
    %cst_131 = arith.constant 0.707106769 : f32
    %392 = vector.broadcast %cst_131 : f32 to vector<128x32xf32>
    %393 = arith.mulf %389, %392 : vector<128x32xf32>
    %394 = math.erf %393 : vector<128x32xf32>
    %cst_132 = arith.constant 1.000000e+00 : f32
    %395 = vector.broadcast %cst_132 : f32 to vector<128x32xf32>
    %396 = arith.addf %395, %394 : vector<128x32xf32>
    %397 = arith.mulf %391, %396 : vector<128x32xf32>
    %c1912 = arith.constant 1912 : index
    %c0_133 = arith.constant 0 : index
    %398 = vector.load %arg1[%c1912, %c0_133] : memref<2160x128xf32, #tpu.memory_space<vmem>>, vector<34x128xf32>
    %399 = arith.truncf %398 : vector<34x128xf32> to vector<34x128xbf16>
    %400 = arith.truncf %397 : vector<128x32xf32> to vector<128x32xbf16>
    %cst_134 = arith.constant dense<0.000000e+00> : vector<34x32xf32>
    %401 = tpu.matmul %399, %400, %cst_134 {dimension_numbers = #tpu.dot_dimension_numbers<[1], [0], [0], [1], [0, 0, 1, 1], [], []>} : vector<34x128xbf16>, vector<128x32xbf16>, vector<34x32xf32> -> vector<34x32xf32>
    %c1952 = arith.constant 1952 : index
    %c0_135 = arith.constant 0 : index
    %402 = vector.load %arg1[%c1952, %c0_135] : memref<2160x128xf32, #tpu.memory_space<vmem>>, vector<34x32xf32>
    %403 = arith.addf %401, %402 : vector<34x32xf32>
    %c1992 = arith.constant 1992 : index
    %c0_136 = arith.constant 0 : index
    %404 = vector.load %arg1[%c1992, %c0_136] : memref<2160x128xf32, #tpu.memory_space<vmem>>, vector<2x32xf32>
    %405 = arith.addf %358, %403 : vector<34x32xf32>
    %406 = vector.extract_strided_slice %404 {offsets = [0, 0], sizes = [1, 32], strides = [1, 1]} : vector<2x32xf32> to vector<1x32xf32>
    %407 = vector.extract_strided_slice %404 {offsets = [1, 0], sizes = [1, 32], strides = [1, 1]} : vector<2x32xf32> to vector<1x32xf32>
    %cst_137 = arith.constant dense<0.000000e+00> : vector<34xf32>
    %408 = vector.multi_reduction <add>, %405, %cst_137 [1] : vector<34x32xf32> to vector<34xf32>
    %409 = vector.shape_cast %408 : vector<34xf32> to vector<34x1xf32>
    %cst_138 = arith.constant 3.200000e+01 : f32
    %410 = vector.broadcast %cst_138 : f32 to vector<34x1xf32>
    %411 = arith.divf %409, %410 : vector<34x1xf32>
    %412 = vector.broadcast %411 : vector<34x1xf32> to vector<34x32xf32>
    %413 = arith.subf %405, %412 : vector<34x32xf32>
    %414 = arith.mulf %413, %413 : vector<34x32xf32>
    %cst_139 = arith.constant dense<0.000000e+00> : vector<34xf32>
    %415 = vector.multi_reduction <add>, %414, %cst_139 [1] : vector<34x32xf32> to vector<34xf32>
    %416 = vector.shape_cast %415 : vector<34xf32> to vector<34x1xf32>
    %cst_140 = arith.constant 3.200000e+01 : f32
    %417 = vector.broadcast %cst_140 : f32 to vector<34x1xf32>
    %418 = arith.divf %416, %417 : vector<34x1xf32>
    %419 = vector.broadcast %411 : vector<34x1xf32> to vector<34x32xf32>
    %420 = arith.subf %405, %419 : vector<34x32xf32>
    %cst_141 = arith.constant 9.99999974E-6 : f32
    %421 = vector.broadcast %cst_141 : f32 to vector<34x1xf32>
    %422 = arith.addf %418, %421 : vector<34x1xf32>
    %423 = math.rsqrt %422 : vector<34x1xf32>
    %424 = vector.broadcast %423 : vector<34x1xf32> to vector<34x32xf32>
    %425 = arith.mulf %420, %424 : vector<34x32xf32>
    %426 = vector.broadcast %406 : vector<1x32xf32> to vector<34x32xf32>
    %427 = arith.mulf %425, %426 : vector<34x32xf32>
    %428 = vector.broadcast %407 : vector<1x32xf32> to vector<34x32xf32>
    %429 = arith.addf %427, %428 : vector<34x32xf32>
    %c2000 = arith.constant 2000 : index
    %c0_142 = arith.constant 0 : index
    %430 = vector.load %arg1[%c2000, %c0_142] : memref<2160x128xf32, #tpu.memory_space<vmem>>, vector<32x64xf32>
    %431 = arith.truncf %429 : vector<34x32xf32> to vector<34x32xbf16>
    %432 = arith.truncf %430 : vector<32x64xf32> to vector<32x64xbf16>
    %cst_143 = arith.constant dense<0.000000e+00> : vector<34x64xf32>
    %433 = tpu.matmul %431, %432, %cst_143 {dimension_numbers = #tpu.dot_dimension_numbers<[1], [0], [0], [1], [0, 0, 1, 1], [], []>} : vector<34x32xbf16>, vector<32x64xbf16>, vector<34x64xf32> -> vector<34x64xf32>
    %c2032 = arith.constant 2032 : index
    %c0_144 = arith.constant 0 : index
    %434 = vector.load %arg1[%c2032, %c0_144] : memref<2160x128xf32, #tpu.memory_space<vmem>>, vector<1x64xf32>
    %435 = vector.broadcast %434 : vector<1x64xf32> to vector<34x64xf32>
    %436 = arith.addf %433, %435 : vector<34x64xf32>
    %cst_145 = arith.constant 5.000000e-01 : f32
    %437 = vector.broadcast %cst_145 : f32 to vector<34x64xf32>
    %438 = arith.mulf %437, %436 : vector<34x64xf32>
    %cst_146 = arith.constant 0.707106769 : f32
    %439 = vector.broadcast %cst_146 : f32 to vector<34x64xf32>
    %440 = arith.mulf %436, %439 : vector<34x64xf32>
    %441 = math.erf %440 : vector<34x64xf32>
    %cst_147 = arith.constant 1.000000e+00 : f32
    %442 = vector.broadcast %cst_147 : f32 to vector<34x64xf32>
    %443 = arith.addf %442, %441 : vector<34x64xf32>
    %444 = arith.mulf %438, %443 : vector<34x64xf32>
    %c2040 = arith.constant 2040 : index
    %c0_148 = arith.constant 0 : index
    %445 = vector.load %arg1[%c2040, %c0_148] : memref<2160x128xf32, #tpu.memory_space<vmem>>, vector<64x32xf32>
    %446 = arith.truncf %444 : vector<34x64xf32> to vector<34x64xbf16>
    %447 = arith.truncf %445 : vector<64x32xf32> to vector<64x32xbf16>
    %cst_149 = arith.constant dense<0.000000e+00> : vector<34x32xf32>
    %448 = tpu.matmul %446, %447, %cst_149 {dimension_numbers = #tpu.dot_dimension_numbers<[1], [0], [0], [1], [0, 0, 1, 1], [], []>} : vector<34x64xbf16>, vector<64x32xbf16>, vector<34x32xf32> -> vector<34x32xf32>
    %c2104 = arith.constant 2104 : index
    %c0_150 = arith.constant 0 : index
    %449 = vector.load %arg1[%c2104, %c0_150] : memref<2160x128xf32, #tpu.memory_space<vmem>>, vector<1x32xf32>
    %450 = vector.broadcast %449 : vector<1x32xf32> to vector<34x32xf32>
    %451 = arith.addf %448, %450 : vector<34x32xf32>
    %452 = arith.addf %358, %403 : vector<34x32xf32>
    %453 = arith.addf %452, %451 : vector<34x32xf32>
    %c2112 = arith.constant 2112 : index
    %c0_151 = arith.constant 0 : index
    %454 = vector.load %arg1[%c2112, %c0_151] : memref<2160x128xf32, #tpu.memory_space<vmem>>, vector<2x32xf32>
    %455 = vector.extract_strided_slice %454 {offsets = [0, 0], sizes = [1, 32], strides = [1, 1]} : vector<2x32xf32> to vector<1x32xf32>
    %456 = vector.extract_strided_slice %454 {offsets = [1, 0], sizes = [1, 32], strides = [1, 1]} : vector<2x32xf32> to vector<1x32xf32>
    %cst_152 = arith.constant dense<0.000000e+00> : vector<34xf32>
    %457 = vector.multi_reduction <add>, %453, %cst_152 [1] : vector<34x32xf32> to vector<34xf32>
    %458 = vector.shape_cast %457 : vector<34xf32> to vector<34x1xf32>
    %cst_153 = arith.constant 3.200000e+01 : f32
    %459 = vector.broadcast %cst_153 : f32 to vector<34x1xf32>
    %460 = arith.divf %458, %459 : vector<34x1xf32>
    %461 = vector.broadcast %460 : vector<34x1xf32> to vector<34x32xf32>
    %462 = arith.subf %453, %461 : vector<34x32xf32>
    %463 = arith.mulf %462, %462 : vector<34x32xf32>
    %cst_154 = arith.constant dense<0.000000e+00> : vector<34xf32>
    %464 = vector.multi_reduction <add>, %463, %cst_154 [1] : vector<34x32xf32> to vector<34xf32>
    %465 = vector.shape_cast %464 : vector<34xf32> to vector<34x1xf32>
    %cst_155 = arith.constant 3.200000e+01 : f32
    %466 = vector.broadcast %cst_155 : f32 to vector<34x1xf32>
    %467 = arith.divf %465, %466 : vector<34x1xf32>
    %468 = vector.broadcast %460 : vector<34x1xf32> to vector<34x32xf32>
    %469 = arith.subf %453, %468 : vector<34x32xf32>
    %cst_156 = arith.constant 9.99999974E-6 : f32
    %470 = vector.broadcast %cst_156 : f32 to vector<34x1xf32>
    %471 = arith.addf %467, %470 : vector<34x1xf32>
    %472 = math.rsqrt %471 : vector<34x1xf32>
    %473 = vector.broadcast %472 : vector<34x1xf32> to vector<34x32xf32>
    %474 = arith.mulf %469, %473 : vector<34x32xf32>
    %475 = vector.broadcast %455 : vector<1x32xf32> to vector<34x32xf32>
    %476 = arith.mulf %474, %475 : vector<34x32xf32>
    %477 = vector.broadcast %456 : vector<1x32xf32> to vector<34x32xf32>
    %478 = arith.addf %476, %477 : vector<34x32xf32>
    %c2120 = arith.constant 2120 : index
    %c0_157 = arith.constant 0 : index
    %479 = vector.load %arg1[%c2120, %c0_157] : memref<2160x128xf32, #tpu.memory_space<vmem>>, vector<32x2xf32>
    %480 = arith.truncf %478 : vector<34x32xf32> to vector<34x32xbf16>
    %481 = arith.truncf %479 : vector<32x2xf32> to vector<32x2xbf16>
    %cst_158 = arith.constant dense<0.000000e+00> : vector<34x2xf32>
    %482 = tpu.matmul %480, %481, %cst_158 {dimension_numbers = #tpu.dot_dimension_numbers<[1], [0], [0], [1], [0, 0, 1, 1], [], []>} : vector<34x32xbf16>, vector<32x2xbf16>, vector<34x2xf32> -> vector<34x2xf32>
    %c2152 = arith.constant 2152 : index
    %c0_159 = arith.constant 0 : index
    %483 = vector.load %arg1[%c2152, %c0_159] : memref<2160x128xf32, #tpu.memory_space<vmem>>, vector<1x2xf32>
    %484 = vector.broadcast %483 : vector<1x2xf32> to vector<34x2xf32>
    %485 = arith.addf %482, %484 : vector<34x2xf32>
    %cst_160 = arith.constant 0.000000e+00 : f32
    %486 = vector.broadcast %cst_160 : f32 to vector<34x126xf32>
    %487 = tpu.concatenate %485, %486 in 1 : vector<34x2xf32>, vector<34x126xf32> -> vector<34x128xf32>
    %cst_161 = arith.constant 0.000000e+00 : f32
    %488 = vector.broadcast %cst_161 : f32 to vector<6x128xf32>
    %489 = tpu.concatenate %487, %488 in 0 : vector<34x128xf32>, vector<6x128xf32> -> vector<40x128xf32>
    %490 = arith.sitofp %249 : vector<16x1xi32> to vector<16x1xf32>
    %cst_162 = arith.constant 0.000000e+00 : f32
    %491 = vector.broadcast %cst_162 : f32 to vector<16x95xf32>
    %492 = tpu.concatenate %240, %490, %491 in 1 : vector<16x32xf32>, vector<16x1xf32>, vector<16x95xf32> -> vector<16x128xf32>
    %493 = tpu.concatenate %489, %492 in 0 : vector<40x128xf32>, vector<16x128xf32> -> vector<56x128xf32>
    %c0_163 = arith.constant 0 : index
    %c0_164 = arith.constant 0 : index
    %494 = vector.load %arg2[%c0_163, %c0_164] : memref<56x128xf32, #tpu.memory_space<vmem>>, vector<56x128xf32>
    tpu.vector_store %arg2[%c0_163, %c0_164], %493 {strides = array<i32>} : memref<56x128xf32, #tpu.memory_space<vmem>>, vector<56x128xf32>,
    return
  }
}

</mosaic_0001>

<bundles_post_ra>
// kernel: _lambda_.1
= control target key start
LH: loop header
LB: loop body
LE: loop exit
PB: predicated region body
PF: predicated region fallthrough
CT: control target
= control target key end

     0   :  { %7 = vsyncpa [#allocation3], 0  ;;  %s5368_s9 = smov [#allocation2]   ;;  %s6161_s0 = inlined_call_operand.vmem [shape: f32[34,3], index: 0, kind: input, shape index: {}]   ;;  %s6162_s1 = inlined_call_operand.hbm [shape: f32[2160,128], index: 1, kind: input, shape index: {}]   ;;  %s6163_s2 = inlined_call_operand.vmem [shape: f32[56,128], index: 2, kind: output, shape index: {}]  }
   0x1   :  { %s15_s10 = sshll.u32 %s5368_s9, 4  ;;  %s5344_s13 = scalar_lea.hbm %s6162_s1, 34560  ;;  %s16_s10 = int_to_ptr.vmem [resolvable:$true] %s15_s10 }
   0x2   :  { %p5345_p0 = scmp.ne.s32.totalorder %s6162_s1, %s5344_s13  ;;  %p5348_p1 = scmp.lt.u32.totalorder %s5344_s13, %s6162_s1 }
   0x4   :  { %p5350_p2 = pnand %p5348_p1, %p5345_p0 }
   0x6   :  { %5353 = shalt.err (!%p5350_p2)
}
   0x7   :  { %s5354_s18 = scalar_lea.vmem %s16_s10, 34560  ;;  %p5359_p4 = scmp.lt.s32.totalorder %s16_s10, %s16_s10 }
   0x8   :  { %p5355_p3 = scmp.ne.s32.totalorder %s16_s10, %s5354_s18  ;;  %p5360_p5 = scmp.lt.s32.totalorder %s5354_s18, %s5354_s18 }
   0xa   :  { %p5361_p6 = por %p5360_p5, %p5359_p4 }
   0xc   :  { %p5362_p7 = pnand %p5361_p6, %p5355_p3 }
   0xe   :  { %5365 = shalt.err (!%p5362_p7)
}
   0xf   :  { %s5369_s19 = smov 128   ;;  %s5370_s20 = smov 8  }
  0x10   :  { %21 = dma.hbm_to_vmem [thread:$0]  %s6162_s1, 34560, %s16_s10, [#allocation3], %s5369_s19, %s5369_s19, %s5370_s20  }
  0x11   :  { %5366 = dma.done.wait [#allocation3], 34560  }
  0x12   :  { %5367 = vsyncadd [#allocation3], 4294932736  ;;  %v5371_v0 = vmov 0.0   ;;  %vm5372_vm0 = vmmov 0   ;;  %v5373_v1 = vmov 2   ;;  %vm68_vm1 = vcmask 1041408  }
  0x13   :  { %4399 = vmatprep.subr.mxu0 %v5371_v0  ;;  %4401 = vmatprep.mubr.msk.f32.mxu0 %vm5372_vm0, %v5371_v0  ;;  %vm52_vm2 = vcmask 15360   ;;  %v46_v2 = vld [vmem:[#allocation2] sm:$0x3]  ;;  %v27_v4 = vld [vmem:[%s6161_s0 + $0x8] sm:$0xff]  ;;  %v28_v5 = vld [vmem:[%s6161_s0 + $0x10] sm:$0xff]  ;;  %vm238_vm8 = vcmask 261120  }
  0x14   :  { %5064 = vset.pattern.permute.xlu0 %v5373_v1  ;;  %5070 = vset.pattern.permute.xlu1 %v5373_v1  ;;  %v26_v3 = vld [vmem:[%s6161_s0] sm:$0xff]  ;;  %v29_v6 = vld [vmem:[%s6161_s0 + $0x18] sm:$0xff]  ;;  %vm32_vm4 = vcmp.ne.f32.partialorder %v27_v4, 0.0  ;;  %vm33_vm5 = vcmp.ne.f32.partialorder %v28_v5, 0.0  ;;  %v4056_v22 = vld [vmem:[#allocation2 + $0x10] ss:$0 sm:$0xff] }
  0x15   :  { %4400 = vmatpush3.msk.msra.mxu0 %vm68_vm1, %v46_v2  ;;  %vm31_vm3 = vcmp.ne.f32.partialorder %v26_v3, 0.0  ;;  %v4045_v8 = vsel %vm32_vm4, 1.0, %v5371_v0  ;;  %vm34_vm6 = vcmp.ne.f32.partialorder %v29_v6, 0.0  ;;  %v4046_v10 = vsel %vm33_vm5, 1.0, %v5371_v0  ;;  %v30_v16 = vld [vmem:[%s6161_s0 + $0x20] sm:$0x3] }
  0x16   :  { %4402 = vmatmul.mubr.msk.f32.vlgmr.msra.gmra.mrb[0].mxu0 %vm52_vm2, %v26_v3  ;;  %v4044_v7 = vsel %vm31_vm3, 1.0, %v5371_v0  ;;  %v4047_v11 = vsel %vm34_vm6, 1.0, %v5371_v0  ;;  %v194_v14 = vsub.f32 1.0, %v4045_v8  ;;  %v195_v15 = vsub.f32 1.0, %v4046_v10  ;;  %v4049_v23 = vld [vmem:[#allocation2 + $0x8] ss:$0 sm:$0xff] }
  0x17   :  { %4404 = vmatprep.mubr.msk.f32.mxu0 %vm5372_vm0, %v5371_v0  ;;  %v5065_v9 = vpack.i.bf16 %v4045_v8, %v4044_v7  ;;  %v193_v12 = vsub.f32 1.0, %v4044_v7  ;;  %v5071_v13 = vpack.i.bf16 %v4047_v11, %v4046_v10  ;;  %v196_v17 = vsub.f32 1.0, %v4047_v11 }
  0x18   :  { %vm35_vm7 = vcmp.ne.f32.partialorder %v30_v16, 0.0  ;;  %vm251_vm9 = vcmask 254976   ;;  %vm356_vm10 = vcmask 277504   ;;  %vm974_vm11 = vcmask 523264  }
  0x19   :  { %5066 = vperm.xlu0 %5064, %v5065_v9   ;;  %5072 = vperm.xlu1 %5070, %v5071_v13   ;;  %v4048_v18 = vsel %vm35_vm7, 1.0, %v5371_v0  ;;  %vm4029_vm3 = vcmask 269312   ;;  %vm2407_vm6 = vcmask 130048   ;;  %vm2624_vm7 = vcmask 1040384  }
  0x1a   :  { %4405 = vmatmul.mubr.msk.f32.gmra.mrb[2].mxu0 %vm52_vm2, %v27_v4  ;;  %v197_v19 = vsub.f32 1.0, %v4048_v18 }
  0x1b   :  { %4407 = vmatprep.mubr.msk.f32.mxu0 %vm5372_vm0, %v5371_v0 }
  0x1d   :  { %204 = vperm.xlu0 %5064, %v193_v12   ;;  %209 = vperm.xlu1 %5070, %v194_v14  }
  0x1e   :  { %4408 = vmatmul.mubr.msk.f32.gmra.mrb[4].mxu0 %vm52_vm2, %v28_v5 }
  0x1f   :  { %4410 = vmatprep.mubr.msk.f32.mxu0 %vm5372_vm0, %v5371_v0 }
  0x21   :  { %214 = vperm.xlu0 %5064, %v195_v15   ;;  %219 = vperm.xlu1 %5070, %v196_v17  }
  0x22   :  { %4411 = vmatmul.mubr.msk.f32.gmra.mrb[6].mxu0 %vm52_vm2, %v29_v6 }
  0x23   :  { %4413 = vmatprep.mubr.msk.f32.mxu0 %vm5372_vm0, %v5371_v0 }
  0x25   :  { %184 = vperm.xlu0 %5064, %v4048_v18   ;;  %224 = vperm.xlu1 %5070, %v197_v19  }
  0x26   :  { %4414 = vmatmul.mubr.msk.f32.gmra.mrb[8].mxu0 %vm52_vm2, %v30_v16 }
  0x27   :  { %4482 = vmatprep.mubr.msk.f32.mxu0 %vm5372_vm0, %v5371_v0 }
  0x98   :  { %v5067_v20 = vpop.permute.xlu0 %5066  ;;  %v5073_v21 = vpop.permute.xlu1 %5072 }
  0x99   :  { %v5068_v24 = vunpack.i.l.bf16 %v5067_v20  ;;  %v5069_v33 = vunpack.i.h.bf16 %v5067_v20  ;;  %v5074_v41 = vunpack.i.l.bf16 %v5073_v21  ;;  %v5075_v51 = vunpack.i.h.bf16 %v5073_v21 }
  0x9c   :  { %v205_v25 = vpop.permute.xlu0 %204  ;;  %v210_v31 = vpop.permute.xlu1 %209 }
  0x9d   :  { %v227_v27 = vmul.f32 %v4056_v22, %v205_v25  ;;  %v228_v34 = vmul.f32 %v4056_v22, %v210_v31  ;;  %v324_v31 = vld [vmem:[#allocation2 + $0x20] sm:$0xff] }
  0x9e   :  { %4426 = vmatprep.mubr.msk.f32.mxu1 %vm356_vm10, %v324_v31  ;;  %v338_v31 = vld [vmem:[#allocation2 + $0x90] sm:$0xff] }
  0xa0   :  { %v215_v45 = vpop.permute.xlu0 %214  ;;  %v220_v46 = vpop.permute.xlu1 %219 }
  0xa1   :  { %v229_v47 = vmul.f32 %v4056_v22, %v215_v45  ;;  %v230_v55 = vmul.f32 %v4056_v22, %v220_v46 }
  0xa4   :  { %v225_v58 = vpop.permute.xlu1 %224  ;;  %v185_v63 = vpop.permute.xlu0 %184 }
  0xa5   :  { %v231_v1 = vmul.f32 %v4056_v22, %v225_v58 }
  0xe9   :  { %v138_v26 = vpop.f32.mrb[0].mxu0 }
  0xea   :  { %v139_v28 = vadd.f32 %v4049_v23, %v138_v26  ;;  %v4403_v29 = vpop.f32.mrb[1].mxu0 }
  0xec   :  { %v187_v30 = vmul.f32 %v5068_v24, %v139_v28 }
  0xed   :  { %v143_v32 = vpop.f32.mrb[2].mxu0 }
  0xee   :  { %v5441_v35 = vadd.f32 %v227_v27, %v187_v30  ;;  %v144_v36 = vadd.f32 %v4049_v23, %v143_v32  ;;  %v4406_v37 = vpop.f32.mrb[3].mxu0 }
  0xef   :  { %v306_v37 = vlaneseq }
  0xf0   :  { %v188_v38 = vmul.f32 %v5069_v33, %v144_v36  ;;  %v239_v39 = vsel %vm238_vm8, %v5441_v35, 0.0 }
  0xf1   :  { %v148_v40 = vpop.f32.mrb[4].mxu0  ;;  %240 = vadd.xlane.f32.xlu0 %v239_v39 }
  0xf2   :  { %v5445_v42 = vadd.f32 %v228_v34, %v188_v38  ;;  %v149_v43 = vadd.f32 %v4049_v23, %v148_v40  ;;  %v4409_v44 = vpop.f32.mrb[5].mxu0 }
  0xf4   :  { %v189_v48 = vmul.f32 %v5074_v41, %v149_v43  ;;  %v242_v49 = vsel %vm238_vm8, %v5445_v42, 0.0  ;;  %v307_v41 = vshrl.u32 %v306_v37, 7 }
  0xf5   :  { %v153_v50 = vpop.f32.mrb[6].mxu0  ;;  %243 = vadd.xlane.f32.xlu1 %v242_v49 }
  0xf6   :  { %v5449_v52 = vadd.f32 %v229_v47, %v189_v48  ;;  %v154_v53 = vadd.f32 %v4049_v23, %v153_v50  ;;  %v4412_v54 = vpop.f32.mrb[7].mxu0  ;;  %v5473_v46 = vsub.s32 0, %v307_v41  ;;  %v237_v48 = vld [vmem:[#allocation2 + $0x18] sm:$0x3] }
  0xf8   :  { %v190_v56 = vmul.f32 %v5075_v51, %v154_v53  ;;  %v245_v57 = vsel %vm238_vm8, %v5449_v52, 0.0  ;;  %v309_v54 = vrot.slane %v237_v48, %v5473_v46 }
  0xf9   :  { %v158_v59 = vpop.f32.mrb[8].mxu0  ;;  %246 = vadd.xlane.f32.xlu0 %v245_v57 }
  0xfa   :  { %v5453_v60 = vadd.f32 %v230_v55, %v190_v56  ;;  %v159_v61 = vadd.f32 %v4049_v23, %v158_v59  ;;  %v4415_v62 = vpop.f32.mrb[9].mxu0  ;;  %v5476_v55 = vsub.s32 1, %v307_v41 }
  0xfc   :  { %v191_v2 = vmul.f32 %v185_v63, %v159_v61  ;;  %v248_v3 = vsel %vm238_vm8, %v5453_v60, 0.0  ;;  %v318_v62 = vrot.slane %v237_v48, %v5476_v55 }
  0xfd   :  { %249 = vadd.xlane.f32.xlu0 %v248_v3 }
  0xfe   :  { %v5457_v4 = vadd.f32 %v231_v1, %v191_v2 }
 0x100   :  { %v252_v5 = vsel %vm251_vm9, %v5457_v4, 0.0 }
 0x101   :  { %253 = vadd.xlane.f32.xlu1 %v252_v5 }
 0x17e   :  { %v241_v6 = vpop.xlane.xlu0 %240 }
 0x17f   :  { %v256_v7 = vmul.f32 0.03125, %v241_v6 }
 0x181   :  { %v261_v8 = vsub.f32 %v5441_v35, %v256_v7 }
 0x182   :  { %v244_v9 = vpop.xlane.xlu1 %243 }
 0x183   :  { %v257_v10 = vmul.f32 0.03125, %v244_v9  ;;  %v266_v11 = vmul.f32 %v261_v8, %v261_v8 }
 0x185   :  { %v262_v12 = vsub.f32 %v5445_v42, %v257_v10  ;;  %v271_v13 = vsel %vm238_vm8, %v266_v11, 0.0 }
 0x186   :  { %272 = vadd.xlane.f32.xlu0 %v271_v13  ;;  %v247_v14 = vpop.xlane.xlu0 %246 }
 0x187   :  { %v258_v15 = vmul.f32 0.03125, %v247_v14  ;;  %v267_v16 = vmul.f32 %v262_v12, %v262_v12 }
 0x189   :  { %v263_v17 = vsub.f32 %v5449_v52, %v258_v15  ;;  %v274_v18 = vsel %vm238_vm8, %v267_v16, 0.0 }
 0x18a   :  { %275 = vadd.xlane.f32.xlu1 %v274_v18  ;;  %v250_v19 = vpop.xlane.xlu0 %249 }
 0x18b   :  { %v259_v20 = vmul.f32 0.03125, %v250_v19  ;;  %v268_v21 = vmul.f32 %v263_v17, %v263_v17  ;;  %v325_v19 = vld [vmem:[#allocation2 + $0x28] sm:$0xff] }
 0x18d   :  { %v264_v22 = vsub.f32 %v5453_v60, %v259_v20  ;;  %v277_v23 = vsel %vm238_vm8, %v268_v21, 0.0  ;;  %v327_v20 = vld [vmem:[#allocation2 + $0x38] sm:$0xff]  ;;  %v328_v21 = vld [vmem:[#allocation2 + $0x40] sm:$0xff] }
 0x18e   :  { %v254_v24 = vpop.xlane.xlu1 %253  ;;  %278 = vadd.xlane.f32.xlu0 %v277_v23  ;;  %v330_v23 = vld [vmem:[#allocation2 + $0x50] sm:$0xff] }
 0x18f   :  { %v260_v25 = vmul.f32 0.03125, %v254_v24  ;;  %v269_v26 = vmul.f32 %v264_v22, %v264_v22  ;;  %v331_v24 = vld [vmem:[#allocation2 + $0x58] sm:$0xff] }
 0x191   :  { %v265_v27 = vsub.f32 %v5457_v4, %v260_v25  ;;  %v280_v28 = vsel %vm238_vm8, %v269_v26, 0.0  ;;  %v332_v25 = vld [vmem:[#allocation2 + $0x60] sm:$0xff]  ;;  %v333_v26 = vld [vmem:[#allocation2 + $0x68] sm:$0xff] }
 0x192   :  { %281 = vadd.xlane.f32.xlu1 %v280_v28  ;;  %v335_v28 = vld [vmem:[#allocation2 + $0x78] sm:$0xff] }
 0x193   :  { %v270_v29 = vmul.f32 %v265_v27, %v265_v27 }
 0x195   :  { %v283_v30 = vsel %vm251_vm9, %v270_v29, 0.0  ;;  %v336_v29 = vld [vmem:[#allocation2 + $0x80] sm:$0xff] }
 0x196   :  { %284 = vadd.xlane.f32.xlu0 %v283_v30  ;;  %v337_v30 = vld [vmem:[#allocation2 + $0x88] sm:$0xff] }
 0x213   :  { %v273_v32 = vpop.xlane.xlu0 %272 }
 0x214   :  { %v286_v33 = vmul.f32 0.03125, %v273_v32  ;;  %v339_v32 = vld [vmem:[#allocation2 + $0x98] sm:$0xff] }
 0x216   :  { %v291_v34 = vadd.f32 1e-05, %v286_v33  ;;  %v5374_v33 = vmov 0.0|0.0  }
 0x217   :  { %v276_v36 = vpop.xlane.xlu1 %275  ;;  %4939 = vmatprep.subr.bf16.mxu0 %v5374_v33 }
 0x218   :  { %5076 = vrsqrt.f32 %v291_v34  ;;  %v287_v38 = vmul.f32 0.03125, %v276_v36  ;;  %v341_v34 = vld [vmem:[#allocation2 + $0xa8] sm:$0xff]  ;;  %v340_v36 = vld [vmem:[#allocation2 + $0xa0] sm:$0xff] }
 0x21a   :  { %v292_v39 = vadd.f32 1e-05, %v287_v38 }
 0x21b   :  { %v279_v40 = vpop.xlane.xlu0 %278 }
 0x21c   :  { %5078 = vrsqrt.f32 %v292_v39  ;;  %v288_v43 = vmul.f32 0.03125, %v279_v40 }
 0x21e   :  { %v293_v44 = vadd.f32 1e-05, %v288_v43  ;;  %v343_v43 = vld [vmem:[#allocation2 + $0xb8] sm:$0xff] }
 0x21f   :  { %v282_v45 = vpop.xlane.xlu1 %281 }
 0x220   :  { %5080 = vrsqrt.f32 %v293_v44  ;;  %v289_v47 = vmul.f32 0.03125, %v282_v45  ;;  %v342_v45 = vld [vmem:[#allocation2 + $0xb0] sm:$0xff] }
 0x222   :  { %v5077_v49 = vpop.eup %5076  ;;  %v294_v50 = vadd.f32 1e-05, %v289_v47 }
 0x223   :  { %v285_v51 = vpop.xlane.xlu0 %284  ;;  %v301_v53 = vmul.f32 %v5077_v49, %v261_v8 }
 0x224   :  { %5082 = vrsqrt.f32 %v294_v50  ;;  %v290_v56 = vmul.f32 0.03125, %v285_v51 }
 0x225   :  { %v310_v61 = vmul.f32 %v309_v54, %v301_v53  ;;  %v345_v53 = vld [vmem:[#allocation2 + $0xc8] sm:$0xff] }
 0x226   :  { %v5079_v57 = vpop.eup %5078  ;;  %v295_v58 = vadd.f32 1e-05, %v290_v56  ;;  %v344_v56 = vld [vmem:[#allocation2 + $0xc0] sm:$0xff] }
 0x227   :  { %v302_v59 = vmul.f32 %v5079_v57, %v262_v12  ;;  %v319_v2 = vadd.f32 %v318_v62, %v310_v61 }
 0x228   :  { %5084 = vrsqrt.f32 %v295_v58 }
 0x229   :  { %v311_v63 = vmul.f32 %v309_v54, %v302_v59 }
 0x22a   :  { %v5081_v1 = vpop.eup %5080 }
 0x22b   :  { %v320_v3 = vadd.f32 %v318_v62, %v311_v63  ;;  %v303_v5 = vmul.f32 %v5081_v1, %v263_v17  ;;  %v326_v17 = vld [vmem:[#allocation2 + $0x30] sm:$0xff]  ;;  %v347_v63 = vld [vmem:[#allocation2 + $0xd8] sm:$0xff] }
 0x22d   :  { %v4931_v6 = vpack.c.bf16 %v320_v3, %v319_v2  ;;  %v312_v9 = vmul.f32 %v309_v54, %v303_v5  ;;  %v346_v2 = vld [vmem:[#allocation2 + $0xd0] sm:$0xff] }
 0x22e   :  { %v5083_v7 = vpop.eup %5082 }
 0x22f   :  { %4932 = vmatprep.subr.bf16.mxu1 %v4931_v6  ;;  %v304_v8 = vmul.f32 %v5083_v7, %v264_v22  ;;  %v321_v13 = vadd.f32 %v318_v62, %v312_v9  ;;  %v329_v22 = vld [vmem:[#allocation2 + $0x48] sm:$0xff] }
 0x230   :  { %4934 = vmatpush3.bf16.msra.mxu1 %v4931_v6  ;;  %v349_v9 = vld [vmem:[#allocation2 + $0xe8] sm:$0xff] }
 0x231   :  { %v313_v10 = vmul.f32 %v309_v54, %v304_v8 }
 0x232   :  { %v5085_v11 = vpop.eup %5084 }
 0x233   :  { %v322_v14 = vadd.f32 %v318_v62, %v313_v10  ;;  %v305_v12 = vmul.f32 %v5085_v11, %v265_v27  ;;  %v334_v27 = vld [vmem:[#allocation2 + $0x70] sm:$0xff] }
 0x235   :  { %v4935_v15 = vpack.c.bf16 %v322_v14, %v321_v13  ;;  %v314_v16 = vmul.f32 %v309_v54, %v305_v12  ;;  %v348_v13 = vld [vmem:[#allocation2 + $0xe0] sm:$0xff] }
 0x237   :  { %4936 = vmatprep.subr.bf16.mxu1 %v4935_v15  ;;  %v323_v18 = vadd.f32 %v318_v62, %v314_v16 }
 0x238   :  { %4938 = vmatpush3.bf16.msra.mxu1 %v4935_v15 }
 0x239   :  { %4424 = vmatprep.subr.msk.mxu1 %vm68_vm1, %v323_v18 }
 0x23c   :  { %4425 = vmatpush3.msk.msra.mxu1 %vm68_vm1, %v323_v18 }
 0x23d   :  { %4427 = vmatmul.mubr.msk.f32.vlgmr.msra.gmra.mrb[0].mxu1 %vm356_vm10, %v325_v19  ;;  %4963 = vmatprep.subr.bf16.mxu1 %v5374_v33 }
 0x23e   :  { %4429 = vmatprep.mubr.msk.f32.mxu1 %vm356_vm10, %v326_v17 }
 0x241   :  { %4430 = vmatmul.mubr.msk.f32.gmra.mrb[2].mxu1 %vm356_vm10, %v327_v20 }
 0x242   :  { %4432 = vmatprep.mubr.msk.f32.mxu1 %vm356_vm10, %v328_v21 }
 0x245   :  { %4433 = vmatmul.mubr.msk.f32.gmra.mrb[4].mxu1 %vm356_vm10, %v329_v22 }
 0x246   :  { %4435 = vmatprep.mubr.msk.f32.mxu1 %vm356_vm10, %v330_v23 }
 0x249   :  { %4436 = vmatmul.mubr.msk.f32.gmra.mrb[6].mxu1 %vm356_vm10, %v331_v24  ;;  %v351_v24 = vld [vmem:[#allocation2 + $0xf8] sm:$0xff] }
 0x24a   :  { %4438 = vmatprep.mubr.msk.f32.mxu1 %vm356_vm10, %v332_v25 }
 0x24d   :  { %4439 = vmatmul.mubr.msk.f32.gmra.mrb[8].mxu1 %vm356_vm10, %v333_v26 }
 0x24e   :  { %4441 = vmatprep.mubr.msk.f32.mxu1 %vm356_vm10, %v334_v27 }
 0x251   :  { %4442 = vmatmul.mubr.msk.f32.gmra.mrb[10].mxu1 %vm356_vm10, %v335_v28  ;;  %v350_v28 = vld [vmem:[#allocation2 + $0xf0] sm:$0xff] }
 0x252   :  { %4444 = vmatprep.mubr.msk.f32.mxu1 %vm356_vm10, %v336_v29 }
 0x255   :  { %4445 = vmatmul.mubr.msk.f32.gmra.mrb[12].mxu1 %vm356_vm10, %v337_v30 }
 0x256   :  { %4447 = vmatprep.mubr.msk.f32.mxu1 %vm356_vm10, %v338_v31 }
 0x259   :  { %4448 = vmatmul.mubr.msk.f32.gmra.mrb[14].mxu1 %vm356_vm10, %v339_v32 }
 0x25a   :  { %4505 = vmatprep.mubr.msk.f32.mxu1 %vm5372_vm0, %v5371_v0 }
 0x310   :  { %v4428_v38 = vpop.f32.mrb[0].mxu1 }
 0x311   :  { %v480_v39 = vadd.f32 %v4428_v38, %v341_v34  ;;  %v474_v40 = vpop.f32.mrb[1].mxu1 }
 0x312   :  { %v475_v41 = vadd.f32 %v474_v40, %v340_v36 }
 0x313   :  { %v570_v44 = vmul.f32 0.70710677, %v480_v39  ;;  %v554_v12 = vmul.f32 0.5, %v480_v39 }
 0x314   :  { %v569_v47 = vmul.f32 0.70710677, %v475_v41  ;;  %v4431_v48 = vpop.f32.mrb[2].mxu1  ;;  %v553_v19 = vmul.f32 0.5, %v475_v41 }
 0x315   :  { %5086 = verf.f32 %v570_v44  ;;  %v490_v49 = vadd.f32 %v4431_v48, %v343_v43  ;;  %v484_v50 = vpop.f32.mrb[3].mxu1 }
 0x316   :  { %5088 = verf.f32 %v569_v47  ;;  %v485_v51 = vadd.f32 %v484_v50, %v342_v45  ;;  %v353_v45 = vld [vmem:[#allocation2 + $0x108] sm:$0xff]  ;;  %v352_v50 = vld [vmem:[#allocation2 + $0x100] sm:$0xff] }
 0x317   :  { %v572_v54 = vmul.f32 0.70710677, %v490_v49  ;;  %v556_v30 = vmul.f32 0.5, %v490_v49 }
 0x318   :  { %v571_v57 = vmul.f32 0.70710677, %v485_v51  ;;  %v4434_v58 = vpop.f32.mrb[4].mxu1  ;;  %v555_v32 = vmul.f32 0.5, %v485_v51 }
 0x319   :  { %5090 = verf.f32 %v572_v54  ;;  %v500_v59 = vadd.f32 %v4434_v58, %v345_v53  ;;  %v494_v61 = vpop.f32.mrb[5].mxu1 }
 0x31a   :  { %5092 = verf.f32 %v571_v57  ;;  %v495_v62 = vadd.f32 %v494_v61, %v344_v56 }
 0x31b   :  { %v574_v1 = vmul.f32 0.70710677, %v500_v59  ;;  %v558_v53 = vmul.f32 0.5, %v500_v59  ;;  %v354_v59 = vld [vmem:[#allocation2 + $0x110] sm:$0xff] }
 0x31c   :  { %v573_v3 = vmul.f32 0.70710677, %v495_v62  ;;  %v4437_v5 = vpop.f32.mrb[6].mxu1  ;;  %v557_v56 = vmul.f32 0.5, %v495_v62 }
 0x31d   :  { %5094 = verf.f32 %v574_v1  ;;  %v5500_v6 = vadd.f32 %v4437_v5, %v347_v63  ;;  %v504_v7 = vpop.f32.mrb[7].mxu1 }
 0x31e   :  { %5096 = verf.f32 %v573_v3  ;;  %v5502_v8 = vadd.f32 %v504_v7, %v346_v2  ;;  %v355_v7 = vld [vmem:[#allocation2 + $0x118] sm:$0xff] }
 0x31f   :  { %v5087_v10 = vpop.eup %5086  ;;  %v576_v11 = vmul.f32 0.70710677, %v5500_v6 }
 0x320   :  { %v5089_v14 = vpop.eup %5088  ;;  %v602_v15 = vadd.f32 1.0, %v5087_v10  ;;  %v575_v16 = vmul.f32 0.70710677, %v5502_v8  ;;  %v4440_v18 = vpop.f32.mrb[8].mxu1 }
 0x321   :  { %v601_v17 = vadd.f32 1.0, %v5089_v14  ;;  %5098 = verf.f32 %v576_v11  ;;  %v5506_v20 = vadd.f32 %v4440_v18, %v349_v9  ;;  %v514_v21 = vpop.f32.mrb[9].mxu1 }
 0x322   :  { %v618_v22 = vmul.f32 %v602_v15, %v554_v12  ;;  %5100 = verf.f32 %v575_v16  ;;  %v5508_v23 = vadd.f32 %v514_v21, %v348_v13  ;;  %v560_v13 = vmul.f32 0.5, %v5500_v6 }
 0x323   :  { %v5091_v25 = vpop.eup %5090  ;;  %v617_v26 = vmul.f32 %v601_v17, %v553_v19  ;;  %v578_v27 = vmul.f32 0.70710677, %v5506_v20  ;;  %v559_v12 = vmul.f32 0.5, %v5502_v8 }
 0x324   :  { %v5093_v29 = vpop.eup %5092  ;;  %v604_v31 = vadd.f32 1.0, %v5091_v25  ;;  %v577_v34 = vmul.f32 0.70710677, %v5508_v23  ;;  %v4443_v36 = vpop.f32.mrb[10].mxu1 }
 0x325   :  { %v4940_v38 = vpack.c.bf16 %v618_v22, %v617_v26  ;;  %v603_v39 = vadd.f32 1.0, %v5093_v29  ;;  %5102 = verf.f32 %v578_v27  ;;  %v5512_v40 = vadd.f32 %v4443_v36, %v351_v24  ;;  %v524_v41 = vpop.f32.mrb[11].mxu1 }
 0x326   :  { %v620_v43 = vmul.f32 %v604_v31, %v556_v30  ;;  %5104 = verf.f32 %v577_v34  ;;  %v5514_v44 = vadd.f32 %v524_v41, %v350_v28  ;;  %v562_v28 = vmul.f32 0.5, %v5506_v20 }
 0x327   :  { %v5095_v47 = vpop.eup %5094  ;;  %v619_v48 = vmul.f32 %v603_v39, %v555_v32  ;;  %v580_v49 = vmul.f32 0.70710677, %v5512_v40  ;;  %4941 = vmatpush3.bf16.msra.mxu0 %v4940_v38  ;;  %v561_v31 = vmul.f32 0.5, %v5508_v23  ;;  %v564_v41 = vmul.f32 0.5, %v5512_v40 }
 0x328   :  { %v5097_v51 = vpop.eup %5096  ;;  %v606_v54 = vadd.f32 1.0, %v5095_v47  ;;  %v579_v57 = vmul.f32 0.70710677, %v5514_v44  ;;  %v4446_v58 = vpop.f32.mrb[12].mxu1  ;;  %4942 = vmatprep.subr.bf16.mxu0 %v5374_v33 }
 0x329   :  { %v4943_v61 = vpack.c.bf16 %v620_v43, %v619_v48  ;;  %v605_v63 = vadd.f32 1.0, %v5097_v51  ;;  %5106 = verf.f32 %v580_v49  ;;  %v540_v1 = vadd.f32 %v4446_v58, %v353_v45  ;;  %v534_v2 = vpop.f32.mrb[13].mxu1 }
 0x32a   :  { %v622_v3 = vmul.f32 %v606_v54, %v558_v53  ;;  %5108 = verf.f32 %v579_v57  ;;  %v535_v5 = vadd.f32 %v534_v2, %v352_v50  ;;  %v563_v45 = vmul.f32 0.5, %v5514_v44 }
 0x32b   :  { %v5099_v9 = vpop.eup %5098  ;;  %v621_v10 = vmul.f32 %v605_v63, %v557_v56  ;;  %v582_v11 = vmul.f32 0.70710677, %v540_v1  ;;  %4944 = vmatpush3.bf16.msra.mxu0 %v4943_v61  ;;  %v566_v51 = vmul.f32 0.5, %v540_v1 }
 0x32c   :  { %v5101_v62 = vpop.eup %5100  ;;  %v608_v14 = vadd.f32 1.0, %v5099_v9  ;;  %v581_v15 = vmul.f32 0.70710677, %v535_v5  ;;  %v4449_v16 = vpop.f32.mrb[14].mxu1  ;;  %4945 = vmatprep.subr.bf16.mxu0 %v5374_v33  ;;  %v565_v56 = vmul.f32 0.5, %v535_v5  ;;  %v633_v5 = vld [vmem:[#allocation2 + $0x120] sm:$0xff] }
 0x32d   :  { %v4946_v18 = vpack.c.bf16 %v622_v3, %v621_v10  ;;  %v607_v19 = vadd.f32 1.0, %v5101_v62  ;;  %5110 = verf.f32 %v582_v11  ;;  %v550_v17 = vadd.f32 %v4449_v16, %v355_v7  ;;  %v544_v21 = vpop.f32.mrb[15].mxu1  ;;  %v635_v62 = vld [vmem:[#allocation2 + $0x130] sm:$0xff] }
 0x32e   :  { %v624_v22 = vmul.f32 %v608_v14, %v560_v13  ;;  %5112 = verf.f32 %v581_v15  ;;  %v545_v24 = vadd.f32 %v544_v21, %v354_v59  ;;  %v634_v59 = vld [vmem:[#allocation2 + $0x128] sm:$0xff]  ;;  %v636_v13 = vld [vmem:[#allocation2 + $0x138] sm:$0xff]  ;;  %v637_v14 = vld [vmem:[#allocation2 + $0x140] sm:$0x3] }
 0x32f   :  { %v5103_v25 = vpop.eup %5102  ;;  %v623_v26 = vmul.f32 %v607_v19, %v559_v12  ;;  %v584_v27 = vmul.f32 0.70710677, %v550_v17  ;;  %4947 = vmatpush3.bf16.msra.mxu0 %v4946_v18  ;;  %v568_v2 = vmul.f32 0.5, %v550_v17  ;;  %v638_v12 = vld [vmem:[#allocation2 + $0x148] sm:$0xff]  ;;  %v639_v19 = vld [vmem:[#allocation2 + $0x150] sm:$0xff] }
 0x330   :  { %v5105_v6 = vpop.eup %5104  ;;  %v610_v8 = vadd.f32 1.0, %v5103_v25  ;;  %v583_v29 = vmul.f32 0.70710677, %v545_v24  ;;  %4948 = vmatprep.subr.bf16.mxu0 %v5374_v33  ;;  %v567_v7 = vmul.f32 0.5, %v545_v24 }
 0x331   :  { %v4949_v30 = vpack.c.bf16 %v624_v22, %v623_v26  ;;  %v609_v32 = vadd.f32 1.0, %v5105_v6  ;;  %5114 = verf.f32 %v584_v27  ;;  %v640_v26 = vld [vmem:[#allocation2 + $0x158] sm:$0xff] }
 0x332   :  { %v626_v34 = vmul.f32 %v610_v8, %v562_v28  ;;  %5116 = verf.f32 %v583_v29 }
 0x333   :  { %v5107_v36 = vpop.eup %5106  ;;  %v625_v38 = vmul.f32 %v609_v32, %v561_v31  ;;  %4950 = vmatpush3.bf16.msra.mxu0 %v4949_v30 }
 0x334   :  { %v5109_v39 = vpop.eup %5108  ;;  %v612_v43 = vadd.f32 1.0, %v5107_v36  ;;  %4951 = vmatprep.subr.bf16.mxu0 %v5374_v33 }
 0x335   :  { %v4952_v20 = vpack.c.bf16 %v626_v34, %v625_v38  ;;  %v611_v47 = vadd.f32 1.0, %v5109_v39 }
 0x336   :  { %v628_v48 = vmul.f32 %v612_v43, %v564_v41 }
 0x337   :  { %v5111_v49 = vpop.eup %5110  ;;  %v627_v23 = vmul.f32 %v611_v47, %v563_v45  ;;  %4953 = vmatpush3.bf16.msra.mxu0 %v4952_v20  ;;  %v822_v47 = vld [vmem:[#allocation2 + $0x178] sm:$0xff] }
 0x338   :  { %v5113_v50 = vpop.eup %5112  ;;  %v614_v53 = vadd.f32 1.0, %v5111_v49  ;;  %4954 = vmatprep.subr.bf16.mxu0 %v5374_v33 }
 0x339   :  { %v4955_v54 = vpack.c.bf16 %v628_v48, %v627_v23  ;;  %v613_v57 = vadd.f32 1.0, %v5113_v50  ;;  %v823_v48 = vld [vmem:[#allocation2 + $0x180] sm:$0xff] }
 0x33a   :  { %v630_v40 = vmul.f32 %v614_v53, %v566_v51  ;;  %v4964_v49 = vpack.c.bf16 %v823_v48, %v822_v47 }
 0x33b   :  { %v5115_v58 = vpop.eup %5114  ;;  %v629_v61 = vmul.f32 %v613_v57, %v565_v56  ;;  %4956 = vmatpush3.bf16.msra.mxu0 %v4955_v54 }
 0x33c   :  { %v5117_v63 = vpop.eup %5116  ;;  %v616_v44 = vadd.f32 1.0, %v5115_v58  ;;  %4957 = vmatprep.subr.bf16.mxu0 %v5374_v33  ;;  %4965 = vmatpush3.bf16.msra.mxu1 %v4964_v49 }
 0x33d   :  { %v4958_v3 = vpack.c.bf16 %v630_v40, %v629_v61  ;;  %v615_v9 = vadd.f32 1.0, %v5117_v63  ;;  %4966 = vmatprep.subr.bf16.mxu1 %v5374_v33 }
 0x33e   :  { %v632_v10 = vmul.f32 %v616_v44, %v568_v2 }
 0x33f   :  { %v631_v1 = vmul.f32 %v615_v9, %v567_v7  ;;  %4959 = vmatpush3.bf16.msra.mxu0 %v4958_v3 }
 0x340   :  { %4960 = vmatprep.subr.bf16.mxu0 %v5374_v33 }
 0x341   :  { %v4961_v11 = vpack.c.bf16 %v632_v10, %v631_v1 }
 0x343   :  { %4962 = vmatpush3.bf16.msra.mxu0 %v4961_v11 }
 0x344   :  { %4969 = vmatprep.subr.bf16.mxu0 %v5374_v33 }
 0x346   :  { %4483 = vmatmul.mubr.f32.vlgmr.msra.gmra.mrb[10].mxu0 %v633_v5 }
 0x347   :  { %4485 = vmatprep.mubr.msk.f32.mxu0 %vm5372_vm0, %v5371_v0 }
 0x34a   :  { %4486 = vmatmul.mubr.f32.gmra.mrb[12].mxu0 %v634_v59 }
 0x34b   :  { %4488 = vmatprep.mubr.msk.f32.mxu0 %vm5372_vm0, %v5371_v0 }
 0x34e   :  { %4489 = vmatmul.mubr.f32.gmra.mrb[14].mxu0 %v635_v62 }
 0x34f   :  { %4491 = vmatprep.mubr.msk.f32.mxu0 %vm5372_vm0, %v5371_v0 }
 0x352   :  { %4492 = vmatmul.mubr.f32.gmra.mrb[16].mxu0 %v636_v13 }
 0x353   :  { %4494 = vmatprep.mubr.msk.f32.mxu0 %vm5372_vm0, %v5371_v0 }
 0x356   :  { %4495 = vmatmul.mubr.f32.gmra.mrb[18].mxu0 %v637_v14  ;;  %v824_v14 = vld [vmem:[#allocation2 + $0x188] sm:$0xff] }
 0x357   :  { %4536 = vmatprep.mubr.msk.f32.mxu0 %vm5372_vm0, %v5371_v0 }
 0x419   :  { %v709_v15 = vpop.f32.mrb[10].mxu0 }
 0x41a   :  { %v710_v16 = vadd.f32 %v709_v15, %v638_v12  ;;  %v4484_v18 = vpop.f32.mrb[11].mxu0  ;;  %v825_v12 = vld [vmem:[#allocation2 + $0x190] sm:$0xff] }
 0x41b   :  { %v4967_v15 = vpack.c.bf16 %v825_v12, %v824_v14 }
 0x41c   :  { %v5543_v17 = vadd.f32 %v710_v16, %v5441_v35  ;;  %v641_v35 = vld [vmem:[#allocation2 + $0x160] sm:$0xff] }
 0x41d   :  { %v714_v21 = vpop.f32.mrb[12].mxu0  ;;  %4968 = vmatpush3.bf16.msra.mxu1 %v4967_v15 }
 0x41e   :  { %v715_v22 = vadd.f32 %v714_v21, %v639_v19  ;;  %v4487_v24 = vpop.f32.mrb[13].mxu0  ;;  %v739_v25 = vsel %vm238_vm8, %v5543_v17, 0.0 }
 0x41f   :  { %740 = vadd.xlane.f32.xlu1 %v739_v25 }
 0x420   :  { %v5548_v27 = vadd.f32 %v715_v22, %v5445_v42  ;;  %v642_v42 = vld [vmem:[#allocation2 + $0x168] sm:$0x3] }
 0x421   :  { %v719_v6 = vpop.f32.mrb[14].mxu0 }
 0x422   :  { %v720_v28 = vadd.f32 %v719_v6, %v640_v26  ;;  %v4490_v8 = vpop.f32.mrb[15].mxu0  ;;  %v742_v29 = vsel %vm238_vm8, %v5548_v27, 0.0  ;;  %v733_v6 = vld [vmem:[#allocation2 + $0x170] sm:$0x3] }
 0x423   :  { %743 = vadd.xlane.f32.xlu0 %v742_v29 }
 0x424   :  { %v5553_v30 = vadd.f32 %v720_v28, %v5449_v52 }
 0x425   :  { %v724_v31 = vpop.f32.mrb[16].mxu0 }
 0x426   :  { %v725_v32 = vadd.f32 %v724_v31, %v641_v35  ;;  %v4493_v34 = vpop.f32.mrb[17].mxu0  ;;  %v745_v36 = vsel %vm238_vm8, %v5553_v30, 0.0  ;;  %v807_v35 = vrot.slane %v733_v6, %v5473_v46 }
 0x427   :  { %746 = vadd.xlane.f32.xlu1 %v745_v36  ;;  %v816_v34 = vrot.slane %v733_v6, %v5476_v55 }
 0x428   :  { %v5558_v38 = vadd.f32 %v725_v32, %v5453_v60 }
 0x429   :  { %v729_v39 = vpop.f32.mrb[18].mxu0 }
 0x42a   :  { %v730_v41 = vadd.f32 %v729_v39, %v642_v42  ;;  %v748_v43 = vsel %vm238_vm8, %v5558_v38, 0.0  ;;  %v4496_v20 = vpop.f32.mrb[19].mxu0 }
 0x42b   :  { %749 = vadd.xlane.f32.xlu0 %v748_v43 }
 0x42c   :  { %v5563_v52 = vadd.f32 %v730_v41, %v5457_v4 }
 0x42e   :  { %v751_v45 = vsel %vm251_vm9, %v5563_v52, 0.0 }
 0x42f   :  { %752 = vadd.xlane.f32.xlu1 %v751_v45 }
 0x4ac   :  { %v741_v60 = vpop.xlane.xlu1 %740 }
 0x4ad   :  { %v754_v23 = vmul.f32 0.03125, %v741_v60 }
 0x4af   :  { %v759_v50 = vsub.f32 %v5543_v17, %v754_v23 }
 0x4b0   :  { %v744_v51 = vpop.xlane.xlu0 %743 }
 0x4b1   :  { %v755_v53 = vmul.f32 0.03125, %v744_v51  ;;  %v764_v54 = vmul.f32 %v759_v50, %v759_v50 }
 0x4b3   :  { %v760_v4 = vsub.f32 %v5548_v27, %v755_v53  ;;  %v769_v56 = vsel %vm238_vm8, %v764_v54, 0.0 }
 0x4b4   :  { %v747_v57 = vpop.xlane.xlu1 %746  ;;  %770 = vadd.xlane.f32.xlu0 %v769_v56 }
 0x4b5   :  { %v756_v40 = vmul.f32 0.03125, %v747_v57  ;;  %v765_v58 = vmul.f32 %v760_v4, %v760_v4 }
 0x4b7   :  { %v761_v61 = vsub.f32 %v5553_v30, %v756_v40  ;;  %v772_v63 = vsel %vm238_vm8, %v765_v58, 0.0 }
 0x4b8   :  { %v750_v2 = vpop.xlane.xlu0 %749  ;;  %773 = vadd.xlane.f32.xlu1 %v772_v63  ;;  %v961_v63 = vld [vmem:[#allocation2 + $0x1a0] sm:$0xff] }
 0x4b9   :  { %v757_v44 = vmul.f32 0.03125, %v750_v2  ;;  %v766_v3 = vmul.f32 %v761_v61, %v761_v61  ;;  %v962_v2 = vld [vmem:[#allocation2 + $0x1a8] sm:$0xff] }
 0x4bb   :  { %v762_v7 = vsub.f32 %v5558_v38, %v757_v44  ;;  %v775_v9 = vsel %vm238_vm8, %v766_v3, 0.0  ;;  %v4970_v44 = vpack.c.bf16 %v962_v2, %v961_v63  ;;  %v963_v3 = vld [vmem:[#allocation2 + $0x1b0] sm:$0xff] }
 0x4bc   :  { %776 = vadd.xlane.f32.xlu0 %v775_v9  ;;  %v753_v10 = vpop.xlane.xlu1 %752 }
 0x4bd   :  { %v758_v1 = vmul.f32 0.03125, %v753_v10  ;;  %v767_v11 = vmul.f32 %v762_v7, %v762_v7  ;;  %4971 = vmatpush3.bf16.msra.mxu0 %v4970_v44  ;;  %v965_v10 = vld [vmem:[#allocation2 + $0x1c0] sm:$0xff] }
 0x4be   :  { %4972 = vmatprep.subr.bf16.mxu0 %v5374_v33 }
 0x4bf   :  { %v763_v5 = vsub.f32 %v5563_v52, %v758_v1  ;;  %v778_v59 = vsel %vm238_vm8, %v767_v11, 0.0  ;;  %v966_v1 = vld [vmem:[#allocation2 + $0x1c8] sm:$0xff] }
 0x4c0   :  { %779 = vadd.xlane.f32.xlu1 %v778_v59  ;;  %v4976_v11 = vpack.c.bf16 %v966_v1, %v965_v10  ;;  %v968_v59 = vld [vmem:[#allocation2 + $0x1d8] sm:$0xff] }
 0x4c1   :  { %v768_v62 = vmul.f32 %v763_v5, %v763_v5 }
 0x4c3   :  { %v781_v13 = vsel %vm251_vm9, %v768_v62, 0.0 }
 0x4c4   :  { %782 = vadd.xlane.f32.xlu0 %v781_v13  ;;  %v4074_v13 = vld [vmem:[#allocation2 + $0x198] ss:$0 sm:$0xff] }
 0x541   :  { %v771_v16 = vpop.xlane.xlu0 %770 }
 0x542   :  { %v784_v18 = vmul.f32 0.03125, %v771_v16 }
 0x544   :  { %v789_v19 = vadd.f32 1e-05, %v784_v18 }
 0x545   :  { %v774_v21 = vpop.xlane.xlu1 %773 }
 0x546   :  { %5118 = vrsqrt.f32 %v789_v19  ;;  %v785_v22 = vmul.f32 0.03125, %v774_v21 }
 0x548   :  { %v790_v24 = vadd.f32 1e-05, %v785_v22 }
 0x549   :  { %v777_v25 = vpop.xlane.xlu0 %776 }
 0x54a   :  { %5120 = vrsqrt.f32 %v790_v24  ;;  %v786_v26 = vmul.f32 0.03125, %v777_v25 }
 0x54c   :  { %v791_v28 = vadd.f32 1e-05, %v786_v26 }
 0x54d   :  { %v780_v8 = vpop.xlane.xlu1 %779 }
 0x54e   :  { %5122 = vrsqrt.f32 %v791_v28  ;;  %v787_v29 = vmul.f32 0.03125, %v780_v8 }
 0x550   :  { %v5119_v31 = vpop.eup %5118  ;;  %v792_v32 = vadd.f32 1e-05, %v787_v29 }
 0x551   :  { %v799_v36 = vmul.f32 %v5119_v31, %v759_v50  ;;  %v783_v42 = vpop.xlane.xlu0 %782 }
 0x552   :  { %5124 = vrsqrt.f32 %v792_v32  ;;  %v788_v39 = vmul.f32 0.03125, %v783_v42 }
 0x553   :  { %v808_v41 = vmul.f32 %v807_v35, %v799_v36 }
 0x554   :  { %v5121_v43 = vpop.eup %5120  ;;  %v793_v20 = vadd.f32 1e-05, %v788_v39 }
 0x555   :  { %v817_v45 = vadd.f32 %v816_v34, %v808_v41  ;;  %v800_v47 = vmul.f32 %v5121_v43, %v760_v4 }
 0x556   :  { %5126 = vrsqrt.f32 %v793_v20 }
 0x557   :  { %4506 = vmatmul.mubr.msk.f32.vlgmr.msra.gmra.mrb[16].mxu1 %vm238_vm8, %v817_v45  ;;  %v809_v48 = vmul.f32 %v807_v35, %v800_v47 }
 0x558   :  { %v5123_v49 = vpop.eup %5122  ;;  %4508 = vmatprep.mubr.msk.f32.mxu1 %vm5372_vm0, %v5371_v0 }
 0x559   :  { %v818_v60 = vadd.f32 %v816_v34, %v809_v48  ;;  %v801_v23 = vmul.f32 %v5123_v49, %v761_v61 }
 0x55b   :  { %4509 = vmatmul.mubr.msk.f32.gmra.mrb[18].mxu1 %vm238_vm8, %v818_v60  ;;  %v810_v50 = vmul.f32 %v807_v35, %v801_v23 }
 0x55c   :  { %v5125_v51 = vpop.eup %5124  ;;  %4511 = vmatprep.mubr.msk.f32.mxu1 %vm5372_vm0, %v5371_v0 }
 0x55d   :  { %v819_v53 = vadd.f32 %v816_v34, %v810_v50  ;;  %v802_v54 = vmul.f32 %v5125_v51, %v762_v7  ;;  %v964_v7 = vld [vmem:[#allocation2 + $0x1b8] sm:$0xff] }
 0x55e   :  { %v4973_v9 = vpack.c.bf16 %v964_v7, %v963_v3 }
 0x55f   :  { %4512 = vmatmul.mubr.msk.f32.gmra.mrb[20].mxu1 %vm238_vm8, %v819_v53  ;;  %v811_v4 = vmul.f32 %v807_v35, %v802_v54 }
 0x560   :  { %v5127_v56 = vpop.eup %5126  ;;  %4514 = vmatprep.mubr.msk.f32.mxu1 %vm5372_vm0, %v5371_v0  ;;  %4974 = vmatpush3.bf16.msra.mxu0 %v4973_v9 }
 0x561   :  { %v820_v57 = vadd.f32 %v816_v34, %v811_v4  ;;  %v803_v40 = vmul.f32 %v5127_v56, %v763_v5  ;;  %4975 = vmatprep.subr.bf16.mxu0 %v5374_v33  ;;  %v967_v5 = vld [vmem:[#allocation2 + $0x1d0] sm:$0xff] }
 0x562   :  { %v4979_v62 = vpack.c.bf16 %v968_v59, %v967_v5 }
 0x563   :  { %4515 = vmatmul.mubr.msk.f32.gmra.mrb[22].mxu1 %vm238_vm8, %v820_v57  ;;  %v812_v58 = vmul.f32 %v807_v35, %v803_v40 }
 0x564   :  { %4517 = vmatprep.mubr.msk.f32.mxu1 %vm5372_vm0, %v5371_v0  ;;  %4977 = vmatpush3.bf16.msra.mxu0 %v4976_v11 }
 0x565   :  { %v821_v61 = vadd.f32 %v816_v34, %v812_v58  ;;  %4978 = vmatprep.subr.bf16.mxu0 %v5374_v33 }
 0x567   :  { %4518 = vmatmul.mubr.msk.f32.gmra.mrb[24].mxu1 %vm238_vm8, %v821_v61  ;;  %v4080_v61 = vld [vmem:[#allocation2 + $0x1e0] ss:$0 sm:$0xff] }
 0x568   :  { %4980 = vmatpush3.bf16.msra.mxu0 %v4979_v62 }
 0x569   :  { %4989 = vmatprep.subr.bf16.mxu0 %v5374_v33 }
 0x62a   :  { %v912_v14 = vpop.f32.mrb[16].mxu1 }
 0x62b   :  { %v913_v12 = vadd.f32 %v4074_v13, %v912_v14  ;;  %v4507_v15 = vpop.f32.mrb[17].mxu1 }
 0x62d   :  { %v941_v16 = vmul.f32 0.70710677, %v913_v12  ;;  %v936_v32 = vmul.f32 0.5, %v913_v12 }
 0x62e   :  { %v917_v18 = vpop.f32.mrb[18].mxu1 }
 0x62f   :  { %5128 = verf.f32 %v941_v16  ;;  %v918_v19 = vadd.f32 %v4074_v13, %v917_v18  ;;  %v4510_v21 = vpop.f32.mrb[19].mxu1 }
 0x631   :  { %v942_v22 = vmul.f32 0.70710677, %v918_v19  ;;  %v937_v45 = vmul.f32 0.5, %v918_v19 }
 0x632   :  { %v922_v24 = vpop.f32.mrb[20].mxu1 }
 0x633   :  { %5130 = verf.f32 %v942_v22  ;;  %v923_v25 = vadd.f32 %v4074_v13, %v922_v24  ;;  %v4513_v26 = vpop.f32.mrb[21].mxu1 }
 0x635   :  { %v943_v6 = vmul.f32 0.70710677, %v923_v25  ;;  %v938_v60 = vmul.f32 0.5, %v923_v25 }
 0x636   :  { %v927_v28 = vpop.f32.mrb[22].mxu1 }
 0x637   :  { %5132 = verf.f32 %v943_v6  ;;  %v928_v8 = vadd.f32 %v4074_v13, %v927_v28  ;;  %v4516_v29 = vpop.f32.mrb[23].mxu1 }
 0x639   :  { %v5129_v35 = vpop.eup %5128  ;;  %v944_v31 = vmul.f32 0.70710677, %v928_v8  ;;  %v939_v53 = vmul.f32 0.5, %v928_v8 }
 0x63a   :  { %v951_v34 = vadd.f32 1.0, %v5129_v35  ;;  %v932_v36 = vpop.f32.mrb[24].mxu1 }
 0x63b   :  { %5134 = verf.f32 %v944_v31  ;;  %v933_v42 = vadd.f32 %v4074_v13, %v932_v36  ;;  %v4519_v39 = vpop.f32.mrb[25].mxu1 }
 0x63c   :  { %v956_v41 = vmul.f32 %v951_v34, %v936_v32 }
 0x63d   :  { %v5131_v43 = vpop.eup %5130  ;;  %v945_v20 = vmul.f32 0.70710677, %v933_v42  ;;  %v940_v57 = vmul.f32 0.5, %v933_v42 }
 0x63e   :  { %v952_v47 = vadd.f32 1.0, %v5131_v43  ;;  %4537 = vmatmul.mubr.msk.f32.vlgmr.msra.gmra.mrb[20].mxu0 %vm974_vm11, %v956_v41 }
 0x63f   :  { %5136 = verf.f32 %v945_v20  ;;  %4539 = vmatprep.mubr.msk.f32.mxu0 %vm5372_vm0, %v5371_v0 }
 0x640   :  { %v957_v48 = vmul.f32 %v952_v47, %v937_v45 }
 0x641   :  { %v5133_v49 = vpop.eup %5132 }
 0x642   :  { %v953_v23 = vadd.f32 1.0, %v5133_v49  ;;  %4540 = vmatmul.mubr.msk.f32.gmra.mrb[22].mxu0 %vm974_vm11, %v957_v48 }
 0x643   :  { %4542 = vmatprep.mubr.msk.f32.mxu0 %vm5372_vm0, %v5371_v0 }
 0x644   :  { %v958_v50 = vmul.f32 %v953_v23, %v938_v60 }
 0x645   :  { %v5135_v51 = vpop.eup %5134 }
 0x646   :  { %v954_v54 = vadd.f32 1.0, %v5135_v51  ;;  %4543 = vmatmul.mubr.msk.f32.gmra.mrb[24].mxu0 %vm974_vm11, %v958_v50  ;;  %v1169_v51 = vld [vmem:[#allocation2 + $0x1f0] sm:$0xff] }
 0x647   :  { %4545 = vmatprep.mubr.msk.f32.mxu0 %vm5372_vm0, %v5371_v0  ;;  %4561 = vmatprep.mubr.msk.f32.mxu1 %vm356_vm10, %v1169_v51  ;;  %v1183_v51 = vld [vmem:[#allocation2 + $0x260] sm:$0xff] }
 0x648   :  { %v959_v4 = vmul.f32 %v954_v54, %v939_v53 }
 0x649   :  { %v5137_v56 = vpop.eup %5136 }
 0x64a   :  { %v955_v40 = vadd.f32 1.0, %v5137_v56  ;;  %4546 = vmatmul.mubr.msk.f32.gmra.mrb[26].mxu0 %vm974_vm11, %v959_v4 }
 0x64b   :  { %4548 = vmatprep.mubr.msk.f32.mxu0 %vm5372_vm0, %v5371_v0 }
 0x64c   :  { %v960_v58 = vmul.f32 %v955_v40, %v940_v57 }
 0x64e   :  { %4549 = vmatmul.mubr.msk.f32.gmra.mrb[28].mxu0 %vm974_vm11, %v960_v58 }
 0x64f   :  { %4617 = vmatprep.mubr.msk.f32.mxu0 %vm5372_vm0, %v5371_v0 }
 0x711   :  { %v1056_v63 = vpop.f32.mrb[20].mxu0 }
 0x712   :  { %v1057_v2 = vadd.f32 %v4080_v61, %v1056_v63  ;;  %v4538_v44 = vpop.f32.mrb[21].mxu0 }
 0x714   :  { %v5613_v3 = vadd.f32 %v1057_v2, %v5543_v17 }
 0x715   :  { %v1061_v7 = vpop.f32.mrb[22].mxu0 }
 0x716   :  { %v1062_v9 = vadd.f32 %v4080_v61, %v1061_v7  ;;  %v4541_v10 = vpop.f32.mrb[23].mxu0  ;;  %v1086_v1 = vsel %vm238_vm8, %v5613_v3, 0.0  ;;  %v1085_v7 = vld [vmem:[#allocation2 + $0x1e8] sm:$0x3] }
 0x717   :  { %1087 = vadd.xlane.f32.xlu1 %v1086_v1 }
 0x718   :  { %v5618_v11 = vadd.f32 %v1062_v9, %v5548_v27 }
 0x719   :  { %v1066_v5 = vpop.f32.mrb[24].mxu0 }
 0x71a   :  { %v1067_v59 = vadd.f32 %v4080_v61, %v1066_v5  ;;  %v4544_v62 = vpop.f32.mrb[25].mxu0  ;;  %v1089_v13 = vsel %vm238_vm8, %v5618_v11, 0.0 }
 0x71b   :  { %1090 = vadd.xlane.f32.xlu0 %v1089_v13 }
 0x71c   :  { %v5623_v17 = vadd.f32 %v1067_v59, %v5553_v30  ;;  %v1154_v59 = vrot.slane %v1085_v7, %v5473_v46 }
 0x71d   :  { %v1071_v14 = vpop.f32.mrb[26].mxu0 }
 0x71e   :  { %v1072_v12 = vadd.f32 %v4080_v61, %v1071_v14  ;;  %v4547_v15 = vpop.f32.mrb[27].mxu0  ;;  %v1092_v16 = vsel %vm238_vm8, %v5623_v17, 0.0 }
 0x71f   :  { %1093 = vadd.xlane.f32.xlu1 %v1092_v16  ;;  %v1163_v16 = vrot.slane %v1085_v7, %v5476_v55 }
 0x720   :  { %v5628_v27 = vadd.f32 %v1072_v12, %v5558_v38 }
 0x721   :  { %v1076_v18 = vpop.f32.mrb[28].mxu0 }
 0x722   :  { %v1077_v19 = vadd.f32 %v4080_v61, %v1076_v18  ;;  %v4550_v21 = vpop.f32.mrb[29].mxu0  ;;  %v1095_v22 = vsel %vm238_vm8, %v5628_v27, 0.0 }
 0x723   :  { %1096 = vadd.xlane.f32.xlu0 %v1095_v22 }
 0x724   :  { %v5633_v30 = vadd.f32 %v1077_v19, %v5563_v52 }
 0x726   :  { %v1098_v24 = vsel %vm251_vm9, %v5633_v30, 0.0 }
 0x727   :  { %1099 = vadd.xlane.f32.xlu1 %v1098_v24 }
 0x7a4   :  { %v1088_v25 = vpop.xlane.xlu1 %1087 }
 0x7a5   :  { %v1101_v26 = vmul.f32 0.03125, %v1088_v25 }
 0x7a7   :  { %v1106_v6 = vsub.f32 %v5613_v3, %v1101_v26 }
 0x7a8   :  { %v1091_v38 = vpop.xlane.xlu0 %1090 }
 0x7a9   :  { %v1102_v28 = vmul.f32 0.03125, %v1091_v38  ;;  %v1111_v8 = vmul.f32 %v1106_v6, %v1106_v6 }
 0x7ab   :  { %v1107_v29 = vsub.f32 %v5618_v11, %v1102_v28  ;;  %v1116_v35 = vsel %vm238_vm8, %v1111_v8, 0.0 }
 0x7ac   :  { %v1094_v31 = vpop.xlane.xlu1 %1093  ;;  %1117 = vadd.xlane.f32.xlu0 %v1116_v35 }
 0x7ad   :  { %v1103_v32 = vmul.f32 0.03125, %v1094_v31  ;;  %v1112_v52 = vmul.f32 %v1107_v29, %v1107_v29 }
 0x7af   :  { %v1108_v34 = vsub.f32 %v5623_v17, %v1103_v32  ;;  %v1119_v36 = vsel %vm238_vm8, %v1112_v52, 0.0 }
 0x7b0   :  { %v1097_v42 = vpop.xlane.xlu0 %1096  ;;  %1120 = vadd.xlane.f32.xlu1 %v1119_v36 }
 0x7b1   :  { %v1104_v39 = vmul.f32 0.03125, %v1097_v42  ;;  %v1113_v41 = vmul.f32 %v1108_v34, %v1108_v34  ;;  %v1170_v42 = vld [vmem:[#allocation2 + $0x1f8] sm:$0xff] }
 0x7b3   :  { %v1109_v43 = vsub.f32 %v5628_v27, %v1104_v39  ;;  %v1122_v20 = vsel %vm238_vm8, %v1113_v41, 0.0  ;;  %v1172_v39 = vld [vmem:[#allocation2 + $0x208] sm:$0xff]  ;;  %v1173_v41 = vld [vmem:[#allocation2 + $0x210] sm:$0xff] }
 0x7b4   :  { %1123 = vadd.xlane.f32.xlu0 %v1122_v20  ;;  %v1100_v45 = vpop.xlane.xlu1 %1099  ;;  %v1175_v20 = vld [vmem:[#allocation2 + $0x220] sm:$0xff] }
 0x7b5   :  { %v1105_v47 = vmul.f32 0.03125, %v1100_v45  ;;  %v1114_v48 = vmul.f32 %v1109_v43, %v1109_v43  ;;  %v1176_v45 = vld [vmem:[#allocation2 + $0x228] sm:$0xff] }
 0x7b7   :  { %v1110_v49 = vsub.f32 %v5633_v30, %v1105_v47  ;;  %v1125_v60 = vsel %vm238_vm8, %v1114_v48, 0.0  ;;  %v1177_v47 = vld [vmem:[#allocation2 + $0x230] sm:$0xff]  ;;  %v1178_v48 = vld [vmem:[#allocation2 + $0x238] sm:$0xff] }
 0x7b8   :  { %1126 = vadd.xlane.f32.xlu1 %v1125_v60  ;;  %v1180_v60 = vld [vmem:[#allocation2 + $0x248] sm:$0xff] }
 0x7b9   :  { %v1115_v23 = vmul.f32 %v1110_v49, %v1110_v49 }
 0x7bb   :  { %v1128_v50 = vsel %vm251_vm9, %v1115_v23, 0.0  ;;  %v1181_v23 = vld [vmem:[#allocation2 + $0x250] sm:$0xff] }
 0x7bc   :  { %1129 = vadd.xlane.f32.xlu0 %v1128_v50  ;;  %v1182_v50 = vld [vmem:[#allocation2 + $0x258] sm:$0xff] }
 0x839   :  { %v1118_v53 = vpop.xlane.xlu0 %1117 }
 0x83a   :  { %v1131_v54 = vmul.f32 0.03125, %v1118_v53  ;;  %v1184_v53 = vld [vmem:[#allocation2 + $0x268] sm:$0xff] }
 0x83c   :  { %v1136_v4 = vadd.f32 1e-05, %v1131_v54  ;;  %v1186_v54 = vld [vmem:[#allocation2 + $0x278] sm:$0xff] }
 0x83d   :  { %v1121_v56 = vpop.xlane.xlu1 %1120 }
 0x83e   :  { %5138 = vrsqrt.f32 %v1136_v4  ;;  %v1132_v57 = vmul.f32 0.03125, %v1121_v56  ;;  %v1185_v4 = vld [vmem:[#allocation2 + $0x270] sm:$0xff] }
 0x840   :  { %v1137_v40 = vadd.f32 1e-05, %v1132_v57 }
 0x841   :  { %v1124_v58 = vpop.xlane.xlu0 %1123 }
 0x842   :  { %5140 = vrsqrt.f32 %v1137_v40  ;;  %v1133_v61 = vmul.f32 0.03125, %v1124_v58 }
 0x844   :  { %v1138_v63 = vadd.f32 1e-05, %v1133_v61  ;;  %v1188_v61 = vld [vmem:[#allocation2 + $0x288] sm:$0xff] }
 0x845   :  { %v1127_v2 = vpop.xlane.xlu1 %1126 }
 0x846   :  { %5142 = vrsqrt.f32 %v1138_v63  ;;  %v1134_v44 = vmul.f32 0.03125, %v1127_v2  ;;  %v1187_v2 = vld [vmem:[#allocation2 + $0x280] sm:$0xff] }
 0x848   :  { %v5139_v9 = vpop.eup %5138  ;;  %v1139_v10 = vadd.f32 1e-05, %v1134_v44 }
 0x849   :  { %v1130_v1 = vpop.xlane.xlu0 %1129  ;;  %v1146_v5 = vmul.f32 %v5139_v9, %v1106_v6 }
 0x84a   :  { %5144 = vrsqrt.f32 %v1139_v10  ;;  %v1135_v62 = vmul.f32 0.03125, %v1130_v1 }
 0x84b   :  { %v1155_v15 = vmul.f32 %v1154_v59, %v1146_v5  ;;  %v1190_v5 = vld [vmem:[#allocation2 + $0x298] sm:$0xff] }
 0x84c   :  { %v5141_v13 = vpop.eup %5140  ;;  %v1140_v14 = vadd.f32 1e-05, %v1135_v62  ;;  %v1189_v62 = vld [vmem:[#allocation2 + $0x290] sm:$0xff] }
 0x84d   :  { %v1147_v12 = vmul.f32 %v5141_v13, %v1107_v29  ;;  %v1164_v21 = vadd.f32 %v1163_v16, %v1155_v15 }
 0x84e   :  { %5146 = vrsqrt.f32 %v1140_v14 }
 0x84f   :  { %v1156_v18 = vmul.f32 %v1154_v59, %v1147_v12 }
 0x850   :  { %v5143_v19 = vpop.eup %5142 }
 0x851   :  { %v1165_v22 = vadd.f32 %v1163_v16, %v1156_v18  ;;  %v1148_v24 = vmul.f32 %v5143_v19, %v1108_v34  ;;  %v1171_v34 = vld [vmem:[#allocation2 + $0x200] sm:$0xff]  ;;  %v1192_v18 = vld [vmem:[#allocation2 + $0x2a8] sm:$0xff] }
 0x853   :  { %v4981_v25 = vpack.c.bf16 %v1165_v22, %v1164_v21  ;;  %v1157_v38 = vmul.f32 %v1154_v59, %v1148_v24  ;;  %v1191_v21 = vld [vmem:[#allocation2 + $0x2a0] sm:$0xff] }
 0x854   :  { %v5145_v26 = vpop.eup %5144 }
 0x855   :  { %4982 = vmatprep.subr.bf16.mxu1 %v4981_v25  ;;  %v1149_v6 = vmul.f32 %v5145_v26, %v1109_v43  ;;  %v1166_v35 = vadd.f32 %v1163_v16, %v1157_v38  ;;  %v1174_v43 = vld [vmem:[#allocation2 + $0x218] sm:$0xff] }
 0x856   :  { %4984 = vmatpush3.bf16.msra.mxu1 %v4981_v25  ;;  %v1194_v38 = vld [vmem:[#allocation2 + $0x2b8] sm:$0xff] }
 0x857   :  { %v1158_v28 = vmul.f32 %v1154_v59, %v1149_v6 }
 0x858   :  { %v5147_v8 = vpop.eup %5146 }
 0x859   :  { %v1167_v31 = vadd.f32 %v1163_v16, %v1158_v28  ;;  %v1150_v29 = vmul.f32 %v5147_v8, %v1110_v49  ;;  %v1179_v49 = vld [vmem:[#allocation2 + $0x240] sm:$0xff] }
 0x85b   :  { %v4985_v32 = vpack.c.bf16 %v1167_v31, %v1166_v35  ;;  %v1159_v52 = vmul.f32 %v1154_v59, %v1150_v29  ;;  %v1193_v35 = vld [vmem:[#allocation2 + $0x2b0] sm:$0xff] }
 0x85d   :  { %4986 = vmatprep.subr.bf16.mxu1 %v4985_v32  ;;  %v1168_v36 = vadd.f32 %v1163_v16, %v1159_v52 }
 0x85e   :  { %4988 = vmatpush3.bf16.msra.mxu1 %v4985_v32 }
 0x85f   :  { %4559 = vmatprep.subr.msk.mxu1 %vm68_vm1, %v1168_v36 }
 0x862   :  { %4560 = vmatpush3.msk.msra.mxu1 %vm68_vm1, %v1168_v36 }
 0x863   :  { %4562 = vmatmul.mubr.msk.f32.vlgmr.msra.gmra.mrb[26].mxu1 %vm356_vm10, %v1170_v42  ;;  %5013 = vmatprep.subr.bf16.mxu1 %v5374_v33 }
 0x864   :  { %4564 = vmatprep.mubr.msk.f32.mxu1 %vm356_vm10, %v1171_v34 }
 0x867   :  { %4565 = vmatmul.mubr.msk.f32.gmra.mrb[28].mxu1 %vm356_vm10, %v1172_v39 }
 0x868   :  { %4567 = vmatprep.mubr.msk.f32.mxu1 %vm356_vm10, %v1173_v41 }
 0x86b   :  { %4568 = vmatmul.mubr.msk.f32.gmra.mrb[30].mxu1 %vm356_vm10, %v1174_v43 }
 0x86c   :  { %4570 = vmatprep.mubr.msk.f32.mxu1 %vm356_vm10, %v1175_v20 }
 0x86f   :  { %4571 = vmatmul.mubr.msk.f32.gmra.mrb[32].mxu1 %vm356_vm10, %v1176_v45  ;;  %v1196_v45 = vld [vmem:[#allocation2 + $0x2c8] sm:$0xff] }
 0x870   :  { %4573 = vmatprep.mubr.msk.f32.mxu1 %vm356_vm10, %v1177_v47 }
 0x873   :  { %4574 = vmatmul.mubr.msk.f32.gmra.mrb[34].mxu1 %vm356_vm10, %v1178_v48 }
 0x874   :  { %4576 = vmatprep.mubr.msk.f32.mxu1 %vm356_vm10, %v1179_v49 }
 0x877   :  { %4577 = vmatmul.mubr.msk.f32.gmra.mrb[36].mxu1 %vm356_vm10, %v1180_v60  ;;  %v1195_v60 = vld [vmem:[#allocation2 + $0x2c0] sm:$0xff] }
 0x878   :  { %4579 = vmatprep.mubr.msk.f32.mxu1 %vm356_vm10, %v1181_v23 }
 0x87b   :  { %4580 = vmatmul.mubr.msk.f32.gmra.mrb[38].mxu1 %vm356_vm10, %v1182_v50 }
 0x87c   :  { %4582 = vmatprep.mubr.msk.f32.mxu1 %vm356_vm10, %v1183_v51 }
 0x87f   :  { %4583 = vmatmul.mubr.msk.f32.gmra.mrb[40].mxu1 %vm356_vm10, %v1184_v53 }
 0x880   :  { %4640 = vmatprep.mubr.msk.f32.mxu1 %vm5372_vm0, %v5371_v0 }
 0x936   :  { %v4563_v56 = vpop.f32.mrb[26].mxu1 }
 0x937   :  { %v1324_v57 = vadd.f32 %v4563_v56, %v1186_v54  ;;  %v1318_v40 = vpop.f32.mrb[27].mxu1 }
 0x938   :  { %v1319_v58 = vadd.f32 %v1318_v40, %v1185_v4 }
 0x939   :  { %v1414_v63 = vmul.f32 0.70710677, %v1324_v57  ;;  %v1398_v29 = vmul.f32 0.5, %v1324_v57 }
 0x93a   :  { %v1413_v44 = vmul.f32 0.70710677, %v1319_v58  ;;  %v4566_v7 = vpop.f32.mrb[28].mxu1  ;;  %v1397_v42 = vmul.f32 0.5, %v1319_v58 }
 0x93b   :  { %5148 = verf.f32 %v1414_v63  ;;  %v1334_v9 = vadd.f32 %v4566_v7, %v1188_v61  ;;  %v1328_v10 = vpop.f32.mrb[29].mxu1 }
 0x93c   :  { %5150 = verf.f32 %v1413_v44  ;;  %v1329_v1 = vadd.f32 %v1328_v10, %v1187_v2  ;;  %v1198_v2 = vld [vmem:[#allocation2 + $0x2d8] sm:$0xff]  ;;  %v1197_v10 = vld [vmem:[#allocation2 + $0x2d0] sm:$0xff] }
 0x93d   :  { %v1416_v59 = vmul.f32 0.70710677, %v1334_v9  ;;  %v1400_v50 = vmul.f32 0.5, %v1334_v9 }
 0x93e   :  { %v1415_v13 = vmul.f32 0.70710677, %v1329_v1  ;;  %v4569_v14 = vpop.f32.mrb[30].mxu1  ;;  %v1399_v53 = vmul.f32 0.5, %v1329_v1 }
 0x93f   :  { %5152 = verf.f32 %v1416_v59  ;;  %v1344_v12 = vadd.f32 %v4569_v14, %v1190_v5  ;;  %v1338_v15 = vpop.f32.mrb[31].mxu1 }
 0x940   :  { %5154 = verf.f32 %v1415_v13  ;;  %v1339_v16 = vadd.f32 %v1338_v15, %v1189_v62 }
 0x941   :  { %v1418_v19 = vmul.f32 0.70710677, %v1344_v12  ;;  %v1402_v5 = vmul.f32 0.5, %v1344_v12  ;;  %v1199_v12 = vld [vmem:[#allocation2 + $0x2e0] sm:$0xff] }
 0x942   :  { %v1417_v22 = vmul.f32 0.70710677, %v1339_v16  ;;  %v4572_v24 = vpop.f32.mrb[32].mxu1  ;;  %v1401_v62 = vmul.f32 0.5, %v1339_v16 }
 0x943   :  { %5156 = verf.f32 %v1418_v19  ;;  %v5670_v25 = vadd.f32 %v4572_v24, %v1192_v18  ;;  %v1348_v26 = vpop.f32.mrb[33].mxu1 }
 0x944   :  { %5158 = verf.f32 %v1417_v22  ;;  %v5672_v6 = vadd.f32 %v1348_v26, %v1191_v21  ;;  %v1200_v26 = vld [vmem:[#allocation2 + $0x2e8] sm:$0xff] }
 0x945   :  { %v5149_v28 = vpop.eup %5148  ;;  %v1420_v8 = vmul.f32 0.70710677, %v5670_v25 }
 0x946   :  { %v5151_v31 = vpop.eup %5150  ;;  %v1446_v32 = vadd.f32 1.0, %v5149_v28  ;;  %v1419_v52 = vmul.f32 0.70710677, %v5672_v6  ;;  %v4575_v36 = vpop.f32.mrb[34].mxu1 }
 0x947   :  { %v1445_v34 = vadd.f32 1.0, %v5151_v31  ;;  %5160 = verf.f32 %v1420_v8  ;;  %v5676_v39 = vadd.f32 %v4575_v36, %v1194_v38  ;;  %v1358_v41 = vpop.f32.mrb[35].mxu1 }
 0x948   :  { %v1462_v43 = vmul.f32 %v1446_v32, %v1398_v29  ;;  %5162 = verf.f32 %v1419_v52  ;;  %v5678_v20 = vadd.f32 %v1358_v41, %v1193_v35  ;;  %v1404_v35 = vmul.f32 0.5, %v5670_v25 }
 0x949   :  { %v5153_v47 = vpop.eup %5152  ;;  %v1461_v48 = vmul.f32 %v1445_v34, %v1397_v42  ;;  %v1422_v49 = vmul.f32 0.70710677, %v5676_v39  ;;  %v1403_v29 = vmul.f32 0.5, %v5672_v6 }
 0x94a   :  { %v5155_v23 = vpop.eup %5154  ;;  %v1448_v51 = vadd.f32 1.0, %v5153_v47  ;;  %v1421_v54 = vmul.f32 0.70710677, %v5678_v20  ;;  %v4578_v4 = vpop.f32.mrb[36].mxu1 }
 0x94b   :  { %v4990_v56 = vpack.c.bf16 %v1462_v43, %v1461_v48  ;;  %v1447_v57 = vadd.f32 1.0, %v5155_v23  ;;  %5164 = verf.f32 %v1422_v49  ;;  %v5682_v40 = vadd.f32 %v4578_v4, %v1196_v45  ;;  %v1368_v58 = vpop.f32.mrb[37].mxu1 }
 0x94c   :  { %v1464_v61 = vmul.f32 %v1448_v51, %v1400_v50  ;;  %5166 = verf.f32 %v1421_v54  ;;  %v5684_v63 = vadd.f32 %v1368_v58, %v1195_v60  ;;  %v1406_v60 = vmul.f32 0.5, %v5676_v39 }
 0x94d   :  { %v5157_v44 = vpop.eup %5156  ;;  %v1463_v7 = vmul.f32 %v1447_v57, %v1399_v53  ;;  %v1424_v9 = vmul.f32 0.70710677, %v5682_v40  ;;  %4991 = vmatpush3.bf16.msra.mxu0 %v4990_v56  ;;  %v1405_v51 = vmul.f32 0.5, %v5678_v20  ;;  %v1408_v58 = vmul.f32 0.5, %v5682_v40 }
 0x94e   :  { %v5159_v1 = vpop.eup %5158  ;;  %v1450_v59 = vadd.f32 1.0, %v5157_v44  ;;  %v1423_v13 = vmul.f32 0.70710677, %v5684_v63  ;;  %v4581_v14 = vpop.f32.mrb[38].mxu1  ;;  %4992 = vmatprep.subr.bf16.mxu0 %v5374_v33 }
 0x94f   :  { %v4993_v15 = vpack.c.bf16 %v1464_v61, %v1463_v7  ;;  %v1449_v18 = vadd.f32 1.0, %v5159_v1  ;;  %5168 = verf.f32 %v1424_v9  ;;  %v1384_v19 = vadd.f32 %v4581_v14, %v1198_v2  ;;  %v1378_v21 = vpop.f32.mrb[39].mxu1 }
 0x950   :  { %v1466_v22 = vmul.f32 %v1450_v59, %v1402_v5  ;;  %5170 = verf.f32 %v1423_v13  ;;  %v1379_v24 = vadd.f32 %v1378_v21, %v1197_v10  ;;  %v1407_v2 = vmul.f32 0.5, %v5684_v63 }
 0x951   :  { %v5161_v38 = vpop.eup %5160  ;;  %v1465_v28 = vmul.f32 %v1449_v18, %v1401_v62  ;;  %v1426_v8 = vmul.f32 0.70710677, %v1384_v19  ;;  %4994 = vmatpush3.bf16.msra.mxu0 %v4993_v15  ;;  %v1410_v1 = vmul.f32 0.5, %v1384_v19 }
 0x952   :  { %v5163_v16 = vpop.eup %5162  ;;  %v1452_v31 = vadd.f32 1.0, %v5161_v38  ;;  %v1425_v32 = vmul.f32 0.70710677, %v1379_v24  ;;  %v4584_v52 = vpop.f32.mrb[40].mxu1  ;;  %4995 = vmatprep.subr.bf16.mxu0 %v5374_v33  ;;  %v1409_v62 = vmul.f32 0.5, %v1379_v24  ;;  %v1477_v24 = vld [vmem:[#allocation2 + $0x2f0] sm:$0xff] }
 0x953   :  { %v4996_v36 = vpack.c.bf16 %v1466_v22, %v1465_v28  ;;  %v1451_v42 = vadd.f32 1.0, %v5163_v16  ;;  %5172 = verf.f32 %v1426_v8  ;;  %v1394_v34 = vadd.f32 %v4584_v52, %v1200_v26  ;;  %v1388_v41 = vpop.f32.mrb[41].mxu1  ;;  %v1479_v16 = vld [vmem:[#allocation2 + $0x300] sm:$0xff] }
 0x954   :  { %v1468_v43 = vmul.f32 %v1452_v31, %v1404_v35  ;;  %5174 = verf.f32 %v1425_v32  ;;  %v1389_v45 = vadd.f32 %v1388_v41, %v1199_v12  ;;  %v1478_v12 = vld [vmem:[#allocation2 + $0x2f8] sm:$0xff]  ;;  %v1480_v35 = vld [vmem:[#allocation2 + $0x308] sm:$0xff]  ;;  %v1481_v31 = vld [vmem:[#allocation2 + $0x310] sm:$0x3] }
 0x955   :  { %v5165_v47 = vpop.eup %5164  ;;  %v1467_v48 = vmul.f32 %v1451_v42, %v1403_v29  ;;  %v1428_v49 = vmul.f32 0.70710677, %v1394_v34  ;;  %4997 = vmatpush3.bf16.msra.mxu0 %v4996_v36  ;;  %v1412_v21 = vmul.f32 0.5, %v1394_v34  ;;  %v1482_v29 = vld [vmem:[#allocation2 + $0x318] sm:$0xff]  ;;  %v1483_v42 = vld [vmem:[#allocation2 + $0x320] sm:$0xff] }
 0x956   :  { %v5167_v25 = vpop.eup %5166  ;;  %v1454_v6 = vadd.f32 1.0, %v5165_v47  ;;  %v1427_v23 = vmul.f32 0.70710677, %v1389_v45  ;;  %4998 = vmatprep.subr.bf16.mxu0 %v5374_v33  ;;  %v1411_v26 = vmul.f32 0.5, %v1389_v45 }
 0x957   :  { %v4999_v50 = vpack.c.bf16 %v1468_v43, %v1467_v48  ;;  %v1453_v53 = vadd.f32 1.0, %v5167_v25  ;;  %5176 = verf.f32 %v1428_v49  ;;  %v1484_v48 = vld [vmem:[#allocation2 + $0x328] sm:$0xff] }
 0x958   :  { %v1470_v54 = vmul.f32 %v1454_v6, %v1406_v60  ;;  %5178 = verf.f32 %v1427_v23 }
 0x959   :  { %v5169_v4 = vpop.eup %5168  ;;  %v1469_v56 = vmul.f32 %v1453_v53, %v1405_v51  ;;  %5000 = vmatpush3.bf16.msra.mxu0 %v4999_v50 }
 0x95a   :  { %v5171_v57 = vpop.eup %5170  ;;  %v1456_v61 = vadd.f32 1.0, %v5169_v4  ;;  %5001 = vmatprep.subr.bf16.mxu0 %v5374_v33 }
 0x95b   :  { %v5002_v39 = vpack.c.bf16 %v1470_v54, %v1469_v56  ;;  %v1455_v44 = vadd.f32 1.0, %v5171_v57 }
 0x95c   :  { %v1472_v7 = vmul.f32 %v1456_v61, %v1408_v58 }
 0x95d   :  { %v5173_v9 = vpop.eup %5172  ;;  %v1471_v20 = vmul.f32 %v1455_v44, %v1407_v2  ;;  %5003 = vmatpush3.bf16.msra.mxu0 %v5002_v39  ;;  %v1666_v44 = vld [vmem:[#allocation2 + $0x348] sm:$0xff] }
 0x95e   :  { %v5175_v10 = vpop.eup %5174  ;;  %v1458_v5 = vadd.f32 1.0, %v5173_v9  ;;  %5004 = vmatprep.subr.bf16.mxu0 %v5374_v33 }
 0x95f   :  { %v5005_v59 = vpack.c.bf16 %v1472_v7, %v1471_v20  ;;  %v1457_v13 = vadd.f32 1.0, %v5175_v10  ;;  %v1667_v7 = vld [vmem:[#allocation2 + $0x350] sm:$0xff] }
 0x960   :  { %v1474_v40 = vmul.f32 %v1458_v5, %v1410_v1  ;;  %v5014_v9 = vpack.c.bf16 %v1667_v7, %v1666_v44 }
 0x961   :  { %v5177_v14 = vpop.eup %5176  ;;  %v1473_v15 = vmul.f32 %v1457_v13, %v1409_v62  ;;  %5006 = vmatpush3.bf16.msra.mxu0 %v5005_v59 }
 0x962   :  { %v5179_v18 = vpop.eup %5178  ;;  %v1460_v63 = vadd.f32 1.0, %v5177_v14  ;;  %5007 = vmatprep.subr.bf16.mxu0 %v5374_v33  ;;  %5015 = vmatpush3.bf16.msra.mxu1 %v5014_v9 }
 0x963   :  { %v5008_v22 = vpack.c.bf16 %v1474_v40, %v1473_v15  ;;  %v1459_v38 = vadd.f32 1.0, %v5179_v18  ;;  %5016 = vmatprep.subr.bf16.mxu1 %v5374_v33 }
 0x964   :  { %v1476_v28 = vmul.f32 %v1460_v63, %v1412_v21 }
 0x965   :  { %v1475_v19 = vmul.f32 %v1459_v38, %v1411_v26  ;;  %5009 = vmatpush3.bf16.msra.mxu0 %v5008_v22 }
 0x966   :  { %5010 = vmatprep.subr.bf16.mxu0 %v5374_v33 }
 0x967   :  { %v5011_v8 = vpack.c.bf16 %v1476_v28, %v1475_v19 }
 0x969   :  { %5012 = vmatpush3.bf16.msra.mxu0 %v5011_v8 }
 0x96a   :  { %5019 = vmatprep.subr.bf16.mxu0 %v5374_v33 }
 0x96c   :  { %4618 = vmatmul.mubr.f32.vlgmr.msra.gmra.mrb[30].mxu0 %v1477_v24 }
 0x96d   :  { %4620 = vmatprep.mubr.msk.f32.mxu0 %vm5372_vm0, %v5371_v0 }
 0x970   :  { %4621 = vmatmul.mubr.f32.gmra.mrb[32].mxu0 %v1478_v12 }
 0x971   :  { %4623 = vmatprep.mubr.msk.f32.mxu0 %vm5372_vm0, %v5371_v0 }
 0x974   :  { %4624 = vmatmul.mubr.f32.gmra.mrb[34].mxu0 %v1479_v16 }
 0x975   :  { %4626 = vmatprep.mubr.msk.f32.mxu0 %vm5372_vm0, %v5371_v0 }
 0x978   :  { %4627 = vmatmul.mubr.f32.gmra.mrb[36].mxu0 %v1480_v35 }
 0x979   :  { %4629 = vmatprep.mubr.msk.f32.mxu0 %vm5372_vm0, %v5371_v0 }
 0x97c   :  { %4630 = vmatmul.mubr.f32.gmra.mrb[38].mxu0 %v1481_v31  ;;  %v1668_v31 = vld [vmem:[#allocation2 + $0x358] sm:$0xff] }
 0x97d   :  { %4671 = vmatprep.mubr.msk.f32.mxu0 %vm5372_vm0, %v5371_v0 }
 0xa3f   :  { %v1553_v32 = vpop.f32.mrb[30].mxu0 }
 0xa40   :  { %v1554_v52 = vadd.f32 %v1553_v32, %v1482_v29  ;;  %v4619_v36 = vpop.f32.mrb[31].mxu0  ;;  %v1669_v29 = vld [vmem:[#allocation2 + $0x360] sm:$0xff] }
 0xa41   :  { %v5017_v32 = vpack.c.bf16 %v1669_v29, %v1668_v31 }
 0xa42   :  { %v5713_v34 = vadd.f32 %v1554_v52, %v5613_v3  ;;  %v1485_v3 = vld [vmem:[#allocation2 + $0x330] sm:$0xff] }
 0xa43   :  { %v1558_v41 = vpop.f32.mrb[32].mxu0  ;;  %5018 = vmatpush3.bf16.msra.mxu1 %v5017_v32 }
 0xa44   :  { %v1559_v43 = vadd.f32 %v1558_v41, %v1483_v42  ;;  %v4622_v45 = vpop.f32.mrb[33].mxu0  ;;  %v1583_v47 = vsel %vm238_vm8, %v5713_v34, 0.0 }
 0xa45   :  { %1584 = vadd.xlane.f32.xlu1 %v1583_v47 }
 0xa46   :  { %v5718_v49 = vadd.f32 %v1559_v43, %v5618_v11  ;;  %v1486_v11 = vld [vmem:[#allocation2 + $0x338] sm:$0x3] }
 0xa47   :  { %v1563_v25 = vpop.f32.mrb[34].mxu0 }
 0xa48   :  { %v1564_v60 = vadd.f32 %v1563_v25, %v1484_v48  ;;  %v4625_v6 = vpop.f32.mrb[35].mxu0  ;;  %v1586_v23 = vsel %vm238_vm8, %v5718_v49, 0.0  ;;  %v1577_v25 = vld [vmem:[#allocation2 + $0x340] sm:$0x3] }
 0xa49   :  { %1587 = vadd.xlane.f32.xlu0 %v1586_v23 }
 0xa4a   :  { %v5723_v50 = vadd.f32 %v1564_v60, %v5623_v17 }
 0xa4b   :  { %v1568_v51 = vpop.f32.mrb[36].mxu0 }
 0xa4c   :  { %v1569_v53 = vadd.f32 %v1568_v51, %v1485_v3  ;;  %v4628_v54 = vpop.f32.mrb[37].mxu0  ;;  %v1589_v4 = vsel %vm238_vm8, %v5723_v50, 0.0  ;;  %v1651_v3 = vrot.slane %v1577_v25, %v5473_v46 }
 0xa4d   :  { %1590 = vadd.xlane.f32.xlu1 %v1589_v4  ;;  %v1660_v54 = vrot.slane %v1577_v25, %v5476_v55 }
 0xa4e   :  { %v5728_v56 = vadd.f32 %v1569_v53, %v5628_v27 }
 0xa4f   :  { %v1573_v57 = vpop.f32.mrb[38].mxu0 }
 0xa50   :  { %v1574_v58 = vadd.f32 %v1573_v57, %v1486_v11  ;;  %v1592_v61 = vsel %vm238_vm8, %v5728_v56, 0.0  ;;  %v4631_v39 = vpop.f32.mrb[39].mxu0 }
 0xa51   :  { %1593 = vadd.xlane.f32.xlu0 %v1592_v61 }
 0xa52   :  { %v5733_v17 = vadd.f32 %v1574_v58, %v5633_v30 }
 0xa54   :  { %v1595_v2 = vsel %vm251_vm9, %v5733_v17, 0.0 }
 0xa55   :  { %1596 = vadd.xlane.f32.xlu1 %v1595_v2 }
 0xad2   :  { %v1585_v27 = vpop.xlane.xlu1 %1584 }
 0xad3   :  { %v1598_v20 = vmul.f32 0.03125, %v1585_v27 }
 0xad5   :  { %v1603_v10 = vsub.f32 %v5713_v34, %v1598_v20 }
 0xad6   :  { %v1588_v1 = vpop.xlane.xlu0 %1587 }
 0xad7   :  { %v1599_v5 = vmul.f32 0.03125, %v1588_v1  ;;  %v1608_v59 = vmul.f32 %v1603_v10, %v1603_v10 }
 0xad9   :  { %v1604_v30 = vsub.f32 %v5718_v49, %v1599_v5  ;;  %v1613_v62 = vsel %vm238_vm8, %v1608_v59, 0.0 }
 0xada   :  { %v1591_v13 = vpop.xlane.xlu1 %1590  ;;  %1614 = vadd.xlane.f32.xlu0 %v1613_v62 }
 0xadb   :  { %v1600_v40 = vmul.f32 0.03125, %v1591_v13  ;;  %v1609_v14 = vmul.f32 %v1604_v30, %v1604_v30 }
 0xadd   :  { %v1605_v15 = vsub.f32 %v5723_v50, %v1600_v40  ;;  %v1616_v18 = vsel %vm238_vm8, %v1609_v14, 0.0 }
 0xade   :  { %v1594_v21 = vpop.xlane.xlu0 %1593  ;;  %1617 = vadd.xlane.f32.xlu1 %v1616_v18  ;;  %v1805_v18 = vld [vmem:[#allocation2 + $0x370] sm:$0xff] }
 0xadf   :  { %v1601_v63 = vmul.f32 0.03125, %v1594_v21  ;;  %v1610_v22 = vmul.f32 %v1605_v15, %v1605_v15  ;;  %v1806_v21 = vld [vmem:[#allocation2 + $0x378] sm:$0xff] }
 0xae1   :  { %v1606_v26 = vsub.f32 %v5728_v56, %v1601_v63  ;;  %v1619_v38 = vsel %vm238_vm8, %v1610_v22, 0.0  ;;  %v5020_v63 = vpack.c.bf16 %v1806_v21, %v1805_v18  ;;  %v1807_v22 = vld [vmem:[#allocation2 + $0x380] sm:$0xff] }
 0xae2   :  { %1620 = vadd.xlane.f32.xlu0 %v1619_v38  ;;  %v1597_v28 = vpop.xlane.xlu1 %1596 }
 0xae3   :  { %v1602_v19 = vmul.f32 0.03125, %v1597_v28  ;;  %v1611_v8 = vmul.f32 %v1606_v26, %v1606_v26  ;;  %5021 = vmatpush3.bf16.msra.mxu0 %v5020_v63  ;;  %v1809_v28 = vld [vmem:[#allocation2 + $0x390] sm:$0xff] }
 0xae4   :  { %5022 = vmatprep.subr.bf16.mxu0 %v5374_v33 }
 0xae5   :  { %v1607_v24 = vsub.f32 %v5733_v17, %v1602_v19  ;;  %v1622_v12 = vsel %vm238_vm8, %v1611_v8, 0.0  ;;  %v1810_v19 = vld [vmem:[#allocation2 + $0x398] sm:$0xff] }
 0xae6   :  { %1623 = vadd.xlane.f32.xlu1 %v1622_v12  ;;  %v5026_v8 = vpack.c.bf16 %v1810_v19, %v1809_v28  ;;  %v1812_v12 = vld [vmem:[#allocation2 + $0x3a8] sm:$0xff] }
 0xae7   :  { %v1612_v16 = vmul.f32 %v1607_v24, %v1607_v24 }
 0xae9   :  { %v1625_v35 = vsel %vm251_vm9, %v1612_v16, 0.0 }
 0xaea   :  { %1626 = vadd.xlane.f32.xlu0 %v1625_v35  ;;  %v4103_v35 = vld [vmem:[#allocation2 + $0x368] ss:$0 sm:$0xff] }
 0xb67   :  { %v1615_v52 = vpop.xlane.xlu0 %1614 }
 0xb68   :  { %v1628_v36 = vmul.f32 0.03125, %v1615_v52 }
 0xb6a   :  { %v1633_v42 = vadd.f32 1e-05, %v1628_v36 }
 0xb6b   :  { %v1618_v41 = vpop.xlane.xlu1 %1617 }
 0xb6c   :  { %5180 = vrsqrt.f32 %v1633_v42  ;;  %v1629_v43 = vmul.f32 0.03125, %v1618_v41 }
 0xb6e   :  { %v1634_v45 = vadd.f32 1e-05, %v1629_v43 }
 0xb6f   :  { %v1621_v47 = vpop.xlane.xlu0 %1620 }
 0xb70   :  { %5182 = vrsqrt.f32 %v1634_v45  ;;  %v1630_v48 = vmul.f32 0.03125, %v1621_v47 }
 0xb72   :  { %v1635_v60 = vadd.f32 1e-05, %v1630_v48 }
 0xb73   :  { %v1624_v6 = vpop.xlane.xlu1 %1623 }
 0xb74   :  { %5184 = vrsqrt.f32 %v1635_v60  ;;  %v1631_v23 = vmul.f32 0.03125, %v1624_v6 }
 0xb76   :  { %v5181_v51 = vpop.eup %5180  ;;  %v1636_v53 = vadd.f32 1e-05, %v1631_v23 }
 0xb77   :  { %v1643_v4 = vmul.f32 %v5181_v51, %v1603_v10  ;;  %v1627_v11 = vpop.xlane.xlu0 %1626 }
 0xb78   :  { %5186 = vrsqrt.f32 %v1636_v53  ;;  %v1632_v57 = vmul.f32 0.03125, %v1627_v11 }
 0xb79   :  { %v1652_v58 = vmul.f32 %v1651_v3, %v1643_v4 }
 0xb7a   :  { %v5183_v61 = vpop.eup %5182  ;;  %v1637_v39 = vadd.f32 1e-05, %v1632_v57 }
 0xb7b   :  { %v1661_v2 = vadd.f32 %v1660_v54, %v1652_v58  ;;  %v1644_v44 = vmul.f32 %v5183_v61, %v1604_v30 }
 0xb7c   :  { %5188 = vrsqrt.f32 %v1637_v39 }
 0xb7d   :  { %4641 = vmatmul.mubr.msk.f32.vlgmr.msra.gmra.mrb[42].mxu1 %vm238_vm8, %v1661_v2  ;;  %v1653_v7 = vmul.f32 %v1651_v3, %v1644_v44 }
 0xb7e   :  { %v5185_v9 = vpop.eup %5184  ;;  %4643 = vmatprep.mubr.msk.f32.mxu1 %vm5372_vm0, %v5371_v0 }
 0xb7f   :  { %v1662_v27 = vadd.f32 %v1660_v54, %v1653_v7  ;;  %v1645_v20 = vmul.f32 %v5185_v9, %v1605_v15 }
 0xb81   :  { %4644 = vmatmul.mubr.msk.f32.gmra.mrb[44].mxu1 %vm238_vm8, %v1662_v27  ;;  %v1654_v10 = vmul.f32 %v1651_v3, %v1645_v20 }
 0xb82   :  { %v5187_v1 = vpop.eup %5186  ;;  %4646 = vmatprep.mubr.msk.f32.mxu1 %vm5372_vm0, %v5371_v0 }
 0xb83   :  { %v1663_v5 = vadd.f32 %v1660_v54, %v1654_v10  ;;  %v1646_v59 = vmul.f32 %v5187_v1, %v1606_v26  ;;  %v1808_v26 = vld [vmem:[#allocation2 + $0x388] sm:$0xff] }
 0xb84   :  { %v5023_v38 = vpack.c.bf16 %v1808_v26, %v1807_v22 }
 0xb85   :  { %4647 = vmatmul.mubr.msk.f32.gmra.mrb[46].mxu1 %vm238_vm8, %v1663_v5  ;;  %v1655_v30 = vmul.f32 %v1651_v3, %v1646_v59 }
 0xb86   :  { %v5189_v62 = vpop.eup %5188  ;;  %4649 = vmatprep.mubr.msk.f32.mxu1 %vm5372_vm0, %v5371_v0  ;;  %5024 = vmatpush3.bf16.msra.mxu0 %v5023_v38 }
 0xb87   :  { %v1664_v13 = vadd.f32 %v1660_v54, %v1655_v30  ;;  %v1647_v40 = vmul.f32 %v5189_v62, %v1607_v24  ;;  %5025 = vmatprep.subr.bf16.mxu0 %v5374_v33  ;;  %v1811_v24 = vld [vmem:[#allocation2 + $0x3a0] sm:$0xff] }
 0xb88   :  { %v5029_v16 = vpack.c.bf16 %v1812_v12, %v1811_v24 }
 0xb89   :  { %4650 = vmatmul.mubr.msk.f32.gmra.mrb[48].mxu1 %vm238_vm8, %v1664_v13  ;;  %v1656_v14 = vmul.f32 %v1651_v3, %v1647_v40 }
 0xb8a   :  { %4652 = vmatprep.mubr.msk.f32.mxu1 %vm5372_vm0, %v5371_v0  ;;  %5027 = vmatpush3.bf16.msra.mxu0 %v5026_v8 }
 0xb8b   :  { %v1665_v15 = vadd.f32 %v1660_v54, %v1656_v14  ;;  %5028 = vmatprep.subr.bf16.mxu0 %v5374_v33  ;;  %v4109_v14 = vld [vmem:[#allocation2 + $0x3b0] ss:$0 sm:$0xff] }
 0xb8d   :  { %4653 = vmatmul.mubr.msk.f32.gmra.mrb[50].mxu1 %vm238_vm8, %v1665_v15 }
 0xb8e   :  { %5030 = vmatpush3.bf16.msra.mxu0 %v5029_v16 }
 0xc50   :  { %v1756_v31 = vpop.f32.mrb[42].mxu1 }
 0xc51   :  { %v1757_v29 = vadd.f32 %v4103_v35, %v1756_v31  ;;  %v4642_v32 = vpop.f32.mrb[43].mxu1 }
 0xc53   :  { %v1785_v52 = vmul.f32 0.70710677, %v1757_v29  ;;  %v1780_v51 = vmul.f32 0.5, %v1757_v29 }
 0xc54   :  { %v1761_v36 = vpop.f32.mrb[44].mxu1 }
 0xc55   :  { %5190 = verf.f32 %v1785_v52  ;;  %v1762_v42 = vadd.f32 %v4103_v35, %v1761_v36  ;;  %v4645_v41 = vpop.f32.mrb[45].mxu1 }
 0xc57   :  { %v1786_v43 = vmul.f32 0.70710677, %v1762_v42  ;;  %v1781_v39 = vmul.f32 0.5, %v1762_v42 }
 0xc58   :  { %v1766_v45 = vpop.f32.mrb[46].mxu1 }
 0xc59   :  { %5192 = verf.f32 %v1786_v43  ;;  %v1767_v47 = vadd.f32 %v4103_v35, %v1766_v45  ;;  %v4648_v48 = vpop.f32.mrb[47].mxu1 }
 0xc5b   :  { %v1787_v25 = vmul.f32 0.70710677, %v1767_v47  ;;  %v1782_v9 = vmul.f32 0.5, %v1767_v47 }
 0xc5c   :  { %v1771_v33 = vpop.f32.mrb[48].mxu1 }
 0xc5d   :  { %5194 = verf.f32 %v1787_v25  ;;  %v1772_v60 = vadd.f32 %v4103_v35, %v1771_v33  ;;  %v4651_v6 = vpop.f32.mrb[49].mxu1 }
 0xc5f   :  { %v5191_v23 = vpop.eup %5190  ;;  %v1788_v3 = vmul.f32 0.70710677, %v1772_v60  ;;  %v1783_v1 = vmul.f32 0.5, %v1772_v60 }
 0xc60   :  { %v1795_v53 = vadd.f32 1.0, %v5191_v23  ;;  %v1776_v54 = vpop.f32.mrb[50].mxu1 }
 0xc61   :  { %5196 = verf.f32 %v1788_v3  ;;  %v1777_v4 = vadd.f32 %v4103_v35, %v1776_v54  ;;  %v4654_v11 = vpop.f32.mrb[51].mxu1 }
 0xc62   :  { %v1800_v57 = vmul.f32 %v1795_v53, %v1780_v51 }
 0xc63   :  { %v5193_v58 = vpop.eup %5192  ;;  %v1789_v61 = vmul.f32 0.70710677, %v1777_v4  ;;  %v1784_v62 = vmul.f32 0.5, %v1777_v4 }
 0xc64   :  { %v1796_v2 = vadd.f32 1.0, %v5193_v58  ;;  %4672 = vmatmul.mubr.msk.f32.vlgmr.msra.gmra.mrb[40].mxu0 %vm974_vm11, %v1800_v57 }
 0xc65   :  { %5198 = verf.f32 %v1789_v61  ;;  %4674 = vmatprep.mubr.msk.f32.mxu0 %vm5372_vm0, %v5371_v0 }
 0xc66   :  { %v1801_v44 = vmul.f32 %v1796_v2, %v1781_v39 }
 0xc67   :  { %v5195_v7 = vpop.eup %5194 }
 0xc68   :  { %v1797_v27 = vadd.f32 1.0, %v5195_v7  ;;  %4675 = vmatmul.mubr.msk.f32.gmra.mrb[42].mxu0 %vm974_vm11, %v1801_v44 }
 0xc69   :  { %4677 = vmatprep.mubr.msk.f32.mxu0 %vm5372_vm0, %v5371_v0 }
 0xc6a   :  { %v1802_v20 = vmul.f32 %v1797_v27, %v1782_v9 }
 0xc6b   :  { %v5197_v10 = vpop.eup %5196 }
 0xc6c   :  { %v1798_v5 = vadd.f32 1.0, %v5197_v10  ;;  %4678 = vmatmul.mubr.msk.f32.gmra.mrb[44].mxu0 %vm974_vm11, %v1802_v20  ;;  %v2012_v20 = vld [vmem:[#allocation2 + $0x3c0] sm:$0xff] }
 0xc6d   :  { %4680 = vmatprep.mubr.msk.f32.mxu0 %vm5372_vm0, %v5371_v0  ;;  %v2100_v10 = vld [vmem:[#allocation2 + $0x3e0] sm:$0xff] }
 0xc6e   :  { %v1803_v59 = vmul.f32 %v1798_v5, %v1783_v1  ;;  %v2101_v1 = vld [vmem:[#allocation2 + $0x3e8] sm:$0xff] }
 0xc6f   :  { %v5199_v30 = vpop.eup %5198  ;;  %v5039_v5 = vpack.c.bf16 %v2101_v1, %v2100_v10 }
 0xc70   :  { %v1799_v13 = vadd.f32 1.0, %v5199_v30  ;;  %4681 = vmatmul.mubr.msk.f32.gmra.mrb[46].mxu0 %vm974_vm11, %v1803_v59 }
 0xc71   :  { %4683 = vmatprep.mubr.msk.f32.mxu0 %vm5372_vm0, %v5371_v0  ;;  %5040 = vmatprep.subr.bf16.mxu1 %v5039_v5 }
 0xc72   :  { %v1804_v40 = vmul.f32 %v1799_v13, %v1784_v62  ;;  %5042 = vmatpush3.bf16.msra.mxu1 %v5039_v5 }
 0xc74   :  { %4684 = vmatmul.mubr.msk.f32.gmra.mrb[48].mxu0 %vm974_vm11, %v1804_v40 }
 0xc75   :  { %4696 = vmatprep.mubr.msk.f32.mxu0 %vm356_vm10, %v2012_v20  ;;  %v4118_v20 = vld [vmem:[#allocation2 + $0x400] ss:$0 sm:$0xff] }
 0xd37   :  { %v1899_v15 = vpop.f32.mrb[40].mxu0 }
 0xd38   :  { %v1900_v18 = vadd.f32 %v4109_v14, %v1899_v15  ;;  %v4673_v21 = vpop.f32.mrb[41].mxu0 }
 0xd3a   :  { %v1923_v63 = vadd.f32 %v1900_v18, %v5713_v34 }
 0xd3b   :  { %v1904_v22 = vpop.f32.mrb[42].mxu0 }
 0xd3c   :  { %v1905_v26 = vadd.f32 %v4109_v14, %v1904_v22  ;;  %v4676_v38 = vpop.f32.mrb[43].mxu0  ;;  %v1929_v28 = vsel %vm238_vm8, %v1923_v63, 0.0 }
 0xd3d   :  { %1930 = vadd.xlane.f32.xlu1 %v1929_v28 }
 0xd3e   :  { %v1924_v19 = vadd.f32 %v1905_v26, %v5718_v49  ;;  %v1928_v26 = vld [vmem:[#allocation2 + $0x3b8] sm:$0x3] }
 0xd3f   :  { %v1909_v8 = vpop.f32.mrb[44].mxu0 }
 0xd40   :  { %v1910_v24 = vadd.f32 %v4109_v14, %v1909_v8  ;;  %v4679_v12 = vpop.f32.mrb[45].mxu0  ;;  %v1932_v16 = vsel %vm238_vm8, %v1924_v19, 0.0 }
 0xd41   :  { %1933 = vadd.xlane.f32.xlu0 %v1932_v16 }
 0xd42   :  { %v1925_v35 = vadd.f32 %v1910_v24, %v5723_v50  ;;  %v1997_v24 = vrot.slane %v1928_v26, %v5473_v46 }
 0xd43   :  { %v1914_v31 = vpop.f32.mrb[46].mxu0 }
 0xd44   :  { %v1915_v29 = vadd.f32 %v4109_v14, %v1914_v31  ;;  %v4682_v32 = vpop.f32.mrb[47].mxu0  ;;  %v1935_v34 = vsel %vm238_vm8, %v1925_v35, 0.0 }
 0xd45   :  { %1936 = vadd.xlane.f32.xlu1 %v1935_v34  ;;  %v2006_v32 = vrot.slane %v1928_v26, %v5476_v55 }
 0xd46   :  { %v1926_v52 = vadd.f32 %v1915_v29, %v5728_v56 }
 0xd47   :  { %v1919_v36 = vpop.f32.mrb[48].mxu0 }
 0xd48   :  { %v1920_v42 = vadd.f32 %v4109_v14, %v1919_v36  ;;  %v4685_v41 = vpop.f32.mrb[49].mxu0  ;;  %v1938_v49 = vsel %vm238_vm8, %v1926_v52, 0.0 }
 0xd49   :  { %1939 = vadd.xlane.f32.xlu0 %v1938_v49 }
 0xd4a   :  { %v1927_v43 = vadd.f32 %v1920_v42, %v5733_v17 }
 0xd4c   :  { %v1941_v45 = vsel %vm251_vm9, %v1927_v43, 0.0 }
 0xd4d   :  { %1942 = vadd.xlane.f32.xlu1 %v1941_v45 }
 0xdca   :  { %v1931_v50 = vpop.xlane.xlu1 %1930 }
 0xdcb   :  { %v1944_v47 = vmul.f32 0.03125, %v1931_v50 }
 0xdcd   :  { %v1949_v48 = vsub.f32 %v1923_v63, %v1944_v47 }
 0xdce   :  { %v1934_v25 = vpop.xlane.xlu0 %1933 }
 0xdcf   :  { %v1945_v33 = vmul.f32 0.03125, %v1934_v25  ;;  %v1954_v60 = vmul.f32 %v1949_v48, %v1949_v48 }
 0xdd1   :  { %v1950_v6 = vsub.f32 %v1924_v19, %v1945_v33  ;;  %v1959_v56 = vsel %vm238_vm8, %v1954_v60, 0.0 }
 0xdd2   :  { %v1937_v23 = vpop.xlane.xlu1 %1936  ;;  %1960 = vadd.xlane.f32.xlu0 %v1959_v56 }
 0xdd3   :  { %v1946_v3 = vmul.f32 0.03125, %v1937_v23  ;;  %v1955_v51 = vmul.f32 %v1950_v6, %v1950_v6 }
 0xdd5   :  { %v1951_v53 = vsub.f32 %v1925_v35, %v1946_v3  ;;  %v1962_v54 = vsel %vm238_vm8, %v1955_v51, 0.0  ;;  %v2013_v3 = vld [vmem:[#allocation2 + $0x3c8] sm:$0xff]  ;;  %v2102_v51 = vld [vmem:[#allocation2 + $0x3f0] sm:$0xff] }
 0xdd6   :  { %v1940_v17 = vpop.xlane.xlu0 %1939  ;;  %1963 = vadd.xlane.f32.xlu1 %v1962_v54 }
 0xdd7   :  { %v1947_v4 = vmul.f32 0.03125, %v1940_v17  ;;  %v1956_v11 = vmul.f32 %v1951_v53, %v1951_v53  ;;  %v2205_v17 = vld [vmem:[#allocation2 + $0x408] sm:$0xff] }
 0xdd9   :  { %v1952_v57 = vsub.f32 %v1926_v52, %v1947_v4  ;;  %v1965_v58 = vsel %vm238_vm8, %v1956_v11, 0.0  ;;  %v2206_v4 = vld [vmem:[#allocation2 + $0x410] sm:$0xff] }
 0xdda   :  { %1966 = vadd.xlane.f32.xlu0 %v1965_v58  ;;  %v1943_v61 = vpop.xlane.xlu1 %1942  ;;  %v5047_v11 = vpack.c.bf16 %v2206_v4, %v2205_v17  ;;  %v2015_v58 = vld [vmem:[#allocation2 + $0x3d8] sm:$0xff] }
 0xddb   :  { %v1948_v39 = vmul.f32 0.03125, %v1943_v61  ;;  %v1957_v2 = vmul.f32 %v1952_v57, %v1952_v57 }
 0xddd   :  { %v1953_v44 = vsub.f32 %v1927_v43, %v1948_v39  ;;  %v1968_v7 = vsel %vm238_vm8, %v1957_v2, 0.0 }
 0xdde   :  { %1969 = vadd.xlane.f32.xlu1 %v1968_v7  ;;  %v2207_v7 = vld [vmem:[#allocation2 + $0x418] sm:$0xff] }
 0xddf   :  { %v1958_v9 = vmul.f32 %v1953_v44, %v1953_v44 }
 0xde1   :  { %v1971_v27 = vsel %vm251_vm9, %v1958_v9, 0.0  ;;  %v2208_v9 = vld [vmem:[#allocation2 + $0x420] sm:$0xff] }
 0xde2   :  { %1972 = vadd.xlane.f32.xlu0 %v1971_v27  ;;  %v5051_v27 = vpack.c.bf16 %v2208_v9, %v2207_v7 }
 0xe5f   :  { %v1961_v59 = vpop.xlane.xlu0 %1960 }
 0xe60   :  { %v1974_v30 = vmul.f32 0.03125, %v1961_v59 }
 0xe62   :  { %v1979_v62 = vadd.f32 1e-05, %v1974_v30 }
 0xe63   :  { %v1964_v13 = vpop.xlane.xlu1 %1963 }
 0xe64   :  { %5200 = vrsqrt.f32 %v1979_v62  ;;  %v1975_v40 = vmul.f32 0.03125, %v1964_v13 }
 0xe66   :  { %v1980_v14 = vadd.f32 1e-05, %v1975_v40 }
 0xe67   :  { %v1967_v15 = vpop.xlane.xlu0 %1966 }
 0xe68   :  { %5202 = vrsqrt.f32 %v1980_v14  ;;  %v1976_v18 = vmul.f32 0.03125, %v1967_v15  ;;  %v4121_v14 = vld [vmem:[#allocation2 + $0x428] ss:$0 sm:$0xff] }
 0xe6a   :  { %v1981_v21 = vadd.f32 1e-05, %v1976_v18 }
 0xe6b   :  { %v1970_v63 = vpop.xlane.xlu1 %1969 }
 0xe6c   :  { %5204 = vrsqrt.f32 %v1981_v21  ;;  %v1977_v22 = vmul.f32 0.03125, %v1970_v63 }
 0xe6e   :  { %v5201_v38 = vpop.eup %5200  ;;  %v1982_v28 = vadd.f32 1e-05, %v1977_v22 }
 0xe6f   :  { %v1973_v19 = vpop.xlane.xlu0 %1972  ;;  %v1989_v8 = vmul.f32 %v5201_v38, %v1949_v48 }
 0xe70   :  { %5206 = vrsqrt.f32 %v1982_v28  ;;  %v1978_v12 = vmul.f32 0.03125, %v1973_v19 }
 0xe71   :  { %v1998_v29 = vmul.f32 %v1997_v24, %v1989_v8 }
 0xe72   :  { %v5203_v16 = vpop.eup %5202  ;;  %v1983_v35 = vadd.f32 1e-05, %v1978_v12 }
 0xe73   :  { %v1990_v31 = vmul.f32 %v5203_v16, %v1950_v6  ;;  %v2007_v36 = vadd.f32 %v2006_v32, %v1998_v29  ;;  %v2295_v16 = vand.u32 127, %v306_v37 }
 0xe74   :  { %5208 = vrsqrt.f32 %v1983_v35 }
 0xe75   :  { %v1999_v34 = vmul.f32 %v1997_v24, %v1990_v31 }
 0xe76   :  { %v5205_v52 = vpop.eup %5204 }
 0xe77   :  { %v2008_v42 = vadd.f32 %v2006_v32, %v1999_v34  ;;  %v1991_v41 = vmul.f32 %v5205_v52, %v1951_v53  ;;  %v2103_v53 = vld [vmem:[#allocation2 + $0x3f8] sm:$0xff] }
 0xe78   :  { %v5043_v54 = vpack.c.bf16 %v2103_v53, %v2102_v51 }
 0xe79   :  { %v5031_v49 = vpack.c.bf16 %v2008_v42, %v2007_v36  ;;  %v2000_v50 = vmul.f32 %v1997_v24, %v1991_v41 }
 0xe7a   :  { %v5207_v43 = vpop.eup %5206  ;;  %5044 = vmatprep.subr.bf16.mxu1 %v5043_v54 }
 0xe7b   :  { %5032 = vmatprep.subr.bf16.mxu0 %v5031_v49  ;;  %v1992_v45 = vmul.f32 %v5207_v43, %v1952_v57  ;;  %v2009_v25 = vadd.f32 %v2006_v32, %v2000_v50  ;;  %5046 = vmatpush3.bf16.msra.mxu1 %v5043_v54  ;;  %v2014_v57 = vld [vmem:[#allocation2 + $0x3d0] sm:$0xff] }
 0xe7c   :  { %5034 = vmatpush3.bf16.msra.mxu0 %v5031_v49  ;;  %4721 = vmatprep.subr.bf16.mxu1 %v5371_v0 }
 0xe7d   :  { %v2001_v47 = vmul.f32 %v1997_v24, %v1992_v45 }
 0xe7e   :  { %v5209_v48 = vpop.eup %5208 }
 0xe7f   :  { %v2010_v33 = vadd.f32 %v2006_v32, %v2001_v47  ;;  %v1993_v60 = vmul.f32 %v5209_v48, %v1953_v44 }
 0xe81   :  { %v5035_v6 = vpack.c.bf16 %v2010_v33, %v2009_v25  ;;  %v2002_v56 = vmul.f32 %v1997_v24, %v1993_v60  ;;  %v2338_v60 = vld [vmem:[#allocation2 + $0x458] sm:$0xff] }
 0xe83   :  { %5036 = vmatprep.subr.bf16.mxu0 %v5035_v6  ;;  %v2011_v23 = vadd.f32 %v2006_v32, %v2002_v56 }
 0xe84   :  { %5038 = vmatpush3.bf16.msra.mxu0 %v5035_v6  ;;  %v2339_v6 = vld [vmem:[#allocation2 + $0x460] sm:$0xff] }
 0xe85   :  { %4694 = vmatprep.subr.msk.mxu0 %vm68_vm1, %v2011_v23  ;;  %v2347_v56 = vpack.c.bf16 %v2339_v6, %v2338_v60 }
 0xe88   :  { %4695 = vmatpush3.msk.msra.mxu0 %vm68_vm1, %v2011_v23  ;;  %v2340_v23 = vld [vmem:[#allocation2 + $0x468] sm:$0xff] }
 0xe89   :  { %4697 = vmatmul.mubr.msk.f32.vlgmr.msra.gmra.mrb[50].mxu0 %vm356_vm10, %v2013_v3  ;;  %5048 = vmatprep.subr.bf16.mxu0 %v5047_v11  ;;  %v2341_v3 = vld [vmem:[#allocation2 + $0x470] sm:$0xff] }
 0xe8a   :  { %5050 = vmatpush3.bf16.msra.mxu0 %v5047_v11  ;;  %v2348_v51 = vpack.c.bf16 %v2341_v3, %v2340_v23 }
 0xe8b   :  { %5052 = vmatprep.subr.bf16.mxu0 %v5051_v27 }
 0xe8e   :  { %5054 = vmatpush3.bf16.msra.mxu0 %v5051_v27 }
 0xe8f   :  { %4729 = vmatprep.subr.bf16.mxu0 %v5371_v0 }
 0xf5c   :  { %v4698_v61 = vpop.f32.mrb[50].mxu0 }
 0xf5d   :  { %v2091_v39 = vpop.f32.mrb[51].mxu0  ;;  %v2097_v44 = vadd.f32 %v4698_v61, %v2015_v58 }
 0xf5e   :  { %v2092_v2 = vadd.f32 %v2091_v39, %v2014_v57 }
 0xf60   :  { %4707 = vmatprep.mubr.msk.f32.mxu1 %vm238_vm8, %v2092_v2 }
 0xf61   :  { %4708 = vmatmul.mubr.msk.f32.vlgmr.msra.gmra.mrb[52].mxu1 %vm238_vm8, %v2097_v44 }
 0xf62   :  { %4725 = vmatprep.mubr.msk.bf16.mxu1 %vm5372_vm0, %v5371_v0  ;;  %4722 = vmatpush3.bf16.msra.mxu1 %v2347_v56 }
 0xf63   :  { %4723 = vmatprep.subr.bf16.mxu1 %v5371_v0 }
 0xf66   :  { %4724 = vmatpush3.bf16.msra.mxu1 %v2348_v51 }
0x1034   :  { %v4709_v10 = vpop.f32.mrb[52].mxu1 }
0x1035   :  { %v2187_v1 = vadd.f32 %v4709_v10, %v4118_v20  ;;  %v2181_v5 = vpop.f32.mrb[53].mxu1 }
0x1036   :  { %v2182_v59 = vadd.f32 %v4118_v20, %v2181_v5 }
0x1037   :  { %v2191_v30 = vmul.f32 %v2187_v1, %v2187_v1 }
0x1038   :  { %4718 = vmatprep.mubr.msk.f32.mxu0 %vm238_vm8, %v2182_v59  ;;  %v2190_v62 = vmul.f32 %v2182_v59, %v2182_v59 }
0x1039   :  { %4719 = vmatmul.mubr.msk.f32.vlgmr.msra.gmra.mrb[52].mxu0 %vm238_vm8, %v2187_v1  ;;  %v2195_v13 = vsel %vm238_vm8, %v2191_v30, 0.0 }
0x103a   :  { %2196 = vadd.xlane.f32.xlu0 %v2195_v13  ;;  %v2192_v40 = vsel %vm238_vm8, %v2190_v62, 0.0  ;;  %4731 = vmatprep.mubr.msk.bf16.mxu0 %vm5372_vm0, %v5371_v0  ;;  %v2393_v13 = vld [vmem:[#allocation2 + $0x430] sm:$0xff] }
0x103b   :  { %2193 = vadd.xlane.f32.xlu1 %v2192_v40  ;;  %v2394_v40 = vld [vmem:[#allocation2 + $0x438] sm:$0xff] }
0x10c7   :  { %v2197_v15 = vpop.xlane.xlu0 %2196 }
0x10c8   :  { %v2194_v18 = vpop.xlane.xlu1 %2193  ;;  %v2204_v63 = vadd.f32 %v4121_v14, %v2197_v15 }
0x10c9   :  { %v2203_v38 = vadd.f32 %v4121_v14, %v2194_v18 }
0x110c   :  { %v4720_v21 = vpop.f32.mrb[52].mxu0 }
0x110d   :  { %v2291_v22 = vmul.f32 2.0, %v4720_v21  ;;  %v2281_v26 = vpop.f32.mrb[53].mxu0  ;;  %v2398_v21 = vpack.c.bf16 %v2394_v40, %v2393_v13 }
0x110e   :  { %v2290_v28 = vmul.f32 2.0, %v2281_v26 }
0x110f   :  { %v2293_v19 = vsub.f32 %v2204_v63, %v2291_v22  ;;  %v2395_v63 = vld [vmem:[#allocation2 + $0x440] sm:$0xff]  ;;  %v2396_v22 = vld [vmem:[#allocation2 + $0x448] sm:$0xff] }
0x1110   :  { %v2292_v8 = vsub.f32 %v2203_v38, %v2290_v28  ;;  %v2399_v26 = vpack.c.bf16 %v2396_v22, %v2395_v63  ;;  %v2397_v38 = vld [vmem:[#allocation2 + $0x450] sm:$0x3] }
0x1111   :  { %v2299_v24 = vsel %vm238_vm8, %v2293_v19, inf  ;;  %v2400_v28 = vpack.c.bf16 %v2397_v38, %v2397_v38 }
0x1112   :  { %2300 = vmin.xlane.f32.xlu0 %v2299_v24  ;;  %v2296_v12 = vsel %vm238_vm8, %v2292_v8, inf  ;;  %v2403_v24 = vld [vmem:[#allocation2 + $0x480] sm:$0xff] }
0x1113   :  { %2297 = vmin.xlane.f32.xlu1 %v2296_v12 }
0x119f   :  { %v2301_v35 = vpop.xlane.xlu0 %2300 }
0x11a0   :  { %vm2303_vm12 = vcmp.le.f32.partialorder %v2293_v19, %v2301_v35  ;;  %v2298_v31 = vpop.xlane.xlu1 %2297 }
0x11a1   :  { %v2305_v29 = vsel %vm2303_vm12, %v2295_v16, 32  ;;  %vm2302_vm13 = vcmp.le.f32.partialorder %v2292_v8, %v2298_v31 }
0x11a2   :  { %v2321_v32 = vsel %vm238_vm8, %v2305_v29, 2147483647  ;;  %v2304_v34 = vsel %vm2302_vm13, %v2295_v16, 32 }
0x11a3   :  { %v2306_v52 = vsel %vm238_vm8, %v2304_v34, 2147483647  ;;  %v2323_v36 = vshra.s32 %v2321_v32, 16  ;;  %v2322_v43 = vand.u32 65535, %v2321_v32 }
0x11a4   :  { %v2308_v42 = vshra.s32 %v2306_v52, 16  ;;  %v2307_v45 = vand.u32 65535, %v2306_v52  ;;  %v2404_v52 = vld [vmem:[#allocation2 + $0x488] sm:$0xff] }
0x11a5   :  { %v2325_v41 = vcvt.s32.f32 %v2323_v36  ;;  %v2324_v37 = vcvt.s32.f32 %v2322_v43 }
0x11a6   :  { %v2310_v49 = vcvt.s32.f32 %v2308_v42  ;;  %v2309_v48 = vcvt.s32.f32 %v2307_v45  ;;  %v2405_v42 = vld [vmem:[#allocation2 + $0x490] sm:$0xff] }
0x11a7   :  { %2326 = vmin.xlane.f32.xlu0 %v2325_v41 }
0x11a8   :  { %2311 = vmin.xlane.f32.xlu1 %v2310_v49 }
0x1234   :  { %v2327_v50 = vpop.xlane.xlu0 %2326 }
0x1235   :  { %v2312_v47 = vpop.xlane.xlu1 %2311  ;;  %vm2328_vm14 = vcmp.eq.f32.partialorder %v2325_v41, %v2327_v50  ;;  %v2333_v53 = vcvt.f32.s32 %v2327_v50 }
0x1236   :  { %v2329_v25 = vsel %vm2328_vm14, %v2324_v37, inf  ;;  %vm2313_vm15 = vcmp.eq.f32.partialorder %v2310_v49, %v2312_v47  ;;  %v2318_v54 = vcvt.f32.s32 %v2312_v47 }
0x1237   :  { %2330 = vmin.xlane.f32.xlu0 %v2329_v25  ;;  %v2314_v33 = vsel %vm2313_vm15, %v2309_v48, inf  ;;  %v2334_v4 = vshll.u32 %v2333_v53, 16  ;;  %v2406_v48 = vld [vmem:[#allocation2 + $0x498] sm:$0x3] }
0x1238   :  { %2315 = vmin.xlane.f32.xlu1 %v2314_v33  ;;  %v2319_v58 = vshll.u32 %v2318_v54, 16 }
0x12c4   :  { %v2331_v17 = vpop.xlane.xlu0 %2330 }
0x12c5   :  { %v2332_v11 = vcvt.f32.s32 %v2331_v17  ;;  %v2316_v57 = vpop.xlane.xlu1 %2315 }
0x12c6   :  { %v2317_v61 = vcvt.f32.s32 %v2316_v57 }
0x12c7   :  { %v2335_v39 = vadd.s32 %v2334_v4, %v2332_v11 }
0x12c8   :  { %v2320_v2 = vadd.s32 %v2319_v58, %v2317_v61 }
0x12c9   :  { %vm2337_vm4 = vcmp.eq.s32.totalorder %v2295_v16, %v2335_v39  ;;  %v4026_v44 = vcvt.s32.f32 %v2335_v39 }
0x12ca   :  { %v4125_v7 = vsel %vm2337_vm4, 1.0, %v5371_v0  ;;  %vm2336_vm5 = vcmp.eq.s32.totalorder %v2295_v16, %v2320_v2  ;;  %v4025_v9 = vcvt.s32.f32 %v2320_v2 }
0x12cb   :  { %v4028_v27 = vsel %vm238_vm8, %v2293_v19, %v4026_v44  ;;  %v4124_v20 = vsel %vm2336_vm5, 1.0, %v5371_v0  ;;  %v2402_v19 = vld [vmem:[#allocation2 + $0x478] sm:$0xff] }
0x12cc   :  { %v4031_v10 = vsel %vm4029_vm3, %v4028_v27, 0.0  ;;  %v2346_v1 = vpack.c.bf16 %v4125_v7, %v4124_v20  ;;  %v4027_v5 = vsel %vm238_vm8, %v2292_v8, %v4025_v9 }
0x12cd   :  { %4038 = vst [vmem:[%s6163_s2 + $0x30] sm:$0xff] %v4031_v10  ;;  %v4030_v59 = vsel %vm4029_vm3, %v4027_v5, 0.0 }
0x12ce   :  { %4037 = vst [vmem:[%s6163_s2 + $0x28] sm:$0xff] %v4030_v59  ;;  %4726 = vmatmul.mubr.msk.bf16.vlgmr.msra.gmra.mrb[56].mxu1 %vm238_vm8, %v2346_v1 }
0x13a1   :  { %v2386_v30 = vpop.f32.mrb[56].mxu1 }
0x13a2   :  { %v4727_v62 = vpop.f32.mrb[57].mxu1 }
0x13a3   :  { %v2389_v14 = vpop.f32.mrb[58].mxu1 }
0x13a4   :  { %v2401_v15 = vpack.c.bf16 %v2389_v14, %v2386_v30  ;;  %v4728_v18 = vpop.f32.mrb[59].mxu1  ;;  %v2557_v14 = vld [vmem:[#allocation2 + $0x4a8] sm:$0xff] }
0x13a6   :  { %4730 = vmatpush3.bf16.msra.mxu0 %v2401_v15  ;;  %v2558_v15 = vld [vmem:[#allocation2 + $0x4b0] sm:$0xff] }
0x13a7   :  { %4765 = vmatprep.subr.bf16.mxu0 %v5371_v0  ;;  %v2573_v18 = vpack.c.bf16 %v2558_v15, %v2557_v14  ;;  %v2567_v15 = vld [vmem:[#allocation2 + $0x4f8] sm:$0xff] }
0x13a9   :  { %4732 = vmatmul.mubr.msk.bf16.vlgmr.msra.gmra.mrb[56].mxu0 %vm2407_vm6, %v2398_v21  ;;  %4749 = vmatprep.mubr.msk.bf16.mxu1 %vm356_vm10, %v2573_v18  ;;  %v2568_v18 = vld [vmem:[#allocation2 + $0x500] sm:$0xff] }
0x13aa   :  { %4735 = vmatprep.mubr.msk.bf16.mxu0 %vm5372_vm0, %v5371_v0 }
0x13b1   :  { %4736 = vmatmul.mubr.msk.bf16.gmra.mrb[60].mxu0 %vm2407_vm6, %v2399_v26 }
0x13b2   :  { %4739 = vmatprep.mubr.msk.bf16.mxu0 %vm5372_vm0, %v5371_v0 }
0x13b9   :  { %4740 = vmatmul.mubr.msk.bf16.gmra.mrb[64].mxu0 %vm2407_vm6, %v2400_v28 }
0x13ba   :  { %4781 = vmatprep.mubr.msk.bf16.mxu0 %vm5372_vm0, %v5371_v0 }
0x147c   :  { %v2451_v8 = vpop.f32.mrb[56].mxu0 }
0x147d   :  { %v5836_v12 = vadd.f32 %v2451_v8, %v2402_v19  ;;  %v4733_v16 = vpop.f32.mrb[57].mxu0 }
0x147e   :  { %v2454_v35 = vpop.f32.mrb[58].mxu0 }
0x147f   :  { %v5838_v31 = vadd.f32 %v2454_v35, %v2403_v24  ;;  %v4734_v29 = vpop.f32.mrb[59].mxu0  ;;  %v2474_v32 = vsel %vm238_vm8, %v5836_v12, 0.0 }
0x1480   :  { %2475 = vadd.xlane.f32.xlu1 %v2474_v32  ;;  %v2473_v29 = vld [vmem:[#allocation2 + $0x4a0] sm:$0x3] }
0x1481   :  { %v2477_v34 = vsel %vm238_vm8, %v5838_v31, 0.0 }
0x1482   :  { %2478 = vadd.xlane.f32.xlu0 %v2477_v34  ;;  %v2542_v34 = vrot.slane %v2473_v29, %v5473_v46 }
0x1484   :  { %v2459_v36 = vpop.f32.mrb[60].mxu0 }
0x1485   :  { %v5844_v41 = vadd.f32 %v2459_v36, %v2404_v52  ;;  %v4737_v49 = vpop.f32.mrb[61].mxu0 }
0x1486   :  { %v2462_v43 = vpop.f32.mrb[62].mxu0 }
0x1487   :  { %v5846_v45 = vadd.f32 %v2462_v43, %v2405_v42  ;;  %v4738_v50 = vpop.f32.mrb[63].mxu0  ;;  %v2480_v37 = vsel %vm238_vm8, %v5844_v41, 0.0 }
0x1488   :  { %2481 = vadd.xlane.f32.xlu1 %v2480_v37 }
0x1489   :  { %v2483_v47 = vsel %vm238_vm8, %v5846_v45, 0.0 }
0x148a   :  { %2484 = vadd.xlane.f32.xlu0 %v2483_v47  ;;  %v2551_v47 = vrot.slane %v2473_v29, %v5476_v55 }
0x148c   :  { %v2467_v25 = vpop.f32.mrb[64].mxu0 }
0x148d   :  { %v5852_v33 = vadd.f32 %v2467_v25, %v2406_v48  ;;  %v4741_v60 = vpop.f32.mrb[65].mxu0 }
0x148e   :  { %v2470_v6 = vpop.f32.mrb[66].mxu0 }
0x148f   :  { %v4742_v56 = vpop.f32.mrb[67].mxu0  ;;  %v2486_v23 = vsel %vm251_vm9, %v5852_v33, 0.0 }
0x1490   :  { %2487 = vadd.xlane.f32.xlu1 %v2486_v23 }
0x150d   :  { %v2476_v3 = vpop.xlane.xlu1 %2475 }
0x150e   :  { %v2489_v51 = vmul.f32 0.03125, %v2476_v3 }
0x150f   :  { %v2479_v53 = vpop.xlane.xlu0 %2478 }
0x1510   :  { %v2494_v54 = vsub.f32 %v5836_v12, %v2489_v51  ;;  %v2490_v17 = vmul.f32 0.03125, %v2479_v53 }
0x1512   :  { %v2495_v4 = vsub.f32 %v5838_v31, %v2490_v17  ;;  %v2499_v11 = vmul.f32 %v2494_v54, %v2494_v54 }
0x1514   :  { %v2504_v57 = vsel %vm238_vm8, %v2499_v11, 0.0  ;;  %v2500_v58 = vmul.f32 %v2495_v4, %v2495_v4 }
0x1515   :  { %v2482_v61 = vpop.xlane.xlu1 %2481  ;;  %2505 = vadd.xlane.f32.xlu0 %v2504_v57 }
0x1516   :  { %v2491_v39 = vmul.f32 0.03125, %v2482_v61  ;;  %v2507_v2 = vsel %vm238_vm8, %v2500_v58, 0.0 }
0x1517   :  { %v2485_v44 = vpop.xlane.xlu0 %2484  ;;  %2508 = vadd.xlane.f32.xlu1 %v2507_v2 }
0x1518   :  { %v2496_v7 = vsub.f32 %v5844_v41, %v2491_v39  ;;  %v2492_v9 = vmul.f32 0.03125, %v2485_v44  ;;  %v2559_v44 = vld [vmem:[#allocation2 + $0x4b8] sm:$0xff] }
0x151a   :  { %v2497_v27 = vsub.f32 %v5846_v45, %v2492_v9  ;;  %v2501_v20 = vmul.f32 %v2496_v7, %v2496_v7  ;;  %v2560_v9 = vld [vmem:[#allocation2 + $0x4c0] sm:$0xff] }
0x151c   :  { %v2510_v10 = vsel %vm238_vm8, %v2501_v20, 0.0  ;;  %v2502_v1 = vmul.f32 %v2497_v27, %v2497_v27 }
0x151d   :  { %2511 = vadd.xlane.f32.xlu0 %v2510_v10  ;;  %v2488_v5 = vpop.xlane.xlu1 %2487  ;;  %v2562_v10 = vld [vmem:[#allocation2 + $0x4d0] sm:$0xff] }
0x151e   :  { %v2493_v59 = vmul.f32 0.03125, %v2488_v5  ;;  %v2513_v30 = vsel %vm238_vm8, %v2502_v1, 0.0  ;;  %v2574_v1 = vpack.c.bf16 %v2560_v9, %v2559_v44  ;;  %v2592_v9 = vld [vmem:[#allocation2 + $0x568] sm:$0xff] }
0x151f   :  { %2514 = vadd.xlane.f32.xlu1 %v2513_v30  ;;  %v2564_v30 = vld [vmem:[#allocation2 + $0x4e0] sm:$0xff] }
0x1520   :  { %v2498_v62 = vsub.f32 %v5852_v33, %v2493_v59  ;;  %v2563_v59 = vld [vmem:[#allocation2 + $0x4d8] sm:$0xff] }
0x1522   :  { %v2503_v13 = vmul.f32 %v2498_v62, %v2498_v62 }
0x1524   :  { %v2516_v40 = vsel %vm251_vm9, %v2503_v13, 0.0  ;;  %v2566_v13 = vld [vmem:[#allocation2 + $0x4f0] sm:$0xff] }
0x1525   :  { %2517 = vadd.xlane.f32.xlu0 %v2516_v40  ;;  %v2576_v40 = vpack.c.bf16 %v2564_v30, %v2563_v59  ;;  %v2595_v30 = vld [vmem:[#allocation2 + $0x580] sm:$0xff] }
0x15a2   :  { %v2506_v21 = vpop.xlane.xlu0 %2505 }
0x15a3   :  { %v2519_v63 = vmul.f32 0.03125, %v2506_v21  ;;  %v2569_v21 = vld [vmem:[#allocation2 + $0x508] sm:$0xff] }
0x15a4   :  { %v2509_v22 = vpop.xlane.xlu1 %2508 }
0x15a5   :  { %v2524_v26 = vadd.f32 1e-05, %v2519_v63  ;;  %v2520_v38 = vmul.f32 0.03125, %v2509_v22  ;;  %v2570_v63 = vld [vmem:[#allocation2 + $0x510] sm:$0xff]  ;;  %v2578_v22 = vpack.c.bf16 %v2568_v18, %v2567_v15 }
0x15a7   :  { %5210 = vrsqrt.f32 %v2524_v26  ;;  %v2525_v28 = vadd.f32 1e-05, %v2520_v38  ;;  %v2579_v26 = vpack.c.bf16 %v2570_v63, %v2569_v21  ;;  %v2571_v38 = vld [vmem:[#allocation2 + $0x518] sm:$0xff]  ;;  %v2593_v21 = vld [vmem:[#allocation2 + $0x570] sm:$0xff] }
0x15a9   :  { %5212 = vrsqrt.f32 %v2525_v28  ;;  %v2572_v28 = vld [vmem:[#allocation2 + $0x520] sm:$0xff] }
0x15aa   :  { %v2512_v19 = vpop.xlane.xlu0 %2511 }
0x15ab   :  { %v2521_v8 = vmul.f32 0.03125, %v2512_v19  ;;  %v2580_v19 = vpack.c.bf16 %v2572_v28, %v2571_v38 }
0x15ac   :  { %v2515_v24 = vpop.xlane.xlu1 %2514 }
0x15ad   :  { %v2526_v16 = vadd.f32 1e-05, %v2521_v8  ;;  %v2522_v35 = vmul.f32 0.03125, %v2515_v24  ;;  %v2586_v8 = vld [vmem:[#allocation2 + $0x538] sm:$0xff]  ;;  %v2584_v24 = vld [vmem:[#allocation2 + $0x528] sm:$0xff] }
0x15af   :  { %5214 = vrsqrt.f32 %v2526_v16  ;;  %v2527_v32 = vadd.f32 1e-05, %v2522_v35  ;;  %v2587_v35 = vld [vmem:[#allocation2 + $0x540] sm:$0xff] }
0x15b1   :  { %v5211_v52 = vpop.eup %5210  ;;  %5216 = vrsqrt.f32 %v2527_v32 }
0x15b2   :  { %v2518_v36 = vpop.xlane.xlu0 %2517  ;;  %v2534_v42 = vmul.f32 %v5211_v52, %v2494_v54 }
0x15b3   :  { %v5213_v49 = vpop.eup %5212  ;;  %v2523_v43 = vmul.f32 0.03125, %v2518_v36 }
0x15b4   :  { %v2535_v50 = vmul.f32 %v5213_v49, %v2495_v4  ;;  %v2543_v37 = vmul.f32 %v2542_v34, %v2534_v42 }
0x15b5   :  { %v2528_v48 = vadd.f32 1e-05, %v2523_v43 }
0x15b6   :  { %v2544_v25 = vmul.f32 %v2542_v34, %v2535_v50  ;;  %v2552_v60 = vadd.f32 %v2551_v47, %v2543_v37 }
0x15b7   :  { %5218 = vrsqrt.f32 %v2528_v48 }
0x15b8   :  { %v2553_v6 = vadd.f32 %v2551_v47, %v2544_v25  ;;  %v2590_v25 = vld [vmem:[#allocation2 + $0x558] sm:$0xff] }
0x15b9   :  { %v5215_v56 = vpop.eup %5214 }
0x15ba   :  { %v2581_v23 = vpack.c.bf16 %v2553_v6, %v2552_v60  ;;  %v2536_v3 = vmul.f32 %v5215_v56, %v2496_v7  ;;  %v2561_v7 = vld [vmem:[#allocation2 + $0x4c8] sm:$0xff]  ;;  %v2591_v56 = vld [vmem:[#allocation2 + $0x560] sm:$0xff] }
0x15bb   :  { %v5217_v51 = vpop.eup %5216  ;;  %v2575_v5 = vpack.c.bf16 %v2562_v10, %v2561_v7  ;;  %v2588_v60 = vld [vmem:[#allocation2 + $0x548] sm:$0xff] }
0x15bc   :  { %4743 = vmatprep.subr.bf16.mxu1 %v2581_v23  ;;  %v2537_v53 = vmul.f32 %v5217_v51, %v2497_v27  ;;  %v2545_v17 = vmul.f32 %v2542_v34, %v2536_v3  ;;  %v2589_v51 = vld [vmem:[#allocation2 + $0x550] sm:$0xff] }
0x15bd   :  { %4744 = vmatpush3.bf16.msra.mxu1 %v2581_v23 }
0x15be   :  { %v2546_v54 = vmul.f32 %v2542_v34, %v2537_v53  ;;  %v2554_v11 = vadd.f32 %v2551_v47, %v2545_v17 }
0x15c0   :  { %v2555_v57 = vadd.f32 %v2551_v47, %v2546_v54 }
0x15c1   :  { %v5219_v4 = vpop.eup %5218 }
0x15c2   :  { %v2582_v58 = vpack.c.bf16 %v2555_v57, %v2554_v11  ;;  %v2538_v61 = vmul.f32 %v5219_v4, %v2498_v62  ;;  %v2565_v62 = vld [vmem:[#allocation2 + $0x4e8] sm:$0xff] }
0x15c3   :  { %v2577_v14 = vpack.c.bf16 %v2566_v13, %v2565_v62 }
0x15c4   :  { %4745 = vmatprep.subr.bf16.mxu1 %v2582_v58  ;;  %v2547_v39 = vmul.f32 %v2542_v34, %v2538_v61  ;;  %v2585_v34 = vld [vmem:[#allocation2 + $0x530] sm:$0xff] }
0x15c5   :  { %4746 = vmatpush3.bf16.msra.mxu1 %v2582_v58 }
0x15c6   :  { %v2556_v2 = vadd.f32 %v2551_v47, %v2547_v39 }
0x15c8   :  { %v2583_v20 = vpack.c.bf16 %v2556_v2, %v2556_v2  ;;  %v2594_v2 = vld [vmem:[#allocation2 + $0x578] sm:$0xff] }
0x15ca   :  { %5055 = vmatprep.subr.msk.bf16.mxu1 %vm2624_vm7, %v2583_v20  ;;  %v2626_v27 = vsel %vm2624_vm7, %v2583_v20, 0 }
0x15cb   :  { %4748 = vmatpush3.bf16.msra.mxu1 %v2626_v27 }
0x15cc   :  { %4793 = vmatprep.subr.bf16.mxu1 %v5371_v0 }
0x15ce   :  { %4750 = vmatmul.mubr.msk.bf16.vlgmr.msra.gmra.mrb[60].mxu1 %vm356_vm10, %v2574_v1 }
0x15cf   :  { %4753 = vmatprep.mubr.msk.bf16.mxu1 %vm356_vm10, %v2575_v5 }
0x15d6   :  { %4754 = vmatmul.mubr.msk.bf16.gmra.mrb[64].mxu1 %vm356_vm10, %v2576_v40 }
0x15d7   :  { %4757 = vmatprep.mubr.msk.bf16.mxu1 %vm356_vm10, %v2577_v14 }
0x15de   :  { %4758 = vmatmul.mubr.msk.bf16.gmra.mrb[68].mxu1 %vm356_vm10, %v2578_v22 }
0x15df   :  { %4761 = vmatprep.mubr.msk.bf16.mxu1 %vm356_vm10, %v2579_v26 }
0x15e6   :  { %4762 = vmatmul.mubr.msk.bf16.gmra.mrb[72].mxu1 %vm356_vm10, %v2580_v19 }
0x15e7   :  { %4797 = vmatprep.mubr.msk.bf16.mxu1 %vm5372_vm0, %v5371_v0 }
0x16a1   :  { %v4751_v16 = vpop.f32.mrb[60].mxu1 }
0x16a2   :  { %v2671_v29 = vadd.f32 %v4751_v16, %v2586_v8  ;;  %v2662_v32 = vpop.f32.mrb[61].mxu1 }
0x16a3   :  { %v2663_v52 = vadd.f32 %v2662_v32, %v2584_v24  ;;  %v4752_v36 = vpop.f32.mrb[62].mxu1 }
0x16a4   :  { %v2743_v42 = vmul.f32 0.70710677, %v2671_v29  ;;  %v2674_v49 = vadd.f32 %v4752_v36, %v2587_v35  ;;  %v2665_v43 = vpop.f32.mrb[63].mxu1  ;;  %v2727_v13 = vmul.f32 0.5, %v2671_v29 }
0x16a5   :  { %v2741_v50 = vmul.f32 0.70710677, %v2663_v52  ;;  %v2666_v37 = vadd.f32 %v2665_v43, %v2585_v34  ;;  %v2725_v63 = vmul.f32 0.5, %v2663_v52 }
0x16a6   :  { %5220 = verf.f32 %v2743_v42  ;;  %v2744_v47 = vmul.f32 0.70710677, %v2674_v49  ;;  %v2728_v40 = vmul.f32 0.5, %v2674_v49  ;;  %v2598_v42 = vld [vmem:[#allocation2 + $0x598] sm:$0xff] }
0x16a7   :  { %5222 = verf.f32 %v2741_v50  ;;  %v2742_v48 = vmul.f32 0.70710677, %v2666_v37  ;;  %v2726_v22 = vmul.f32 0.5, %v2666_v37  ;;  %v2596_v50 = vld [vmem:[#allocation2 + $0x588] sm:$0xff] }
0x16a8   :  { %5224 = verf.f32 %v2744_v47 }
0x16a9   :  { %5226 = verf.f32 %v2742_v48  ;;  %v4755_v6 = vpop.f32.mrb[64].mxu1 }
0x16aa   :  { %v5881_v23 = vadd.f32 %v4755_v6, %v2590_v25  ;;  %v2678_v3 = vpop.f32.mrb[65].mxu1 }
0x16ab   :  { %v5883_v53 = vadd.f32 %v2678_v3, %v2588_v60  ;;  %v4756_v17 = vpop.f32.mrb[66].mxu1  ;;  %v2599_v3 = vld [vmem:[#allocation2 + $0x5a0] sm:$0xff] }
0x16ac   :  { %v2747_v54 = vmul.f32 0.70710677, %v5881_v23  ;;  %v2690_v11 = vadd.f32 %v4756_v17, %v2591_v56  ;;  %v2681_v57 = vpop.f32.mrb[67].mxu1  ;;  %v2731_v17 = vmul.f32 0.5, %v5881_v23 }
0x16ad   :  { %v2745_v4 = vmul.f32 0.70710677, %v5883_v53  ;;  %v5887_v58 = vadd.f32 %v2681_v57, %v2589_v51 }
0x16ae   :  { %5228 = verf.f32 %v2747_v54  ;;  %v2748_v61 = vmul.f32 0.70710677, %v2690_v11  ;;  %v2732_v54 = vmul.f32 0.5, %v2690_v11 }
0x16af   :  { %5230 = verf.f32 %v2745_v4  ;;  %v2746_v39 = vmul.f32 0.70710677, %v5887_v58 }
0x16b0   :  { %v5221_v44 = vpop.eup %5220  ;;  %5232 = verf.f32 %v2748_v61 }
0x16b1   :  { %v5223_v20 = vpop.eup %5222  ;;  %v2775_v7 = vadd.f32 1.0, %v5221_v44  ;;  %5234 = verf.f32 %v2746_v39  ;;  %v4759_v10 = vpop.f32.mrb[68].mxu1  ;;  %v2597_v39 = vld [vmem:[#allocation2 + $0x590] sm:$0xff]  ;;  %v2730_v44 = vmul.f32 0.5, %v5887_v58 }
0x16b2   :  { %v5225_v27 = vpop.eup %5224  ;;  %v2773_v1 = vadd.f32 1.0, %v5223_v20  ;;  %v5890_v5 = vadd.f32 %v4759_v10, %v2594_v2  ;;  %v2694_v59 = vpop.f32.mrb[69].mxu1  ;;  %v2729_v2 = vmul.f32 0.5, %v5883_v53 }
0x16b3   :  { %v5227_v62 = vpop.eup %5226  ;;  %v2776_v14 = vadd.f32 1.0, %v5225_v27  ;;  %v5892_v15 = vadd.f32 %v2694_v59, %v2592_v9  ;;  %v4760_v18 = vpop.f32.mrb[70].mxu1  ;;  %v2791_v19 = vmul.f32 %v2775_v7, %v2727_v13 }
0x16b4   :  { %v2774_v26 = vadd.f32 1.0, %v5227_v62  ;;  %v2751_v38 = vmul.f32 0.70710677, %v5890_v5  ;;  %v2697_v28 = vpop.f32.mrb[71].mxu1  ;;  %v2706_v16 = vadd.f32 %v4760_v18, %v2595_v30  ;;  %v2789_v35 = vmul.f32 %v2773_v1, %v2725_v63 }
0x16b5   :  { %v2792_v8 = vmul.f32 %v2776_v14, %v2728_v40  ;;  %v2749_v24 = vmul.f32 0.70710677, %v5892_v15  ;;  %v2698_v29 = vadd.f32 %v2697_v28, %v2593_v21 }
0x16b6   :  { %v2790_v32 = vmul.f32 %v2774_v26, %v2726_v22  ;;  %5236 = verf.f32 %v2751_v38  ;;  %v2752_v36 = vmul.f32 0.70710677, %v2706_v16  ;;  %v2735_v26 = vmul.f32 0.5, %v5890_v5 }
0x16b7   :  { %v2814_v34 = vpack.c.bf16 %v2792_v8, %v2791_v19  ;;  %5238 = verf.f32 %v2749_v24  ;;  %v2750_v43 = vmul.f32 0.70710677, %v2698_v29  ;;  %v2736_v38 = vmul.f32 0.5, %v2706_v16 }
0x16b8   :  { %v5229_v49 = vpop.eup %5228  ;;  %v2813_v52 = vpack.c.bf16 %v2790_v32, %v2789_v35  ;;  %5240 = verf.f32 %v2752_v36  ;;  %v2733_v19 = vmul.f32 0.5, %v5892_v15  ;;  %v2734_v8 = vmul.f32 0.5, %v2698_v29 }
0x16b9   :  { %v5231_v37 = vpop.eup %5230  ;;  %v2779_v47 = vadd.f32 1.0, %v5229_v49  ;;  %v4763_v48 = vpop.f32.mrb[72].mxu1  ;;  %5242 = verf.f32 %v2750_v43 }
0x16ba   :  { %v5233_v25 = vpop.eup %5232  ;;  %v2777_v60 = vadd.f32 1.0, %v5231_v37  ;;  %v2719_v6 = vadd.f32 %v4763_v48, %v2598_v42  ;;  %v2710_v56 = vpop.f32.mrb[73].mxu1  ;;  %4766 = vmatpush3.bf16.msra.mxu0 %v2813_v52 }
0x16bb   :  { %v5235_v51 = vpop.eup %5234  ;;  %v2780_v57 = vadd.f32 1.0, %v5233_v25  ;;  %v2711_v4 = vadd.f32 %v2710_v56, %v2596_v50  ;;  %v4764_v61 = vpop.f32.mrb[74].mxu1  ;;  %4767 = vmatprep.subr.bf16.mxu0 %v5371_v0  ;;  %v2795_v10 = vmul.f32 %v2779_v47, %v2731_v17 }
0x16bc   :  { %v2778_v9 = vadd.f32 1.0, %v5235_v51  ;;  %v2755_v20 = vmul.f32 0.70710677, %v2719_v6  ;;  %v2713_v7 = vpop.f32.mrb[75].mxu1  ;;  %v2722_v59 = vadd.f32 %v4764_v61, %v2599_v3  ;;  %v2793_v30 = vmul.f32 %v2777_v60, %v2729_v2  ;;  %v2805_v61 = vld [vmem:[#allocation2 + $0x5a8] sm:$0xff]  ;;  %v2808_v2 = vld [vmem:[#allocation2 + $0x5c0] sm:$0xff] }
0x16bd   :  { %v2796_v27 = vmul.f32 %v2780_v57, %v2732_v54  ;;  %v2753_v1 = vmul.f32 0.70710677, %v2711_v4  ;;  %v2714_v11 = vadd.f32 %v2713_v7, %v2597_v39  ;;  %v2739_v47 = vmul.f32 0.5, %v2719_v6  ;;  %v2806_v39 = vld [vmem:[#allocation2 + $0x5b0] sm:$0xff] }
0x16be   :  { %v2794_v23 = vmul.f32 %v2778_v9, %v2730_v44  ;;  %5244 = verf.f32 %v2755_v20  ;;  %4768 = vmatpush3.bf16.msra.mxu0 %v2814_v34  ;;  %v2756_v13 = vmul.f32 0.70710677, %v2722_v59  ;;  %v2740_v15 = vmul.f32 0.5, %v2722_v59  ;;  %v2809_v9 = vld [vmem:[#allocation2 + $0x5c8] sm:$0x3]  ;;  %v2821_v7 = vld [vmem:[#allocation2 + $0x5d0] sm:$0xff] }
0x16bf   :  { %v2816_v62 = vpack.c.bf16 %v2796_v27, %v2795_v10  ;;  %5246 = verf.f32 %v2753_v1  ;;  %4769 = vmatprep.subr.bf16.mxu0 %v5371_v0  ;;  %v2754_v58 = vmul.f32 0.70710677, %v2714_v11  ;;  %v2737_v48 = vmul.f32 0.5, %v2711_v4  ;;  %v2807_v4 = vld [vmem:[#allocation2 + $0x5b8] sm:$0xff] }
0x16c0   :  { %v5237_v53 = vpop.eup %5236  ;;  %v2815_v40 = vpack.c.bf16 %v2794_v23, %v2793_v30  ;;  %5248 = verf.f32 %v2756_v13  ;;  %v2738_v25 = vmul.f32 0.5, %v2714_v11  ;;  %v2810_v6 = vpack.c.bf16 %v2806_v39, %v2805_v61  ;;  %v2822_v27 = vld [vmem:[#allocation2 + $0x5d8] sm:$0xff] }
0x16c1   :  { %v5239_v14 = vpop.eup %5238  ;;  %v2783_v18 = vadd.f32 1.0, %v5237_v53  ;;  %5250 = verf.f32 %v2754_v58  ;;  %v2811_v44 = vpack.c.bf16 %v2808_v2, %v2807_v4  ;;  %v2812_v20 = vpack.c.bf16 %v2809_v9, %v2809_v9  ;;  %v2971_v2 = vld [vmem:[#allocation2 + $0x600] sm:$0xff] }
0x16c2   :  { %4770 = vmatpush3.bf16.msra.mxu0 %v2815_v40  ;;  %v5241_v21 = vpop.eup %5240  ;;  %v2781_v63 = vadd.f32 1.0, %v5239_v14  ;;  %v2823_v40 = vld [vmem:[#allocation2 + $0x5e0] sm:$0xff] }
0x16c3   :  { %4771 = vmatprep.subr.bf16.mxu0 %v5371_v0  ;;  %v5243_v22 = vpop.eup %5242  ;;  %v2784_v28 = vadd.f32 1.0, %v5241_v21  ;;  %v2799_v35 = vmul.f32 %v2783_v18, %v2735_v26  ;;  %v2824_v18 = vld [vmem:[#allocation2 + $0x5e8] sm:$0xff] }
0x16c4   :  { %v2782_v24 = vadd.f32 1.0, %v5243_v22  ;;  %v2797_v34 = vmul.f32 %v2781_v63, %v2733_v19  ;;  %v2825_v19 = vld [vmem:[#allocation2 + $0x5f0] sm:$0x3] }
0x16c5   :  { %v2800_v32 = vmul.f32 %v2784_v28, %v2736_v38 }
0x16c6   :  { %4772 = vmatpush3.bf16.msra.mxu0 %v2816_v62  ;;  %v2798_v36 = vmul.f32 %v2782_v24, %v2734_v8 }
0x16c7   :  { %4773 = vmatprep.subr.bf16.mxu0 %v5371_v0  ;;  %v2818_v49 = vpack.c.bf16 %v2800_v32, %v2799_v35 }
0x16c8   :  { %v5245_v42 = vpop.eup %5244  ;;  %v2817_v43 = vpack.c.bf16 %v2798_v36, %v2797_v34 }
0x16c9   :  { %v5247_v52 = vpop.eup %5246  ;;  %v2787_v50 = vadd.f32 1.0, %v5245_v42 }
0x16ca   :  { %v5249_v37 = vpop.eup %5248  ;;  %v2785_v5 = vadd.f32 1.0, %v5247_v52  ;;  %4774 = vmatpush3.bf16.msra.mxu0 %v2817_v43 }
0x16cb   :  { %v5251_v16 = vpop.eup %5250  ;;  %v2788_v29 = vadd.f32 1.0, %v5249_v37  ;;  %4775 = vmatprep.subr.bf16.mxu0 %v5371_v0  ;;  %v2803_v56 = vmul.f32 %v2787_v50, %v2739_v47 }
0x16cc   :  { %v2786_v60 = vadd.f32 1.0, %v5251_v16  ;;  %v2801_v51 = vmul.f32 %v2785_v5, %v2737_v48 }
0x16cd   :  { %v2804_v3 = vmul.f32 %v2788_v29, %v2740_v15 }
0x16ce   :  { %v2802_v17 = vmul.f32 %v2786_v60, %v2738_v25  ;;  %4776 = vmatpush3.bf16.msra.mxu0 %v2818_v49 }
0x16cf   :  { %v2820_v54 = vpack.c.bf16 %v2804_v3, %v2803_v56  ;;  %4777 = vmatprep.subr.bf16.mxu0 %v5371_v0 }
0x16d0   :  { %v2819_v57 = vpack.c.bf16 %v2802_v17, %v2801_v51 }
0x16d2   :  { %4778 = vmatpush3.bf16.msra.mxu0 %v2819_v57 }
0x16d3   :  { %4779 = vmatprep.subr.bf16.mxu0 %v5371_v0 }
0x16d6   :  { %4780 = vmatpush3.bf16.msra.mxu0 %v2820_v54 }
0x16d7   :  { %4809 = vmatprep.subr.bf16.mxu0 %v5371_v0 }
0x16d9   :  { %4782 = vmatmul.mubr.bf16.vlgmr.msra.gmra.mrb[68].mxu0 %v2810_v6 }
0x16da   :  { %4785 = vmatprep.mubr.msk.bf16.mxu0 %vm5372_vm0, %v5371_v0 }
0x16e1   :  { %4786 = vmatmul.mubr.bf16.gmra.mrb[72].mxu0 %v2811_v44  ;;  %v2972_v44 = vld [vmem:[#allocation2 + $0x608] sm:$0xff] }
0x16e2   :  { %4789 = vmatprep.mubr.msk.bf16.mxu0 %vm5372_vm0, %v5371_v0  ;;  %v2978_v9 = vpack.c.bf16 %v2972_v44, %v2971_v2  ;;  %v3081_v2 = vld [vmem:[#allocation2 + $0x658] sm:$0xff]  ;;  %v3082_v44 = vld [vmem:[#allocation2 + $0x660] sm:$0xff] }
0x16e4   :  { %4794 = vmatpush3.bf16.msra.mxu1 %v2978_v9  ;;  %v3089_v9 = vpack.c.bf16 %v3082_v44, %v3081_v2 }
0x16e5   :  { %4795 = vmatprep.subr.bf16.mxu1 %v5371_v0 }
0x16e9   :  { %4790 = vmatmul.mubr.bf16.gmra.mrb[76].mxu0 %v2812_v20  ;;  %v2973_v20 = vld [vmem:[#allocation2 + $0x610] sm:$0xff] }
0x16ea   :  { %4817 = vmatprep.mubr.msk.bf16.mxu0 %vm5372_vm0, %v5371_v0 }
0x17ac   :  { %v2860_v10 = vpop.f32.mrb[68].mxu0 }
0x17ad   :  { %v2861_v1 = vadd.f32 %v2860_v10, %v2821_v7  ;;  %v4783_v59 = vpop.f32.mrb[69].mxu0  ;;  %v2974_v7 = vld [vmem:[#allocation2 + $0x618] sm:$0xff] }
0x17ae   :  { %v2863_v30 = vpop.f32.mrb[70].mxu0  ;;  %v2979_v10 = vpack.c.bf16 %v2974_v7, %v2973_v20  ;;  %v4138_v20 = vld [vmem:[#allocation2 + $0x620] ss:$0 sm:$0xff] }
0x17af   :  { %v5916_v23 = vadd.f32 %v2861_v1, %v5836_v12  ;;  %v2864_v11 = vadd.f32 %v2863_v30, %v2822_v27  ;;  %v4784_v62 = vpop.f32.mrb[71].mxu0 }
0x17b0   :  { %4796 = vmatpush3.bf16.msra.mxu1 %v2979_v10 }
0x17b1   :  { %v5919_v13 = vadd.f32 %v2864_v11, %v5838_v31  ;;  %v2888_v53 = vsel %vm238_vm8, %v5916_v23, 0.0 }
0x17b2   :  { %2889 = vadd.xlane.f32.xlu1 %v2888_v53 }
0x17b3   :  { %v2891_v58 = vsel %vm238_vm8, %v5919_v13, 0.0 }
0x17b4   :  { %2892 = vadd.xlane.f32.xlu0 %v2891_v58  ;;  %v2868_v14 = vpop.f32.mrb[72].mxu0 }
0x17b5   :  { %v2869_v21 = vadd.f32 %v2868_v14, %v2823_v40  ;;  %v4787_v63 = vpop.f32.mrb[73].mxu0  ;;  %v2882_v14 = vld [vmem:[#allocation2 + $0x5f8] sm:$0x3] }
0x17b6   :  { %v2871_v12 = vpop.f32.mrb[74].mxu0 }
0x17b7   :  { %v5926_v22 = vadd.f32 %v2869_v21, %v5844_v41  ;;  %v2872_v26 = vadd.f32 %v2871_v12, %v2824_v18  ;;  %v4788_v31 = vpop.f32.mrb[75].mxu0  ;;  %v2956_v12 = vrot.slane %v2882_v14, %v5473_v46 }
0x17b9   :  { %v5929_v38 = vadd.f32 %v2872_v26, %v5846_v45  ;;  %v2894_v28 = vsel %vm238_vm8, %v5926_v22, 0.0 }
0x17ba   :  { %2895 = vadd.xlane.f32.xlu1 %v2894_v28 }
0x17bb   :  { %v2897_v8 = vsel %vm238_vm8, %v5929_v38, 0.0 }
0x17bc   :  { %2898 = vadd.xlane.f32.xlu0 %v2897_v8  ;;  %v2876_v24 = vpop.f32.mrb[76].mxu0 }
0x17bd   :  { %v2877_v35 = vadd.f32 %v2876_v24, %v2825_v19  ;;  %v4791_v32 = vpop.f32.mrb[77].mxu0  ;;  %v2965_v24 = vrot.slane %v2882_v14, %v5476_v55 }
0x17be   :  { %v2879_v34 = vpop.f32.mrb[78].mxu0 }
0x17bf   :  { %v5936_v41 = vadd.f32 %v2877_v35, %v5852_v33  ;;  %v4792_v36 = vpop.f32.mrb[79].mxu0 }
0x17c1   :  { %v2900_v45 = vsel %vm251_vm9, %v5936_v41, 0.0 }
0x17c2   :  { %2901 = vadd.xlane.f32.xlu1 %v2900_v45 }
0x183f   :  { %v2890_v42 = vpop.xlane.xlu1 %2889 }
0x1840   :  { %v2903_v49 = vmul.f32 0.03125, %v2890_v42 }
0x1841   :  { %v2893_v52 = vpop.xlane.xlu0 %2892 }
0x1842   :  { %v2908_v43 = vsub.f32 %v5916_v23, %v2903_v49  ;;  %v2904_v50 = vmul.f32 0.03125, %v2893_v52 }
0x1844   :  { %v2909_v37 = vsub.f32 %v5919_v13, %v2904_v50  ;;  %v2913_v5 = vmul.f32 %v2908_v43, %v2908_v43 }
0x1846   :  { %v2918_v16 = vsel %vm238_vm8, %v2913_v5, 0.0  ;;  %v2914_v47 = vmul.f32 %v2909_v37, %v2909_v37 }
0x1847   :  { %v2896_v15 = vpop.xlane.xlu1 %2895  ;;  %2919 = vadd.xlane.f32.xlu0 %v2918_v16 }
0x1848   :  { %v2905_v33 = vmul.f32 0.03125, %v2896_v15  ;;  %v2921_v29 = vsel %vm238_vm8, %v2914_v47, 0.0 }
0x1849   :  { %v2899_v48 = vpop.xlane.xlu0 %2898  ;;  %2922 = vadd.xlane.f32.xlu1 %v2921_v29 }
0x184a   :  { %v2910_v25 = vsub.f32 %v5926_v22, %v2905_v33  ;;  %v2906_v60 = vmul.f32 0.03125, %v2899_v48 }
0x184c   :  { %v2911_v56 = vsub.f32 %v5929_v38, %v2906_v60  ;;  %v2915_v3 = vmul.f32 %v2910_v25, %v2910_v25 }
0x184e   :  { %v2924_v51 = vsel %vm238_vm8, %v2915_v3, 0.0  ;;  %v2916_v17 = vmul.f32 %v2911_v56, %v2911_v56  ;;  %v3075_v3 = vld [vmem:[#allocation2 + $0x628] sm:$0xff] }
0x184f   :  { %2925 = vadd.xlane.f32.xlu0 %v2924_v51  ;;  %v2902_v54 = vpop.xlane.xlu1 %2901  ;;  %v3076_v51 = vld [vmem:[#allocation2 + $0x630] sm:$0xff] }
0x1850   :  { %v2907_v57 = vmul.f32 0.03125, %v2902_v54  ;;  %v2927_v61 = vsel %vm238_vm8, %v2916_v17, 0.0  ;;  %v3086_v17 = vpack.c.bf16 %v3076_v51, %v3075_v3  ;;  %v3077_v54 = vld [vmem:[#allocation2 + $0x638] sm:$0xff] }
0x1851   :  { %2928 = vadd.xlane.f32.xlu1 %v2927_v61 }
0x1852   :  { %v2912_v39 = vsub.f32 %v5936_v41, %v2907_v57  ;;  %4810 = vmatpush3.bf16.msra.mxu0 %v3086_v17  ;;  %v3078_v57 = vld [vmem:[#allocation2 + $0x640] sm:$0xff]  ;;  %v4142_v17 = vld [vmem:[#allocation2 + $0x668] ss:$0 sm:$0xff] }
0x1853   :  { %4811 = vmatprep.subr.bf16.mxu0 %v5371_v0  ;;  %v3087_v61 = vpack.c.bf16 %v3078_v57, %v3077_v54 }
0x1854   :  { %v2917_v6 = vmul.f32 %v2912_v39, %v2912_v39 }
0x1856   :  { %v2930_v4 = vsel %vm251_vm9, %v2917_v6, 0.0  ;;  %4812 = vmatpush3.bf16.msra.mxu0 %v3087_v61  ;;  %v3080_v6 = vld [vmem:[#allocation2 + $0x650] sm:$0xff] }
0x1857   :  { %2931 = vadd.xlane.f32.xlu0 %v2930_v4  ;;  %4813 = vmatprep.subr.bf16.mxu0 %v5371_v0 }
0x18d4   :  { %v2920_v27 = vpop.xlane.xlu0 %2919 }
0x18d5   :  { %v2933_v1 = vmul.f32 0.03125, %v2920_v27 }
0x18d6   :  { %v2923_v59 = vpop.xlane.xlu1 %2922 }
0x18d7   :  { %v2938_v30 = vadd.f32 1e-05, %v2933_v1  ;;  %v2934_v11 = vmul.f32 0.03125, %v2923_v59 }
0x18d9   :  { %5252 = vrsqrt.f32 %v2938_v30  ;;  %v2939_v62 = vadd.f32 1e-05, %v2934_v11 }
0x18db   :  { %5254 = vrsqrt.f32 %v2939_v62 }
0x18dc   :  { %v2926_v53 = vpop.xlane.xlu0 %2925 }
0x18dd   :  { %v2935_v40 = vmul.f32 0.03125, %v2926_v53 }
0x18de   :  { %v2929_v58 = vpop.xlane.xlu1 %2928 }
0x18df   :  { %v2940_v18 = vadd.f32 1e-05, %v2935_v40  ;;  %v2936_v21 = vmul.f32 0.03125, %v2929_v58 }
0x18e1   :  { %5256 = vrsqrt.f32 %v2940_v18  ;;  %v2941_v63 = vadd.f32 1e-05, %v2936_v21 }
0x18e3   :  { %v5253_v26 = vpop.eup %5252  ;;  %5258 = vrsqrt.f32 %v2941_v63 }
0x18e4   :  { %v2948_v31 = vmul.f32 %v5253_v26, %v2908_v43  ;;  %v2932_v28 = vpop.xlane.xlu0 %2931 }
0x18e5   :  { %v5255_v19 = vpop.eup %5254  ;;  %v2937_v8 = vmul.f32 0.03125, %v2932_v28 }
0x18e6   :  { %v2957_v35 = vmul.f32 %v2956_v12, %v2948_v31  ;;  %v2949_v32 = vmul.f32 %v5255_v19, %v2909_v37 }
0x18e7   :  { %v2942_v34 = vadd.f32 1e-05, %v2937_v8 }
0x18e8   :  { %v2958_v36 = vmul.f32 %v2956_v12, %v2949_v32  ;;  %v2966_v45 = vadd.f32 %v2965_v24, %v2957_v35 }
0x18e9   :  { %5260 = vrsqrt.f32 %v2942_v34 }
0x18ea   :  { %v2967_v42 = vadd.f32 %v2965_v24, %v2958_v36 }
0x18eb   :  { %v5257_v49 = vpop.eup %5256 }
0x18ec   :  { %v2950_v52 = vmul.f32 %v5257_v49, %v2910_v25  ;;  %v2975_v50 = vpack.c.bf16 %v2967_v42, %v2966_v45 }
0x18ed   :  { %v5259_v5 = vpop.eup %5258 }
0x18ee   :  { %v2951_v16 = vmul.f32 %v5259_v5, %v2911_v56  ;;  %4798 = vmatmul.mubr.msk.bf16.vlgmr.msra.gmra.mrb[76].mxu1 %vm238_vm8, %v2975_v50  ;;  %v2959_v43 = vmul.f32 %v2956_v12, %v2950_v52 }
0x18ef   :  { %4801 = vmatprep.mubr.msk.bf16.mxu1 %vm5372_vm0, %v5371_v0 }
0x18f0   :  { %v2960_v47 = vmul.f32 %v2956_v12, %v2951_v16  ;;  %v2968_v15 = vadd.f32 %v2965_v24, %v2959_v43 }
0x18f2   :  { %v2969_v33 = vadd.f32 %v2965_v24, %v2960_v47 }
0x18f3   :  { %v5261_v37 = vpop.eup %5260 }
0x18f4   :  { %v2976_v29 = vpack.c.bf16 %v2969_v33, %v2968_v15  ;;  %v2952_v48 = vmul.f32 %v5261_v37, %v2912_v39  ;;  %v3079_v39 = vld [vmem:[#allocation2 + $0x648] sm:$0xff] }
0x18f5   :  { %v3088_v4 = vpack.c.bf16 %v3080_v6, %v3079_v39 }
0x18f6   :  { %4802 = vmatmul.mubr.msk.bf16.gmra.mrb[80].mxu1 %vm238_vm8, %v2976_v29  ;;  %v2961_v60 = vmul.f32 %v2956_v12, %v2952_v48 }
0x18f7   :  { %4805 = vmatprep.mubr.msk.bf16.mxu1 %vm5372_vm0, %v5371_v0  ;;  %4814 = vmatpush3.bf16.msra.mxu0 %v3088_v4 }
0x18f8   :  { %v2970_v25 = vadd.f32 %v2965_v24, %v2961_v60  ;;  %4815 = vmatprep.subr.bf16.mxu0 %v5371_v0 }
0x18fa   :  { %v2977_v56 = vpack.c.bf16 %v2970_v25, %v2970_v25 }
0x18fb   :  { %4816 = vmatpush3.bf16.msra.mxu0 %v3089_v9 }
0x18fc   :  { %4851 = vmatprep.subr.bf16.mxu0 %v5371_v0 }
0x18fe   :  { %4806 = vmatmul.mubr.msk.bf16.gmra.mrb[84].mxu1 %vm238_vm8, %v2977_v56 }
0x19c1   :  { %v3028_v7 = vpop.f32.mrb[76].mxu1 }
0x19c2   :  { %v3029_v10 = vadd.f32 %v4138_v20, %v3028_v7  ;;  %v4799_v27 = vpop.f32.mrb[77].mxu1 }
0x19c3   :  { %v3031_v1 = vpop.f32.mrb[78].mxu1 }
0x19c4   :  { %v3055_v59 = vmul.f32 0.70710677, %v3029_v10  ;;  %v3032_v30 = vadd.f32 %v4138_v20, %v3031_v1  ;;  %v4800_v11 = vpop.f32.mrb[79].mxu1  ;;  %v3050_v35 = vmul.f32 0.5, %v3029_v10 }
0x19c6   :  { %5262 = verf.f32 %v3055_v59  ;;  %v3056_v62 = vmul.f32 0.70710677, %v3032_v30  ;;  %v3051_v32 = vmul.f32 0.5, %v3032_v30 }
0x19c8   :  { %5264 = verf.f32 %v3056_v62 }
0x19c9   :  { %v3036_v53 = vpop.f32.mrb[80].mxu1 }
0x19ca   :  { %v3037_v40 = vadd.f32 %v4138_v20, %v3036_v53  ;;  %v4803_v58 = vpop.f32.mrb[81].mxu1 }
0x19cb   :  { %v3039_v14 = vpop.f32.mrb[82].mxu1 }
0x19cc   :  { %v3057_v18 = vmul.f32 0.70710677, %v3037_v40  ;;  %v3040_v21 = vadd.f32 %v4138_v20, %v3039_v14  ;;  %v4804_v63 = vpop.f32.mrb[83].mxu1  ;;  %v3052_v47 = vmul.f32 0.5, %v3037_v40 }
0x19ce   :  { %5266 = verf.f32 %v3057_v18  ;;  %v3058_v12 = vmul.f32 0.70710677, %v3040_v21  ;;  %v3053_v15 = vmul.f32 0.5, %v3040_v21 }
0x19d0   :  { %v5263_v26 = vpop.eup %5262  ;;  %5268 = verf.f32 %v3058_v12 }
0x19d1   :  { %v3065_v31 = vadd.f32 1.0, %v5263_v26  ;;  %v3044_v28 = vpop.f32.mrb[84].mxu1 }
0x19d2   :  { %v5265_v19 = vpop.eup %5264  ;;  %v3045_v8 = vadd.f32 %v4138_v20, %v3044_v28  ;;  %v4807_v24 = vpop.f32.mrb[85].mxu1 }
0x19d3   :  { %v3066_v34 = vadd.f32 1.0, %v5265_v19  ;;  %v3047_v36 = vpop.f32.mrb[86].mxu1  ;;  %v3070_v49 = vmul.f32 %v3065_v31, %v3050_v35 }
0x19d4   :  { %v3059_v45 = vmul.f32 0.70710677, %v3045_v8  ;;  %v4808_v42 = vpop.f32.mrb[87].mxu1  ;;  %v3054_v25 = vmul.f32 0.5, %v3045_v8 }
0x19d5   :  { %v3071_v52 = vmul.f32 %v3066_v34, %v3051_v32 }
0x19d6   :  { %5270 = verf.f32 %v3059_v45 }
0x19d7   :  { %v3083_v50 = vpack.c.bf16 %v3071_v52, %v3070_v49 }
0x19d8   :  { %v5267_v5 = vpop.eup %5266 }
0x19d9   :  { %v3067_v16 = vadd.f32 1.0, %v5267_v5  ;;  %4818 = vmatmul.mubr.msk.bf16.vlgmr.msra.gmra.mrb[80].mxu0 %vm974_vm11, %v3083_v50 }
0x19da   :  { %v5269_v43 = vpop.eup %5268  ;;  %4821 = vmatprep.mubr.msk.bf16.mxu0 %vm5372_vm0, %v5371_v0 }
0x19db   :  { %v3068_v33 = vadd.f32 1.0, %v5269_v43  ;;  %v3072_v37 = vmul.f32 %v3067_v16, %v3052_v47 }
0x19dd   :  { %v3073_v29 = vmul.f32 %v3068_v33, %v3053_v15 }
0x19df   :  { %v3084_v48 = vpack.c.bf16 %v3073_v29, %v3072_v37  ;;  %v3249_v37 = vld [vmem:[#allocation2 + $0x678] sm:$0xff]  ;;  %v3250_v29 = vld [vmem:[#allocation2 + $0x680] sm:$0xff] }
0x19e0   :  { %v5271_v60 = vpop.eup %5270 }
0x19e1   :  { %v3069_v56 = vadd.f32 1.0, %v5271_v60  ;;  %4822 = vmatmul.mubr.msk.bf16.gmra.mrb[84].mxu0 %vm974_vm11, %v3084_v48  ;;  %v3265_v48 = vpack.c.bf16 %v3250_v29, %v3249_v37  ;;  %v3259_v29 = vld [vmem:[#allocation2 + $0x6c8] sm:$0xff] }
0x19e2   :  { %4825 = vmatprep.mubr.msk.bf16.mxu0 %vm5372_vm0, %v5371_v0 }
0x19e3   :  { %v3074_v3 = vmul.f32 %v3069_v56, %v3054_v25  ;;  %4835 = vmatprep.mubr.msk.bf16.mxu1 %vm356_vm10, %v3265_v48  ;;  %v3260_v48 = vld [vmem:[#allocation2 + $0x6d0] sm:$0xff] }
0x19e5   :  { %v3085_v51 = vpack.c.bf16 %v3074_v3, %v3074_v3 }
0x19e9   :  { %4826 = vmatmul.mubr.msk.bf16.gmra.mrb[88].mxu0 %vm974_vm11, %v3085_v51 }
0x19ea   :  { %4867 = vmatprep.mubr.msk.bf16.mxu0 %vm5372_vm0, %v5371_v0 }
0x1aac   :  { %v3138_v54 = vpop.f32.mrb[80].mxu0 }
0x1aad   :  { %v3139_v57 = vadd.f32 %v4142_v17, %v3138_v54  ;;  %v4819_v61 = vpop.f32.mrb[81].mxu0 }
0x1aae   :  { %v3141_v39 = vpop.f32.mrb[82].mxu0 }
0x1aaf   :  { %v5974_v6 = vadd.f32 %v3139_v57, %v5916_v23  ;;  %v3142_v4 = vadd.f32 %v4142_v17, %v3141_v39  ;;  %v4820_v2 = vpop.f32.mrb[83].mxu0 }
0x1ab0   :  { %v3165_v2 = vld [vmem:[#allocation2 + $0x670] sm:$0x3] }
0x1ab1   :  { %v5977_v44 = vadd.f32 %v3142_v4, %v5919_v13  ;;  %v3166_v9 = vsel %vm238_vm8, %v5974_v6, 0.0 }
0x1ab2   :  { %3167 = vadd.xlane.f32.xlu1 %v3166_v9 }
0x1ab3   :  { %v3169_v20 = vsel %vm238_vm8, %v5977_v44, 0.0 }
0x1ab4   :  { %3170 = vadd.xlane.f32.xlu0 %v3169_v20  ;;  %v3146_v7 = vpop.f32.mrb[84].mxu0  ;;  %v3234_v20 = vrot.slane %v3165_v2, %v5473_v46 }
0x1ab5   :  { %v3147_v10 = vadd.f32 %v4142_v17, %v3146_v7  ;;  %v4823_v27 = vpop.f32.mrb[85].mxu0 }
0x1ab6   :  { %v3149_v1 = vpop.f32.mrb[86].mxu0 }
0x1ab7   :  { %v5984_v23 = vadd.f32 %v3147_v10, %v5926_v22  ;;  %v3150_v59 = vadd.f32 %v4142_v17, %v3149_v1  ;;  %v4824_v30 = vpop.f32.mrb[87].mxu0 }
0x1ab9   :  { %v5987_v13 = vadd.f32 %v3150_v59, %v5929_v38  ;;  %v3172_v11 = vsel %vm238_vm8, %v5984_v23, 0.0 }
0x1aba   :  { %3173 = vadd.xlane.f32.xlu1 %v3172_v11 }
0x1abb   :  { %v3175_v62 = vsel %vm238_vm8, %v5987_v13, 0.0 }
0x1abc   :  { %3176 = vadd.xlane.f32.xlu0 %v3175_v62  ;;  %v3154_v53 = vpop.f32.mrb[88].mxu0  ;;  %v3243_v62 = vrot.slane %v3165_v2, %v5476_v55 }
0x1abd   :  { %v3155_v40 = vadd.f32 %v4142_v17, %v3154_v53  ;;  %v4827_v58 = vpop.f32.mrb[89].mxu0 }
0x1abe   :  { %v3157_v14 = vpop.f32.mrb[90].mxu0 }
0x1abf   :  { %v5994_v22 = vadd.f32 %v3155_v40, %v5936_v41  ;;  %v4828_v18 = vpop.f32.mrb[91].mxu0 }
0x1ac1   :  { %v3178_v38 = vsel %vm251_vm9, %v5994_v22, 0.0 }
0x1ac2   :  { %3179 = vadd.xlane.f32.xlu1 %v3178_v38 }
0x1b3f   :  { %v3168_v21 = vpop.xlane.xlu1 %3167 }
0x1b40   :  { %v3181_v63 = vmul.f32 0.03125, %v3168_v21 }
0x1b41   :  { %v3171_v12 = vpop.xlane.xlu0 %3170 }
0x1b42   :  { %v3186_v26 = vsub.f32 %v5974_v6, %v3181_v63  ;;  %v3182_v31 = vmul.f32 0.03125, %v3171_v12 }
0x1b44   :  { %v3187_v28 = vsub.f32 %v5977_v44, %v3182_v31  ;;  %v3191_v19 = vmul.f32 %v3186_v26, %v3186_v26 }
0x1b46   :  { %v3196_v8 = vsel %vm238_vm8, %v3191_v19, 0.0  ;;  %v3192_v24 = vmul.f32 %v3187_v28, %v3187_v28 }
0x1b47   :  { %v3174_v35 = vpop.xlane.xlu1 %3173  ;;  %3197 = vadd.xlane.f32.xlu0 %v3196_v8 }
0x1b48   :  { %v3183_v41 = vmul.f32 0.03125, %v3174_v35  ;;  %v3199_v32 = vsel %vm238_vm8, %v3192_v24, 0.0 }
0x1b49   :  { %v3177_v34 = vpop.xlane.xlu0 %3176  ;;  %3200 = vadd.xlane.f32.xlu1 %v3199_v32 }
0x1b4a   :  { %v3188_v36 = vsub.f32 %v5984_v23, %v3183_v41  ;;  %v3184_v45 = vmul.f32 0.03125, %v3177_v34  ;;  %v3251_v34 = vld [vmem:[#allocation2 + $0x688] sm:$0xff] }
0x1b4c   :  { %v3189_v42 = vsub.f32 %v5987_v13, %v3184_v45  ;;  %v3193_v49 = vmul.f32 %v3188_v36, %v3188_v36  ;;  %v3252_v45 = vld [vmem:[#allocation2 + $0x690] sm:$0xff] }
0x1b4e   :  { %v3202_v52 = vsel %vm238_vm8, %v3193_v49, 0.0  ;;  %v3194_v50 = vmul.f32 %v3189_v42, %v3189_v42 }
0x1b4f   :  { %3203 = vadd.xlane.f32.xlu0 %v3202_v52  ;;  %v3180_v5 = vpop.xlane.xlu1 %3179  ;;  %v3253_v52 = vld [vmem:[#allocation2 + $0x698] sm:$0xff] }
0x1b50   :  { %v3185_v16 = vmul.f32 0.03125, %v3180_v5  ;;  %v3205_v43 = vsel %vm238_vm8, %v3194_v50, 0.0  ;;  %v3266_v50 = vpack.c.bf16 %v3252_v45, %v3251_v34  ;;  %v3284_v45 = vld [vmem:[#allocation2 + $0x738] sm:$0xff] }
0x1b51   :  { %3206 = vadd.xlane.f32.xlu1 %v3205_v43  ;;  %v3256_v43 = vld [vmem:[#allocation2 + $0x6b0] sm:$0xff] }
0x1b52   :  { %v3190_v47 = vsub.f32 %v5994_v22, %v3185_v16  ;;  %v3255_v16 = vld [vmem:[#allocation2 + $0x6a8] sm:$0xff] }
0x1b54   :  { %v3195_v15 = vmul.f32 %v3190_v47, %v3190_v47 }
0x1b56   :  { %v3208_v33 = vsel %vm251_vm9, %v3195_v15, 0.0  ;;  %v3258_v15 = vld [vmem:[#allocation2 + $0x6c0] sm:$0xff] }
0x1b57   :  { %3209 = vadd.xlane.f32.xlu0 %v3208_v33  ;;  %v3268_v33 = vpack.c.bf16 %v3256_v43, %v3255_v16  ;;  %v3287_v43 = vld [vmem:[#allocation2 + $0x750] sm:$0xff] }
0x1bd4   :  { %v3198_v60 = vpop.xlane.xlu0 %3197 }
0x1bd5   :  { %v3211_v25 = vmul.f32 0.03125, %v3198_v60  ;;  %v3261_v60 = vld [vmem:[#allocation2 + $0x6d8] sm:$0xff] }
0x1bd6   :  { %v3201_v56 = vpop.xlane.xlu1 %3200 }
0x1bd7   :  { %v3216_v3 = vadd.f32 1e-05, %v3211_v25  ;;  %v3212_v51 = vmul.f32 0.03125, %v3201_v56  ;;  %v3262_v25 = vld [vmem:[#allocation2 + $0x6e0] sm:$0xff]  ;;  %v3270_v56 = vpack.c.bf16 %v3260_v48, %v3259_v29 }
0x1bd9   :  { %5272 = vrsqrt.f32 %v3216_v3  ;;  %v3217_v17 = vadd.f32 1e-05, %v3212_v51  ;;  %v3271_v3 = vpack.c.bf16 %v3262_v25, %v3261_v60  ;;  %v3263_v51 = vld [vmem:[#allocation2 + $0x6e8] sm:$0xff]  ;;  %v3285_v60 = vld [vmem:[#allocation2 + $0x740] sm:$0xff] }
0x1bdb   :  { %5274 = vrsqrt.f32 %v3217_v17  ;;  %v3264_v17 = vld [vmem:[#allocation2 + $0x6f0] sm:$0xff] }
0x1bdc   :  { %v3204_v54 = vpop.xlane.xlu0 %3203 }
0x1bdd   :  { %v3213_v57 = vmul.f32 0.03125, %v3204_v54  ;;  %v3272_v54 = vpack.c.bf16 %v3264_v17, %v3263_v51 }
0x1bde   :  { %v3207_v61 = vpop.xlane.xlu1 %3206 }
0x1bdf   :  { %v3218_v39 = vadd.f32 1e-05, %v3213_v57  ;;  %v3214_v4 = vmul.f32 0.03125, %v3207_v61  ;;  %v3278_v57 = vld [vmem:[#allocation2 + $0x708] sm:$0xff]  ;;  %v3276_v61 = vld [vmem:[#allocation2 + $0x6f8] sm:$0xff] }
0x1be1   :  { %5276 = vrsqrt.f32 %v3218_v39  ;;  %v3219_v9 = vadd.f32 1e-05, %v3214_v4  ;;  %v3279_v4 = vld [vmem:[#allocation2 + $0x710] sm:$0xff] }
0x1be3   :  { %v5273_v7 = vpop.eup %5272  ;;  %5278 = vrsqrt.f32 %v3219_v9 }
0x1be4   :  { %v3210_v10 = vpop.xlane.xlu0 %3209  ;;  %v3226_v27 = vmul.f32 %v5273_v7, %v3186_v26 }
0x1be5   :  { %v5275_v1 = vpop.eup %5274  ;;  %v3215_v59 = vmul.f32 0.03125, %v3210_v10 }
0x1be6   :  { %v3227_v30 = vmul.f32 %v5275_v1, %v3187_v28  ;;  %v3235_v11 = vmul.f32 %v3234_v20, %v3226_v27 }
0x1be7   :  { %v3220_v53 = vadd.f32 1e-05, %v3215_v59 }
0x1be8   :  { %v3236_v40 = vmul.f32 %v3234_v20, %v3227_v30  ;;  %v3244_v58 = vadd.f32 %v3243_v62, %v3235_v11 }
0x1be9   :  { %5280 = vrsqrt.f32 %v3220_v53 }
0x1bea   :  { %v3245_v14 = vadd.f32 %v3243_v62, %v3236_v40  ;;  %v3282_v40 = vld [vmem:[#allocation2 + $0x728] sm:$0xff] }
0x1beb   :  { %v5277_v18 = vpop.eup %5276 }
0x1bec   :  { %v3273_v38 = vpack.c.bf16 %v3245_v14, %v3244_v58  ;;  %v3228_v21 = vmul.f32 %v5277_v18, %v3188_v36  ;;  %v3254_v36 = vld [vmem:[#allocation2 + $0x6a0] sm:$0xff]  ;;  %v3280_v58 = vld [vmem:[#allocation2 + $0x718] sm:$0xff]  ;;  %v3283_v18 = vld [vmem:[#allocation2 + $0x730] sm:$0xff] }
0x1bed   :  { %v5279_v63 = vpop.eup %5278  ;;  %v3267_v5 = vpack.c.bf16 %v3254_v36, %v3253_v52 }
0x1bee   :  { %4829 = vmatprep.subr.bf16.mxu1 %v3273_v38  ;;  %v3229_v12 = vmul.f32 %v5279_v63, %v3189_v42  ;;  %v3237_v31 = vmul.f32 %v3234_v20, %v3228_v21  ;;  %v3281_v63 = vld [vmem:[#allocation2 + $0x720] sm:$0xff] }
0x1bef   :  { %4830 = vmatpush3.bf16.msra.mxu1 %v3273_v38 }
0x1bf0   :  { %v3238_v26 = vmul.f32 %v3234_v20, %v3229_v12  ;;  %v3246_v19 = vadd.f32 %v3243_v62, %v3237_v31 }
0x1bf2   :  { %v3247_v8 = vadd.f32 %v3243_v62, %v3238_v26 }
0x1bf3   :  { %v5281_v28 = vpop.eup %5280 }
0x1bf4   :  { %v3274_v24 = vpack.c.bf16 %v3247_v8, %v3246_v19  ;;  %v3230_v35 = vmul.f32 %v5281_v28, %v3190_v47  ;;  %v3257_v47 = vld [vmem:[#allocation2 + $0x6b8] sm:$0xff] }
0x1bf5   :  { %v3269_v37 = vpack.c.bf16 %v3258_v15, %v3257_v47 }
0x1bf6   :  { %4831 = vmatprep.subr.bf16.mxu1 %v3274_v24  ;;  %v3239_v41 = vmul.f32 %v3234_v20, %v3230_v35  ;;  %v3277_v20 = vld [vmem:[#allocation2 + $0x700] sm:$0xff] }
0x1bf7   :  { %4832 = vmatpush3.bf16.msra.mxu1 %v3274_v24 }
0x1bf8   :  { %v3248_v32 = vadd.f32 %v3243_v62, %v3239_v41 }
0x1bfa   :  { %v3275_v49 = vpack.c.bf16 %v3248_v32, %v3248_v32  ;;  %v3286_v32 = vld [vmem:[#allocation2 + $0x748] sm:$0xff] }
0x1bfc   :  { %5056 = vmatprep.subr.msk.bf16.mxu1 %vm2624_vm7, %v3275_v49  ;;  %v3317_v42 = vsel %vm2624_vm7, %v3275_v49, 0 }
0x1bfd   :  { %4834 = vmatpush3.bf16.msra.mxu1 %v3317_v42 }
0x1bfe   :  { %4879 = vmatprep.subr.bf16.mxu1 %v5371_v0 }
0x1c00   :  { %4836 = vmatmul.mubr.msk.bf16.vlgmr.msra.gmra.mrb[88].mxu1 %vm356_vm10, %v3266_v50 }
0x1c01   :  { %4839 = vmatprep.mubr.msk.bf16.mxu1 %vm356_vm10, %v3267_v5 }
0x1c08   :  { %4840 = vmatmul.mubr.msk.bf16.gmra.mrb[92].mxu1 %vm356_vm10, %v3268_v33 }
0x1c09   :  { %4843 = vmatprep.mubr.msk.bf16.mxu1 %vm356_vm10, %v3269_v37 }
0x1c10   :  { %4844 = vmatmul.mubr.msk.bf16.gmra.mrb[96].mxu1 %vm356_vm10, %v3270_v56 }
0x1c11   :  { %4847 = vmatprep.mubr.msk.bf16.mxu1 %vm356_vm10, %v3271_v3 }
0x1c18   :  { %4848 = vmatmul.mubr.msk.bf16.gmra.mrb[100].mxu1 %vm356_vm10, %v3272_v54 }
0x1c19   :  { %4883 = vmatprep.mubr.msk.bf16.mxu1 %vm5372_vm0, %v5371_v0 }
0x1cd3   :  { %v4837_v39 = vpop.f32.mrb[88].mxu1 }
0x1cd4   :  { %v3362_v2 = vadd.f32 %v4837_v39, %v3278_v57  ;;  %v3353_v9 = vpop.f32.mrb[89].mxu1 }
0x1cd5   :  { %v3354_v7 = vadd.f32 %v3353_v9, %v3276_v61  ;;  %v4838_v10 = vpop.f32.mrb[90].mxu1 }
0x1cd6   :  { %v3434_v27 = vmul.f32 0.70710677, %v3362_v2  ;;  %v3365_v1 = vadd.f32 %v4838_v10, %v3279_v4  ;;  %v3356_v59 = vpop.f32.mrb[91].mxu1  ;;  %v3418_v15 = vmul.f32 0.5, %v3362_v2 }
0x1cd7   :  { %v3432_v30 = vmul.f32 0.70710677, %v3354_v7  ;;  %v3357_v11 = vadd.f32 %v3356_v59, %v3277_v20  ;;  %v3416_v25 = vmul.f32 0.5, %v3354_v7 }
0x1cd8   :  { %5282 = verf.f32 %v3434_v27  ;;  %v3435_v62 = vmul.f32 0.70710677, %v3365_v1  ;;  %v3419_v33 = vmul.f32 0.5, %v3365_v1  ;;  %v3290_v27 = vld [vmem:[#allocation2 + $0x768] sm:$0xff] }
0x1cd9   :  { %5284 = verf.f32 %v3432_v30  ;;  %v3433_v53 = vmul.f32 0.70710677, %v3357_v11  ;;  %v3417_v56 = vmul.f32 0.5, %v3357_v11  ;;  %v3288_v30 = vld [vmem:[#allocation2 + $0x758] sm:$0xff] }
0x1cda   :  { %5286 = verf.f32 %v3435_v62 }
0x1cdb   :  { %5288 = verf.f32 %v3433_v53  ;;  %v4841_v14 = vpop.f32.mrb[92].mxu1 }
0x1cdc   :  { %v6023_v38 = vadd.f32 %v4841_v14, %v3282_v40  ;;  %v3369_v21 = vpop.f32.mrb[93].mxu1 }
0x1cdd   :  { %v6025_v12 = vadd.f32 %v3369_v21, %v3280_v58  ;;  %v4842_v31 = vpop.f32.mrb[94].mxu1  ;;  %v3291_v21 = vld [vmem:[#allocation2 + $0x770] sm:$0xff] }
0x1cde   :  { %v3438_v26 = vmul.f32 0.70710677, %v6023_v38  ;;  %v3381_v19 = vadd.f32 %v4842_v31, %v3283_v18  ;;  %v3372_v8 = vpop.f32.mrb[95].mxu1  ;;  %v3422_v31 = vmul.f32 0.5, %v6023_v38 }
0x1cdf   :  { %v3436_v28 = vmul.f32 0.70710677, %v6025_v12  ;;  %v6029_v24 = vadd.f32 %v3372_v8, %v3281_v63 }
0x1ce0   :  { %5290 = verf.f32 %v3438_v26  ;;  %v3439_v35 = vmul.f32 0.70710677, %v3381_v19  ;;  %v3423_v26 = vmul.f32 0.5, %v3381_v19 }
0x1ce1   :  { %5292 = verf.f32 %v3436_v28  ;;  %v3437_v41 = vmul.f32 0.70710677, %v6029_v24 }
0x1ce2   :  { %v5283_v34 = vpop.eup %5282  ;;  %5294 = verf.f32 %v3439_v35 }
0x1ce3   :  { %v5285_v49 = vpop.eup %5284  ;;  %v3466_v52 = vadd.f32 1.0, %v5283_v34  ;;  %5296 = verf.f32 %v3437_v41  ;;  %v4845_v36 = vpop.f32.mrb[96].mxu1  ;;  %v3289_v41 = vld [vmem:[#allocation2 + $0x760] sm:$0xff]  ;;  %v3421_v34 = vmul.f32 0.5, %v6029_v24 }
0x1ce4   :  { %v5287_v42 = vpop.eup %5286  ;;  %v3464_v50 = vadd.f32 1.0, %v5285_v49  ;;  %v6032_v5 = vadd.f32 %v4845_v36, %v3286_v32  ;;  %v3385_v16 = vpop.f32.mrb[97].mxu1  ;;  %v3420_v32 = vmul.f32 0.5, %v6025_v12 }
0x1ce5   :  { %v5289_v47 = vpop.eup %5288  ;;  %v3467_v37 = vadd.f32 1.0, %v5287_v42  ;;  %v6034_v29 = vadd.f32 %v3385_v16, %v3284_v45  ;;  %v4846_v48 = vpop.f32.mrb[98].mxu1  ;;  %v3482_v54 = vmul.f32 %v3466_v52, %v3418_v15 }
0x1ce6   :  { %v3465_v3 = vadd.f32 1.0, %v5289_v47  ;;  %v3442_v51 = vmul.f32 0.70710677, %v6032_v5  ;;  %v3388_v17 = vpop.f32.mrb[99].mxu1  ;;  %v3397_v39 = vadd.f32 %v4846_v48, %v3287_v43  ;;  %v3480_v4 = vmul.f32 %v3464_v50, %v3416_v25 }
0x1ce7   :  { %v3483_v57 = vmul.f32 %v3467_v37, %v3419_v33  ;;  %v3440_v61 = vmul.f32 0.70710677, %v6034_v29  ;;  %v3389_v2 = vadd.f32 %v3388_v17, %v3285_v60 }
0x1ce8   :  { %v3481_v9 = vmul.f32 %v3465_v3, %v3417_v56  ;;  %5298 = verf.f32 %v3442_v51  ;;  %v3443_v10 = vmul.f32 0.70710677, %v3397_v39  ;;  %v3426_v3 = vmul.f32 0.5, %v6032_v5 }
0x1ce9   :  { %v3505_v20 = vpack.c.bf16 %v3483_v57, %v3482_v54  ;;  %5300 = verf.f32 %v3440_v61  ;;  %v3441_v59 = vmul.f32 0.70710677, %v3389_v2  ;;  %v3427_v51 = vmul.f32 0.5, %v3397_v39 }
0x1cea   :  { %v5291_v1 = vpop.eup %5290  ;;  %v3504_v7 = vpack.c.bf16 %v3481_v9, %v3480_v4  ;;  %5302 = verf.f32 %v3443_v10  ;;  %v3424_v54 = vmul.f32 0.5, %v6034_v29  ;;  %v3425_v57 = vmul.f32 0.5, %v3389_v2 }
0x1ceb   :  { %v5293_v11 = vpop.eup %5292  ;;  %v3470_v62 = vadd.f32 1.0, %v5291_v1  ;;  %v4849_v53 = vpop.f32.mrb[100].mxu1  ;;  %5304 = verf.f32 %v3441_v59 }
0x1cec   :  { %v5295_v40 = vpop.eup %5294  ;;  %v3468_v58 = vadd.f32 1.0, %v5293_v11  ;;  %v3410_v14 = vadd.f32 %v4849_v53, %v3290_v27  ;;  %v3401_v18 = vpop.f32.mrb[101].mxu1  ;;  %4852 = vmatpush3.bf16.msra.mxu0 %v3504_v7 }
0x1ced   :  { %v5297_v63 = vpop.eup %5296  ;;  %v3471_v8 = vadd.f32 1.0, %v5295_v40  ;;  %v3402_v28 = vadd.f32 %v3401_v18, %v3288_v30  ;;  %v4850_v35 = vpop.f32.mrb[102].mxu1  ;;  %4853 = vmatprep.subr.bf16.mxu0 %v5371_v0  ;;  %v3486_v36 = vmul.f32 %v3470_v62, %v3422_v31 }
0x1cee   :  { %v3469_v45 = vadd.f32 1.0, %v5297_v63  ;;  %v3446_v49 = vmul.f32 0.70710677, %v3410_v14  ;;  %v3404_v52 = vpop.f32.mrb[103].mxu1  ;;  %v3413_v16 = vadd.f32 %v4850_v35, %v3291_v21  ;;  %v3484_v43 = vmul.f32 %v3468_v58, %v3420_v32  ;;  %v3496_v35 = vld [vmem:[#allocation2 + $0x778] sm:$0xff]  ;;  %v3499_v32 = vld [vmem:[#allocation2 + $0x790] sm:$0xff] }
0x1cef   :  { %v3487_v42 = vmul.f32 %v3471_v8, %v3423_v26  ;;  %v3444_v50 = vmul.f32 0.70710677, %v3402_v28  ;;  %v3405_v19 = vadd.f32 %v3404_v52, %v3289_v41  ;;  %v3430_v62 = vmul.f32 0.5, %v3410_v14  ;;  %v3497_v41 = vld [vmem:[#allocation2 + $0x780] sm:$0xff] }
0x1cf0   :  { %v3485_v38 = vmul.f32 %v3469_v45, %v3421_v34  ;;  %5306 = verf.f32 %v3446_v49  ;;  %4854 = vmatpush3.bf16.msra.mxu0 %v3505_v20  ;;  %v3447_v15 = vmul.f32 0.70710677, %v3413_v16  ;;  %v3431_v29 = vmul.f32 0.5, %v3413_v16  ;;  %v3500_v45 = vld [vmem:[#allocation2 + $0x798] sm:$0x3]  ;;  %v3512_v52 = vld [vmem:[#allocation2 + $0x7a0] sm:$0xff] }
0x1cf1   :  { %v3507_v47 = vpack.c.bf16 %v3487_v42, %v3486_v36  ;;  %5308 = verf.f32 %v3444_v50  ;;  %4855 = vmatprep.subr.bf16.mxu0 %v5371_v0  ;;  %v3445_v24 = vmul.f32 0.70710677, %v3405_v19  ;;  %v3428_v53 = vmul.f32 0.5, %v3402_v28  ;;  %v3498_v28 = vld [vmem:[#allocation2 + $0x788] sm:$0xff] }
0x1cf2   :  { %v5299_v12 = vpop.eup %5298  ;;  %v3506_v33 = vpack.c.bf16 %v3485_v38, %v3484_v43  ;;  %5310 = verf.f32 %v3447_v15  ;;  %v3429_v40 = vmul.f32 0.5, %v3405_v19  ;;  %v3501_v14 = vpack.c.bf16 %v3497_v41, %v3496_v35  ;;  %v3513_v42 = vld [vmem:[#allocation2 + $0x7a8] sm:$0xff] }
0x1cf3   :  { %v5301_v37 = vpop.eup %5300  ;;  %v3474_v48 = vadd.f32 1.0, %v5299_v12  ;;  %5312 = verf.f32 %v3445_v24  ;;  %v3502_v34 = vpack.c.bf16 %v3499_v32, %v3498_v28  ;;  %v3503_v49 = vpack.c.bf16 %v3500_v45, %v3500_v45  ;;  %v3662_v32 = vld [vmem:[#allocation2 + $0x7d0] sm:$0xff] }
0x1cf4   :  { %4856 = vmatpush3.bf16.msra.mxu0 %v3506_v33  ;;  %v5303_v60 = vpop.eup %5302  ;;  %v3472_v25 = vadd.f32 1.0, %v5301_v37  ;;  %v3514_v33 = vld [vmem:[#allocation2 + $0x7b0] sm:$0xff] }
0x1cf5   :  { %4857 = vmatprep.subr.bf16.mxu0 %v5371_v0  ;;  %v5305_v56 = vpop.eup %5304  ;;  %v3475_v17 = vadd.f32 1.0, %v5303_v60  ;;  %v3490_v4 = vmul.f32 %v3474_v48, %v3426_v3  ;;  %v3515_v48 = vld [vmem:[#allocation2 + $0x7b8] sm:$0xff] }
0x1cf6   :  { %v3473_v61 = vadd.f32 1.0, %v5305_v56  ;;  %v3488_v20 = vmul.f32 %v3472_v25, %v3424_v54  ;;  %v3516_v54 = vld [vmem:[#allocation2 + $0x7c0] sm:$0x3] }
0x1cf7   :  { %v3491_v9 = vmul.f32 %v3475_v17, %v3427_v51 }
0x1cf8   :  { %4858 = vmatpush3.bf16.msra.mxu0 %v3507_v47  ;;  %v3489_v10 = vmul.f32 %v3473_v61, %v3425_v57 }
0x1cf9   :  { %4859 = vmatprep.subr.bf16.mxu0 %v5371_v0  ;;  %v3509_v1 = vpack.c.bf16 %v3491_v9, %v3490_v4 }
0x1cfa   :  { %v5307_v27 = vpop.eup %5306  ;;  %v3508_v59 = vpack.c.bf16 %v3489_v10, %v3488_v20 }
0x1cfb   :  { %v5309_v7 = vpop.eup %5308  ;;  %v3478_v30 = vadd.f32 1.0, %v5307_v27 }
0x1cfc   :  { %v5311_v11 = vpop.eup %5310  ;;  %v3476_v5 = vadd.f32 1.0, %v5309_v7  ;;  %4860 = vmatpush3.bf16.msra.mxu0 %v3508_v59 }
0x1cfd   :  { %v5313_v39 = vpop.eup %5312  ;;  %v3479_v2 = vadd.f32 1.0, %v5311_v11  ;;  %4861 = vmatprep.subr.bf16.mxu0 %v5371_v0  ;;  %v3494_v18 = vmul.f32 %v3478_v30, %v3430_v62 }
0x1cfe   :  { %v3477_v58 = vadd.f32 1.0, %v5313_v39  ;;  %v3492_v63 = vmul.f32 %v3476_v5, %v3428_v53 }
0x1cff   :  { %v3495_v21 = vmul.f32 %v3479_v2, %v3431_v29 }
0x1d00   :  { %v3493_v31 = vmul.f32 %v3477_v58, %v3429_v40  ;;  %4862 = vmatpush3.bf16.msra.mxu0 %v3509_v1 }
0x1d01   :  { %v3511_v26 = vpack.c.bf16 %v3495_v21, %v3494_v18  ;;  %4863 = vmatprep.subr.bf16.mxu0 %v5371_v0 }
0x1d02   :  { %v3510_v8 = vpack.c.bf16 %v3493_v31, %v3492_v63 }
0x1d04   :  { %4864 = vmatpush3.bf16.msra.mxu0 %v3510_v8 }
0x1d05   :  { %4865 = vmatprep.subr.bf16.mxu0 %v5371_v0 }
0x1d08   :  { %4866 = vmatpush3.bf16.msra.mxu0 %v3511_v26 }
0x1d09   :  { %4895 = vmatprep.subr.bf16.mxu0 %v5371_v0 }
0x1d0b   :  { %4868 = vmatmul.mubr.bf16.vlgmr.msra.gmra.mrb[92].mxu0 %v3501_v14 }
0x1d0c   :  { %4871 = vmatprep.mubr.msk.bf16.mxu0 %vm5372_vm0, %v5371_v0 }
0x1d13   :  { %4872 = vmatmul.mubr.bf16.gmra.mrb[96].mxu0 %v3502_v34  ;;  %v3663_v34 = vld [vmem:[#allocation2 + $0x7d8] sm:$0xff] }
0x1d14   :  { %4875 = vmatprep.mubr.msk.bf16.mxu0 %vm5372_vm0, %v5371_v0  ;;  %v3669_v45 = vpack.c.bf16 %v3663_v34, %v3662_v32  ;;  %v3772_v32 = vld [vmem:[#allocation2 + $0x828] sm:$0xff]  ;;  %v3773_v34 = vld [vmem:[#allocation2 + $0x830] sm:$0xff] }
0x1d16   :  { %4880 = vmatpush3.bf16.msra.mxu1 %v3669_v45  ;;  %v3780_v45 = vpack.c.bf16 %v3773_v34, %v3772_v32 }
0x1d17   :  { %4881 = vmatprep.subr.bf16.mxu1 %v5371_v0 }
0x1d1b   :  { %4876 = vmatmul.mubr.bf16.gmra.mrb[100].mxu0 %v3503_v49  ;;  %v3664_v49 = vld [vmem:[#allocation2 + $0x7e0] sm:$0xff] }
0x1d1c   :  { %4903 = vmatprep.mubr.msk.bf16.mxu0 %vm5372_vm0, %v5371_v0 }
0x1dde   :  { %v3551_v36 = vpop.f32.mrb[92].mxu0 }
0x1ddf   :  { %v3552_v50 = vadd.f32 %v3551_v36, %v3512_v52  ;;  %v4869_v16 = vpop.f32.mrb[93].mxu0  ;;  %v3665_v52 = vld [vmem:[#allocation2 + $0x7e8] sm:$0xff] }
0x1de0   :  { %v3554_v43 = vpop.f32.mrb[94].mxu0  ;;  %v3670_v36 = vpack.c.bf16 %v3665_v52, %v3664_v49  ;;  %v4154_v49 = vld [vmem:[#allocation2 + $0x7f0] ss:$0 sm:$0xff] }
0x1de1   :  { %v6058_v38 = vadd.f32 %v3552_v50, %v5974_v6  ;;  %v3555_v19 = vadd.f32 %v3554_v43, %v3513_v42  ;;  %v4870_v47 = vpop.f32.mrb[95].mxu0 }
0x1de2   :  { %4882 = vmatpush3.bf16.msra.mxu1 %v3670_v36 }
0x1de3   :  { %v6061_v15 = vadd.f32 %v3555_v19, %v5977_v44  ;;  %v3579_v12 = vsel %vm238_vm8, %v6058_v38, 0.0  ;;  %4915 = vmatprep.subr.bf16.mxu1 %v5371_v0 }
0x1de4   :  { %3580 = vadd.xlane.f32.xlu1 %v3579_v12 }
0x1de5   :  { %v3582_v24 = vsel %vm238_vm8, %v6061_v15, 0.0 }
0x1de6   :  { %3583 = vadd.xlane.f32.xlu0 %v3582_v24  ;;  %v3559_v37 = vpop.f32.mrb[96].mxu0 }
0x1de7   :  { %v3560_v60 = vadd.f32 %v3559_v37, %v3514_v33  ;;  %v4873_v25 = vpop.f32.mrb[97].mxu0  ;;  %v3573_v37 = vld [vmem:[#allocation2 + $0x7c8] sm:$0x3] }
0x1de8   :  { %v3562_v6 = vpop.f32.mrb[98].mxu0 }
0x1de9   :  { %v6068_v56 = vadd.f32 %v3560_v60, %v5984_v23  ;;  %v3563_v3 = vadd.f32 %v3562_v6, %v3515_v48  ;;  %v4874_v44 = vpop.f32.mrb[99].mxu0  ;;  %v3647_v6 = vrot.slane %v3573_v37, %v5473_v46 }
0x1deb   :  { %v6071_v51 = vadd.f32 %v3563_v3, %v5987_v13  ;;  %v3585_v17 = vsel %vm238_vm8, %v6068_v56, 0.0 }
0x1dec   :  { %3586 = vadd.xlane.f32.xlu1 %v3585_v17 }
0x1ded   :  { %v3588_v57 = vsel %vm238_vm8, %v6071_v51, 0.0 }
0x1dee   :  { %3589 = vadd.xlane.f32.xlu0 %v3588_v57  ;;  %v3567_v61 = vpop.f32.mrb[100].mxu0 }
0x1def   :  { %v3568_v4 = vadd.f32 %v3567_v61, %v3516_v54  ;;  %v4877_v9 = vpop.f32.mrb[101].mxu0  ;;  %v3656_v61 = vrot.slane %v3573_v37, %v5476_v55 }
0x1df0   :  { %v3570_v20 = vpop.f32.mrb[102].mxu0 }
0x1df1   :  { %v6078_v23 = vadd.f32 %v3568_v4, %v5994_v22  ;;  %v4878_v10 = vpop.f32.mrb[103].mxu0 }
0x1df3   :  { %v3591_v13 = vsel %vm251_vm9, %v6078_v23, 0.0 }
0x1df4   :  { %3592 = vadd.xlane.f32.xlu1 %v3591_v13 }
0x1e71   :  { %v3581_v27 = vpop.xlane.xlu1 %3580 }
0x1e72   :  { %v3594_v1 = vmul.f32 0.03125, %v3581_v27 }
0x1e73   :  { %v3584_v7 = vpop.xlane.xlu0 %3583 }
0x1e74   :  { %v3599_v59 = vsub.f32 %v6058_v38, %v3594_v1  ;;  %v3595_v30 = vmul.f32 0.03125, %v3584_v7 }
0x1e76   :  { %v3600_v11 = vsub.f32 %v6061_v15, %v3595_v30  ;;  %v3604_v5 = vmul.f32 %v3599_v59, %v3599_v59 }
0x1e78   :  { %v3609_v39 = vsel %vm238_vm8, %v3604_v5, 0.0  ;;  %v3605_v62 = vmul.f32 %v3600_v11, %v3600_v11 }
0x1e79   :  { %v3587_v29 = vpop.xlane.xlu1 %3586  ;;  %3610 = vadd.xlane.f32.xlu0 %v3609_v39 }
0x1e7a   :  { %v3596_v22 = vmul.f32 0.03125, %v3587_v29  ;;  %v3612_v2 = vsel %vm238_vm8, %v3605_v62, 0.0 }
0x1e7b   :  { %v3590_v53 = vpop.xlane.xlu0 %3589  ;;  %3613 = vadd.xlane.f32.xlu1 %v3612_v2 }
0x1e7c   :  { %v3601_v40 = vsub.f32 %v6068_v56, %v3596_v22  ;;  %v3597_v58 = vmul.f32 0.03125, %v3590_v53 }
0x1e7e   :  { %v3602_v18 = vsub.f32 %v6071_v51, %v3597_v58  ;;  %v3606_v21 = vmul.f32 %v3601_v40, %v3601_v40 }
0x1e80   :  { %v3615_v63 = vsel %vm238_vm8, %v3606_v21, 0.0  ;;  %v3607_v31 = vmul.f32 %v3602_v18, %v3602_v18  ;;  %v3766_v21 = vld [vmem:[#allocation2 + $0x7f8] sm:$0xff] }
0x1e81   :  { %3616 = vadd.xlane.f32.xlu0 %v3615_v63  ;;  %v3593_v26 = vpop.xlane.xlu1 %3592  ;;  %v3767_v63 = vld [vmem:[#allocation2 + $0x800] sm:$0xff] }
0x1e82   :  { %v3598_v8 = vmul.f32 0.03125, %v3593_v26  ;;  %v3618_v35 = vsel %vm238_vm8, %v3607_v31, 0.0  ;;  %v3777_v31 = vpack.c.bf16 %v3767_v63, %v3766_v21  ;;  %v3768_v26 = vld [vmem:[#allocation2 + $0x808] sm:$0xff] }
0x1e83   :  { %3619 = vadd.xlane.f32.xlu1 %v3618_v35 }
0x1e84   :  { %v3603_v41 = vsub.f32 %v6078_v23, %v3598_v8  ;;  %4896 = vmatpush3.bf16.msra.mxu0 %v3777_v31  ;;  %v3769_v8 = vld [vmem:[#allocation2 + $0x810] sm:$0xff]  ;;  %v4158_v31 = vld [vmem:[#allocation2 + $0x838] ss:$0 sm:$0xff] }
0x1e85   :  { %4897 = vmatprep.subr.bf16.mxu0 %v5371_v0  ;;  %v3778_v35 = vpack.c.bf16 %v3769_v8, %v3768_v26 }
0x1e86   :  { %v3608_v14 = vmul.f32 %v3603_v41, %v3603_v41 }
0x1e88   :  { %v3621_v28 = vsel %vm251_vm9, %v3608_v14, 0.0  ;;  %4898 = vmatpush3.bf16.msra.mxu0 %v3778_v35  ;;  %v3771_v14 = vld [vmem:[#allocation2 + $0x820] sm:$0xff] }
0x1e89   :  { %3622 = vadd.xlane.f32.xlu0 %v3621_v28  ;;  %4899 = vmatprep.subr.bf16.mxu0 %v5371_v0 }
0x1f06   :  { %v3611_v42 = vpop.xlane.xlu0 %3610 }
0x1f07   :  { %v3624_v50 = vmul.f32 0.03125, %v3611_v42 }
0x1f08   :  { %v3614_v16 = vpop.xlane.xlu1 %3613 }
0x1f09   :  { %v3629_v43 = vadd.f32 1e-05, %v3624_v50  ;;  %v3625_v19 = vmul.f32 0.03125, %v3614_v16 }
0x1f0b   :  { %5314 = vrsqrt.f32 %v3629_v43  ;;  %v3630_v47 = vadd.f32 1e-05, %v3625_v19 }
0x1f0d   :  { %5316 = vrsqrt.f32 %v3630_v47 }
0x1f0e   :  { %v3617_v12 = vpop.xlane.xlu0 %3616 }
0x1f0f   :  { %v3626_v33 = vmul.f32 0.03125, %v3617_v12 }
0x1f10   :  { %v3620_v24 = vpop.xlane.xlu1 %3619 }
0x1f11   :  { %v3631_v48 = vadd.f32 1e-05, %v3626_v33  ;;  %v3627_v60 = vmul.f32 0.03125, %v3620_v24 }
0x1f13   :  { %5318 = vrsqrt.f32 %v3631_v48  ;;  %v3632_v25 = vadd.f32 1e-05, %v3627_v60 }
0x1f15   :  { %v5315_v3 = vpop.eup %5314  ;;  %5320 = vrsqrt.f32 %v3632_v25 }
0x1f16   :  { %v3639_v44 = vmul.f32 %v5315_v3, %v3599_v59  ;;  %v3623_v17 = vpop.xlane.xlu0 %3622 }
0x1f17   :  { %v5317_v54 = vpop.eup %5316  ;;  %v3628_v57 = vmul.f32 0.03125, %v3623_v17 }
0x1f18   :  { %v3648_v4 = vmul.f32 %v3647_v6, %v3639_v44  ;;  %v3640_v9 = vmul.f32 %v5317_v54, %v3600_v11 }
0x1f19   :  { %v3633_v20 = vadd.f32 1e-05, %v3628_v57 }
0x1f1a   :  { %v3649_v10 = vmul.f32 %v3647_v6, %v3640_v9  ;;  %v3657_v13 = vadd.f32 %v3656_v61, %v3648_v4 }
0x1f1b   :  { %5322 = vrsqrt.f32 %v3633_v20 }
0x1f1c   :  { %v3658_v27 = vadd.f32 %v3656_v61, %v3649_v10 }
0x1f1d   :  { %v5319_v1 = vpop.eup %5318 }
0x1f1e   :  { %v3641_v7 = vmul.f32 %v5319_v1, %v3601_v40  ;;  %v3666_v30 = vpack.c.bf16 %v3658_v27, %v3657_v13 }
0x1f1f   :  { %v5321_v5 = vpop.eup %5320 }
0x1f20   :  { %v3642_v39 = vmul.f32 %v5321_v5, %v3602_v18  ;;  %4884 = vmatmul.mubr.msk.bf16.vlgmr.msra.gmra.mrb[104].mxu1 %vm238_vm8, %v3666_v30  ;;  %v3650_v59 = vmul.f32 %v3647_v6, %v3641_v7 }
0x1f21   :  { %4887 = vmatprep.mubr.msk.bf16.mxu1 %vm5372_vm0, %v5371_v0 }
0x1f22   :  { %v3651_v62 = vmul.f32 %v3647_v6, %v3642_v39  ;;  %v3659_v29 = vadd.f32 %v3656_v61, %v3650_v59 }
0x1f24   :  { %v3660_v22 = vadd.f32 %v3656_v61, %v3651_v62 }
0x1f25   :  { %v5323_v11 = vpop.eup %5322 }
0x1f26   :  { %v3667_v2 = vpack.c.bf16 %v3660_v22, %v3659_v29  ;;  %v3643_v53 = vmul.f32 %v5323_v11, %v3603_v41  ;;  %v3770_v41 = vld [vmem:[#allocation2 + $0x818] sm:$0xff] }
0x1f27   :  { %v3779_v28 = vpack.c.bf16 %v3771_v14, %v3770_v41 }
0x1f28   :  { %4888 = vmatmul.mubr.msk.bf16.gmra.mrb[108].mxu1 %vm238_vm8, %v3667_v2  ;;  %v3652_v58 = vmul.f32 %v3647_v6, %v3643_v53 }
0x1f29   :  { %4891 = vmatprep.mubr.msk.bf16.mxu1 %vm5372_vm0, %v5371_v0  ;;  %4900 = vmatpush3.bf16.msra.mxu0 %v3779_v28 }
0x1f2a   :  { %v3661_v40 = vadd.f32 %v3656_v61, %v3652_v58  ;;  %4901 = vmatprep.subr.bf16.mxu0 %v5371_v0 }
0x1f2c   :  { %v3668_v18 = vpack.c.bf16 %v3661_v40, %v3661_v40 }
0x1f2d   :  { %4902 = vmatpush3.bf16.msra.mxu0 %v3780_v45 }
0x1f30   :  { %4892 = vmatmul.mubr.msk.bf16.gmra.mrb[112].mxu1 %vm238_vm8, %v3668_v18 }
0x1f31   :  { %4919 = vmatprep.mubr.msk.bf16.mxu1 %vm5372_vm0, %v5371_v0 }
0x1ff3   :  { %v3719_v52 = vpop.f32.mrb[104].mxu1 }
0x1ff4   :  { %v3720_v36 = vadd.f32 %v4154_v49, %v3719_v52  ;;  %v4885_v42 = vpop.f32.mrb[105].mxu1 }
0x1ff5   :  { %v3722_v50 = vpop.f32.mrb[106].mxu1 }
0x1ff6   :  { %v3746_v16 = vmul.f32 0.70710677, %v3720_v36  ;;  %v3723_v43 = vadd.f32 %v4154_v49, %v3722_v50  ;;  %v4886_v19 = vpop.f32.mrb[107].mxu1  ;;  %v3741_v4 = vmul.f32 0.5, %v3720_v36 }
0x1ff8   :  { %5324 = verf.f32 %v3746_v16  ;;  %v3747_v47 = vmul.f32 0.70710677, %v3723_v43  ;;  %v3742_v9 = vmul.f32 0.5, %v3723_v43 }
0x1ffa   :  { %5326 = verf.f32 %v3747_v47 }
0x1ffb   :  { %v3727_v12 = vpop.f32.mrb[108].mxu1 }
0x1ffc   :  { %v3728_v33 = vadd.f32 %v4154_v49, %v3727_v12  ;;  %v4889_v24 = vpop.f32.mrb[109].mxu1 }
0x1ffd   :  { %v3730_v37 = vpop.f32.mrb[110].mxu1 }
0x1ffe   :  { %v3748_v48 = vmul.f32 0.70710677, %v3728_v33  ;;  %v3731_v60 = vadd.f32 %v4154_v49, %v3730_v37  ;;  %v4890_v25 = vpop.f32.mrb[111].mxu1  ;;  %v3743_v62 = vmul.f32 0.5, %v3728_v33 }
0x2000   :  { %5328 = verf.f32 %v3748_v48  ;;  %v3749_v6 = vmul.f32 0.70710677, %v3731_v60  ;;  %v3744_v29 = vmul.f32 0.5, %v3731_v60 }
0x2002   :  { %v5325_v3 = vpop.eup %5324  ;;  %5330 = verf.f32 %v3749_v6 }
0x2003   :  { %v3756_v44 = vadd.f32 1.0, %v5325_v3  ;;  %v3735_v17 = vpop.f32.mrb[112].mxu1 }
0x2004   :  { %v5327_v54 = vpop.eup %5326  ;;  %v3736_v57 = vadd.f32 %v4154_v49, %v3735_v17  ;;  %v4893_v61 = vpop.f32.mrb[113].mxu1 }
0x2005   :  { %v3757_v20 = vadd.f32 1.0, %v5327_v54  ;;  %v3738_v10 = vpop.f32.mrb[114].mxu1  ;;  %v3761_v1 = vmul.f32 %v3756_v44, %v3741_v4 }
0x2006   :  { %v3750_v13 = vmul.f32 0.70710677, %v3736_v57  ;;  %v4894_v27 = vpop.f32.mrb[115].mxu1  ;;  %v3745_v40 = vmul.f32 0.5, %v3736_v57 }
0x2007   :  { %v3762_v7 = vmul.f32 %v3757_v20, %v3742_v9 }
0x2008   :  { %5332 = verf.f32 %v3750_v13 }
0x2009   :  { %v3774_v30 = vpack.c.bf16 %v3762_v7, %v3761_v1 }
0x200a   :  { %v5329_v5 = vpop.eup %5328 }
0x200b   :  { %v3758_v39 = vadd.f32 1.0, %v5329_v5  ;;  %4904 = vmatmul.mubr.msk.bf16.vlgmr.msra.gmra.mrb[104].mxu0 %vm974_vm11, %v3774_v30 }
0x200c   :  { %v5331_v59 = vpop.eup %5330  ;;  %4907 = vmatprep.mubr.msk.bf16.mxu0 %vm5372_vm0, %v5371_v0 }
0x200d   :  { %v3759_v22 = vadd.f32 1.0, %v5331_v59  ;;  %v3763_v11 = vmul.f32 %v3758_v39, %v3743_v62 }
0x200f   :  { %v3764_v2 = vmul.f32 %v3759_v22, %v3744_v29 }
0x2011   :  { %v3775_v53 = vpack.c.bf16 %v3764_v2, %v3763_v11  ;;  %v3940_v11 = vld [vmem:[#allocation2 + $0x848] sm:$0xff]  ;;  %v3941_v2 = vld [vmem:[#allocation2 + $0x850] sm:$0xff] }
0x2012   :  { %v5333_v58 = vpop.eup %5332 }
0x2013   :  { %v3760_v18 = vadd.f32 1.0, %v5333_v58  ;;  %4908 = vmatmul.mubr.msk.bf16.gmra.mrb[108].mxu0 %vm974_vm11, %v3775_v53  ;;  %v3947_v53 = vpack.c.bf16 %v3941_v2, %v3940_v11  ;;  %v3942_v58 = vld [vmem:[#allocation2 + $0x858] sm:$0xff] }
0x2014   :  { %4911 = vmatprep.mubr.msk.bf16.mxu0 %vm5372_vm0, %v5371_v0 }
0x2015   :  { %v3765_v21 = vmul.f32 %v3760_v18, %v3745_v40  ;;  %4916 = vmatpush3.bf16.msra.mxu1 %v3947_v53  ;;  %v3943_v40 = vld [vmem:[#allocation2 + $0x860] sm:$0xff] }
0x2016   :  { %4917 = vmatprep.subr.bf16.mxu1 %v5371_v0  ;;  %v3948_v18 = vpack.c.bf16 %v3943_v40, %v3942_v58 }
0x2017   :  { %v3776_v63 = vpack.c.bf16 %v3765_v21, %v3765_v21 }
0x2019   :  { %4918 = vmatpush3.bf16.msra.mxu1 %v3948_v18 }
0x201b   :  { %4912 = vmatmul.mubr.msk.bf16.gmra.mrb[112].mxu0 %vm974_vm11, %v3776_v63 }
0x20de   :  { %v3829_v26 = vpop.f32.mrb[104].mxu0 }
0x20df   :  { %v3830_v8 = vadd.f32 %v4158_v31, %v3829_v26  ;;  %v4905_v35 = vpop.f32.mrb[105].mxu0 }
0x20e0   :  { %v3832_v41 = vpop.f32.mrb[106].mxu0 }
0x20e1   :  { %v3851_v14 = vadd.f32 %v3830_v8, %v6058_v38  ;;  %v3833_v28 = vadd.f32 %v4158_v31, %v3832_v41  ;;  %v4906_v32 = vpop.f32.mrb[107].mxu0 }
0x20e2   :  { %v3856_v32 = vld [vmem:[#allocation2 + $0x840] sm:$0x3] }
0x20e3   :  { %v3852_v34 = vadd.f32 %v3833_v28, %v6061_v15  ;;  %v3857_v45 = vsel %vm238_vm8, %v3851_v14, 0.0 }
0x20e4   :  { %3858 = vadd.xlane.f32.xlu1 %v3857_v45 }
0x20e5   :  { %v3860_v49 = vsel %vm238_vm8, %v3852_v34, 0.0 }
0x20e6   :  { %3861 = vadd.xlane.f32.xlu0 %v3860_v49  ;;  %v3837_v52 = vpop.f32.mrb[108].mxu0 }
0x20e7   :  { %v3838_v36 = vadd.f32 %v4158_v31, %v3837_v52  ;;  %v4909_v42 = vpop.f32.mrb[109].mxu0  ;;  %v3925_v52 = vrot.slane %v3856_v32, %v5473_v46 }
0x20e8   :  { %v3840_v50 = vpop.f32.mrb[110].mxu0 }
0x20e9   :  { %v3853_v16 = vadd.f32 %v3838_v36, %v6068_v56  ;;  %v3841_v43 = vadd.f32 %v4158_v31, %v3840_v50  ;;  %v4910_v19 = vpop.f32.mrb[111].mxu0 }
0x20ea   :  { %v3934_v19 = vrot.slane %v3856_v32, %v5476_v55 }
0x20eb   :  { %v3854_v38 = vadd.f32 %v3841_v43, %v6071_v51  ;;  %v3863_v47 = vsel %vm238_vm8, %v3853_v16, 0.0 }
0x20ec   :  { %3864 = vadd.xlane.f32.xlu1 %v3863_v47 }
0x20ed   :  { %v3866_v15 = vsel %vm238_vm8, %v3854_v38, 0.0 }
0x20ee   :  { %3867 = vadd.xlane.f32.xlu0 %v3866_v15  ;;  %v3845_v12 = vpop.f32.mrb[112].mxu0 }
0x20ef   :  { %v3846_v33 = vadd.f32 %v4158_v31, %v3845_v12  ;;  %v4913_v24 = vpop.f32.mrb[113].mxu0 }
0x20f0   :  { %v3848_v37 = vpop.f32.mrb[114].mxu0 }
0x20f1   :  { %v3855_v48 = vadd.f32 %v3846_v33, %v6078_v23  ;;  %v4914_v60 = vpop.f32.mrb[115].mxu0 }
0x20f3   :  { %v3869_v25 = vsel %vm251_vm9, %v3855_v48, 0.0 }
0x20f4   :  { %3870 = vadd.xlane.f32.xlu1 %v3869_v25 }
0x2171   :  { %v3859_v56 = vpop.xlane.xlu1 %3858 }
0x2172   :  { %v3872_v6 = vmul.f32 0.03125, %v3859_v56 }
0x2173   :  { %v3862_v3 = vpop.xlane.xlu0 %3861 }
0x2174   :  { %v3877_v51 = vsub.f32 %v3851_v14, %v3872_v6  ;;  %v3873_v44 = vmul.f32 0.03125, %v3862_v3 }
0x2176   :  { %v3878_v17 = vsub.f32 %v3852_v34, %v3873_v44  ;;  %v3882_v54 = vmul.f32 %v3877_v51, %v3877_v51 }
0x2178   :  { %v3887_v57 = vsel %vm238_vm8, %v3882_v54, 0.0  ;;  %v3883_v61 = vmul.f32 %v3878_v17, %v3878_v17 }
0x2179   :  { %v3865_v4 = vpop.xlane.xlu1 %3864  ;;  %3888 = vadd.xlane.f32.xlu0 %v3887_v57 }
0x217a   :  { %v3874_v9 = vmul.f32 0.03125, %v3865_v4  ;;  %v3890_v20 = vsel %vm238_vm8, %v3883_v61, 0.0  ;;  %v4162_v4 = vld [vmem:[#allocation2 + $0x868] ss:$0 sm:$0xff] }
0x217b   :  { %v3868_v23 = vpop.xlane.xlu0 %3867  ;;  %3891 = vadd.xlane.f32.xlu1 %v3890_v20 }
0x217c   :  { %v3879_v10 = vsub.f32 %v3853_v16, %v3874_v9  ;;  %v3875_v13 = vmul.f32 0.03125, %v3868_v23 }
0x217e   :  { %v3880_v27 = vsub.f32 %v3854_v38, %v3875_v13  ;;  %v3884_v1 = vmul.f32 %v3879_v10, %v3879_v10 }
0x2180   :  { %v3893_v7 = vsel %vm238_vm8, %v3884_v1, 0.0  ;;  %v3885_v30 = vmul.f32 %v3880_v27, %v3880_v27 }
0x2181   :  { %3894 = vadd.xlane.f32.xlu0 %v3893_v7  ;;  %v3871_v5 = vpop.xlane.xlu1 %3870 }
0x2182   :  { %v3876_v39 = vmul.f32 0.03125, %v3871_v5  ;;  %v3896_v59 = vsel %vm238_vm8, %v3885_v30, 0.0 }
0x2183   :  { %3897 = vadd.xlane.f32.xlu1 %v3896_v59 }
0x2184   :  { %v3881_v62 = vsub.f32 %v3855_v48, %v3876_v39 }
0x2186   :  { %v3886_v29 = vmul.f32 %v3881_v62, %v3881_v62 }
0x2188   :  { %v3899_v22 = vsel %vm251_vm9, %v3886_v29, 0.0 }
0x2189   :  { %3900 = vadd.xlane.f32.xlu0 %v3899_v22 }
0x2206   :  { %v3889_v21 = vpop.xlane.xlu0 %3888 }
0x2207   :  { %v3902_v63 = vmul.f32 0.03125, %v3889_v21 }
0x2208   :  { %v3892_v31 = vpop.xlane.xlu1 %3891 }
0x2209   :  { %v3907_v26 = vadd.f32 1e-05, %v3902_v63  ;;  %v3903_v8 = vmul.f32 0.03125, %v3892_v31 }
0x220b   :  { %5334 = vrsqrt.f32 %v3907_v26  ;;  %v3908_v35 = vadd.f32 1e-05, %v3903_v8 }
0x220d   :  { %5336 = vrsqrt.f32 %v3908_v35 }
0x220e   :  { %v3895_v41 = vpop.xlane.xlu0 %3894 }
0x220f   :  { %v3904_v14 = vmul.f32 0.03125, %v3895_v41 }
0x2210   :  { %v3898_v28 = vpop.xlane.xlu1 %3897 }
0x2211   :  { %v3909_v34 = vadd.f32 1e-05, %v3904_v14  ;;  %v3905_v45 = vmul.f32 0.03125, %v3898_v28 }
0x2213   :  { %5338 = vrsqrt.f32 %v3909_v34  ;;  %v3910_v49 = vadd.f32 1e-05, %v3905_v45 }
0x2215   :  { %v5335_v36 = vpop.eup %5334  ;;  %5340 = vrsqrt.f32 %v3910_v49 }
0x2216   :  { %v3917_v42 = vmul.f32 %v5335_v36, %v3877_v51  ;;  %v3901_v50 = vpop.xlane.xlu0 %3900 }
0x2217   :  { %v5337_v16 = vpop.eup %5336  ;;  %v3906_v43 = vmul.f32 0.03125, %v3901_v50 }
0x2218   :  { %v3926_v38 = vmul.f32 %v3925_v52, %v3917_v42  ;;  %v3918_v47 = vmul.f32 %v5337_v16, %v3878_v17 }
0x2219   :  { %v3911_v15 = vadd.f32 1e-05, %v3906_v43 }
0x221a   :  { %v3927_v12 = vmul.f32 %v3925_v52, %v3918_v47  ;;  %v3935_v33 = vadd.f32 %v3934_v19, %v3926_v38 }
0x221b   :  { %5342 = vrsqrt.f32 %v3911_v15 }
0x221c   :  { %v3936_v24 = vadd.f32 %v3934_v19, %v3927_v12 }
0x221d   :  { %v5339_v37 = vpop.eup %5338 }
0x221e   :  { %v3919_v48 = vmul.f32 %v5339_v37, %v3879_v10  ;;  %v3944_v60 = vpack.c.bf16 %v3936_v24, %v3935_v33 }
0x221f   :  { %v5341_v25 = vpop.eup %5340 }
0x2220   :  { %v3920_v46 = vmul.f32 %v5341_v25, %v3880_v27  ;;  %4920 = vmatmul.mubr.msk.bf16.vlgmr.msra.gmra.mrb[116].mxu1 %vm238_vm8, %v3944_v60  ;;  %v3928_v56 = vmul.f32 %v3925_v52, %v3919_v48 }
0x2221   :  { %4923 = vmatprep.mubr.msk.bf16.mxu1 %vm5372_vm0, %v5371_v0 }
0x2222   :  { %v3929_v6 = vmul.f32 %v3925_v52, %v3920_v46  ;;  %v3937_v55 = vadd.f32 %v3934_v19, %v3928_v56 }
0x2224   :  { %v3938_v3 = vadd.f32 %v3934_v19, %v3929_v6 }
0x2225   :  { %v5343_v51 = vpop.eup %5342 }
0x2226   :  { %v3921_v44 = vmul.f32 %v5343_v51, %v3881_v62  ;;  %v3945_v17 = vpack.c.bf16 %v3938_v3, %v3937_v55 }
0x2228   :  { %4924 = vmatmul.mubr.msk.bf16.gmra.mrb[120].mxu1 %vm238_vm8, %v3945_v17  ;;  %v3930_v54 = vmul.f32 %v3925_v52, %v3921_v44 }
0x2229   :  { %4927 = vmatprep.mubr.msk.bf16.mxu1 %vm5372_vm0, %v5371_v0 }
0x222a   :  { %v3939_v57 = vadd.f32 %v3934_v19, %v3930_v54 }
0x222c   :  { %v3946_v61 = vpack.c.bf16 %v3939_v57, %v3939_v57 }
0x2230   :  { %4928 = vmatmul.mubr.msk.bf16.gmra.mrb[124].mxu1 %vm238_vm8, %v3946_v61 }
0x22f3   :  { %v3997_v9 = vpop.f32.mrb[116].mxu1 }
0x22f4   :  { %v3998_v20 = vadd.f32 %v4162_v4, %v3997_v9  ;;  %v4921_v23 = vpop.f32.mrb[117].mxu1 }
0x22f5   :  { %v4000_v10 = vpop.f32.mrb[118].mxu1 }
0x22f6   :  { %v4019_v13 = vsel %vm52_vm2, %v3998_v20, 0.0  ;;  %v4001_v27 = vadd.f32 %v4162_v4, %v4000_v10  ;;  %v4922_v1 = vpop.f32.mrb[119].mxu1 }
0x22f7   :  { %4032 = vst [vmem:[%s6163_s2] sm:$0xff] %v4019_v13 }
0x22f8   :  { %v4020_v7 = vsel %vm52_vm2, %v4001_v27, 0.0 }
0x22f9   :  { %4033 = vst [vmem:[%s6163_s2 + $0x8] sm:$0xff] %v4020_v7 }
0x22fb   :  { %v4005_v0 = vpop.f32.mrb[120].mxu1 }
0x22fc   :  { %v4006_v30 = vadd.f32 %v4162_v4, %v4005_v0  ;;  %v4925_v5 = vpop.f32.mrb[121].mxu1 }
0x22fd   :  { %v4008_v39 = vpop.f32.mrb[122].mxu1 }
0x22fe   :  { %v4021_v59 = vsel %vm52_vm2, %v4006_v30, 0.0  ;;  %v4009_v62 = vadd.f32 %v4162_v4, %v4008_v39  ;;  %v4926_v29 = vpop.f32.mrb[123].mxu1 }
0x22ff   :  { %4034 = vst [vmem:[%s6163_s2 + $0x10] sm:$0xff] %v4021_v59 }
0x2300   :  { %v4022_v22 = vsel %vm52_vm2, %v4009_v62, 0.0 }
0x2301   :  { %4035 = vst [vmem:[%s6163_s2 + $0x18] sm:$0xff] %v4022_v22 }
0x2303   :  { %v4013_v11 = vpop.f32.mrb[124].mxu1 }
0x2304   :  { %v4014_v2 = vadd.f32 %v4162_v4, %v4013_v11  ;;  %v4929_v53 = vpop.f32.mrb[125].mxu1 }
0x2305   :  { %v4016_v58 = vpop.f32.mrb[126].mxu1 }
0x2306   :  { %v4023_v40 = vsel %vm52_vm2, %v4014_v2, 0.0  ;;  %v4930_v18 = vpop.f32.mrb[127].mxu1 }
0x2307   :  { %v4024_v21 = vsel %vm68_vm1, %v4023_v40, 0.0 }
0x2308   :  { %4036 = vst [vmem:[%s6163_s2 + $0x20] sm:$0xff] %v4024_v21 }
0x2309   :  { %4043 = vsyncpa [#allocation3], 1 }

</bundles_post_ra>
